<compile_context>
chip_gen: v7x
topology: tpu7x:2x2x1
jax: 0.10.0
libtpu: 0.0.40
codegen_flags: <defaults>
</compile_context>

<pallas_src>
import functools
import math

import jax
import jax.numpy as jnp
from jax.experimental import pallas as pl
from jax.experimental.pallas import tpu as pltpu

F32 = jnp.float32
EPS = 1e-5
VMEM_LIMIT = 32 * 1024 * 1024


def _cp(*sem):
    return pltpu.CompilerParams(dimension_semantics=tuple(sem),
                                vmem_limit_bytes=VMEM_LIMIT)


def _pick(n, cap, align):
    """Largest tile <= cap that divides n and is a multiple of `align`;
    falls back to the full extent (always a legal block)."""
    if n <= cap:
        return n
    t = (cap // align) * align
    while t >= align:
        if n % t == 0:
            return t
        t -= align
    return n


# ---------------------------------------------------------------------------
# MXU matmul with fused BatchNorm batch-statistics epilogue
# ---------------------------------------------------------------------------

def _matmul_stats_kernel(a_ref, b_ref, o_ref, st_ref, acc_ref):
    @pl.when(pl.program_id(2) == 0)
    def _():
        acc_ref[...] = jnp.zeros_like(acc_ref)

    acc_ref[...] += jnp.dot(a_ref[...], b_ref[...],
                            preferred_element_type=jnp.float32)

    @pl.when(pl.program_id(2) == pl.num_programs(2) - 1)
    def _():
        acc = acc_ref[...]
        o_ref[...] = acc
        st_ref[0, 0:1, :] = jnp.sum(acc, axis=0, keepdims=True)
        st_ref[0, 1:2, :] = jnp.sum(acc * acc, axis=0, keepdims=True)


def matmul_stats(a, b):
    """(M,K)@(K,N); also returns per-column sum / sum-of-squares of the
    product (BatchNorm batch statistics) with zero extra HBM passes."""
    M, K = a.shape
    K2, N = b.shape
    assert K == K2
    tm = _pick(M, 512, 8)
    tk = _pick(K, 512, 128)
    tn = _pick(N, 256, 128)
    gm, gn, gk = M // tm, N // tn, K // tk
    out, st = pl.pallas_call(
        _matmul_stats_kernel,
        out_shape=(jax.ShapeDtypeStruct((M, N), F32),
                   jax.ShapeDtypeStruct((gm, 2, N), F32)),
        grid_spec=pltpu.PrefetchScalarGridSpec(
            num_scalar_prefetch=0,
            grid=(gm, gn, gk),
            in_specs=[pl.BlockSpec((tm, tk), lambda i, j, k: (i, k)),
                      pl.BlockSpec((tk, tn), lambda i, j, k: (k, j))],
            out_specs=[pl.BlockSpec((tm, tn), lambda i, j, k: (i, j)),
                       pl.BlockSpec((1, 2, tn), lambda i, j, k: (i, 0, j))],
            scratch_shapes=[pltpu.VMEM((tm, tn), F32)]),
        compiler_params=_cp("parallel", "parallel", "arbitrary"),
    )(a.astype(F32), b.astype(F32))
    return out, jnp.sum(st[:, 0, :], axis=0), jnp.sum(st[:, 1, :], axis=0)


# ---------------------------------------------------------------------------
# Direct kxk convolution (no im2col in HBM), fused BN-stats epilogue
# ---------------------------------------------------------------------------

def _conv_tap_kernel(x_ref, w_ref, o_ref, st_ref, acc_ref, *,
                     kh, kw, s, dil, Ho, Wo, Lw):
    HoLw = Ho * Lw
    first = True
    for i in range(kh):
        for j in range(kw):
            ai, aj = i * dil, j * dil
            pi, qi = ai % s, ai // s
            pj, qj = aj % s, aj // s
            off = qi * Lw + qj
            xwin = x_ref[0, pi * s + pj, off:off + HoLw, :]     # (Ho*Lw, Cin)
            contrib = jnp.dot(xwin, w_ref[i, j],
                              preferred_element_type=jnp.float32)
            if first:
                acc_ref[...] = contrib
                first = False
            else:
                acc_ref[...] += contrib
    acc = acc_ref[...]
    o_ref[0] = acc
    # mask the (wrap-around) padded-width columns out of the BN statistics
    rows = jax.lax.broadcasted_iota(jnp.int32, (HoLw, 1), 0)
    valid = (rows % Lw) < Wo
    masked = jnp.where(valid, acc, 0.0)
    st_ref[0, 0:1, :] = jnp.sum(masked, axis=0, keepdims=True)
    st_ref[0, 1:2, :] = jnp.sum(masked * masked, axis=0, keepdims=True)


def conv_kxk_raw(x, w, stride, pad, dilation):
    """Direct kxk conv, NHWC, Cin kept whole.  The padded input is stride-phase
    decomposed and spatially flattened so every tap is a contiguous row window
    (output computed at padded width Lw; garbage columns masked / later sliced)."""
    O, I, kh, kw = w.shape
    N, H, W, C = x.shape
    s, d = stride, dilation
    Ho = (H + 2 * pad - d * (kh - 1) - 1) // s + 1
    Wo = (W + 2 * pad - d * (kw - 1) - 1) // s + 1
    qh, qw = (d * (kh - 1)) // s, (d * (kw - 1)) // s
    Lh, Lw = Ho + qh, Wo + qw
    xp = jnp.pad(x.astype(F32), ((0, 0), (pad, pad), (pad, pad), (0, 0)))
    phases = []
    for r in range(s):
        for cph in range(s):
            ph = xp[:, r::s, cph::s, :][:, :Lh, :Lw, :]
            ph = jnp.pad(ph, ((0, 0), (0, Lh - ph.shape[1]),
                              (0, Lw - ph.shape[2]), (0, 0)))
            phases.append(ph)
    xph = jnp.stack(phases, axis=1).reshape(N, s * s, Lh * Lw, C)
    if qw:
        xph = jnp.pad(xph, ((0, 0), (0, 0), (0, qw), (0, 0)))
    Lflat = Lh * Lw + qw
    wt = jnp.transpose(w, (2, 3, 1, 0)).astype(F32)          # (kh, kw, I, O)
    t_o = _pick(O, 256, 128)
    HoLw = Ho * Lw
    out, st = pl.pallas_call(
        functools.partial(_conv_tap_kernel, kh=kh, kw=kw, s=s, dil=d,
                          Ho=Ho, Wo=Wo, Lw=Lw),
        out_shape=(jax.ShapeDtypeStruct((N, HoLw, O), F32),
                   jax.ShapeDtypeStruct((N, 2, O), F32)),
        grid_spec=pltpu.PrefetchScalarGridSpec(
            num_scalar_prefetch=0,
            grid=(O // t_o, N),
            in_specs=[pl.BlockSpec((1, s * s, Lflat, C),
                                   lambda co, n: (n, 0, 0, 0)),
                      pl.BlockSpec((kh, kw, C, t_o),
                                   lambda co, n: (0, 0, 0, co))],
            out_specs=[pl.BlockSpec((1, HoLw, t_o), lambda co, n: (n, 0, co)),
                       pl.BlockSpec((1, 2, t_o), lambda co, n: (n, 0, co))],
            scratch_shapes=[pltpu.VMEM((HoLw, t_o), F32)]),
        compiler_params=_cp("parallel", "parallel"),
    )(xph, wt)
    return out, jnp.sum(st[:, 0, :], axis=0), jnp.sum(st[:, 1, :], axis=0), \
        (N, Ho, Wo, Lw, O)


def conv1x1_raw(x, w, stride=1):
    if stride > 1:
        x = x[:, ::stride, ::stride, :]
    N, Ho, Wo, C = x.shape
    O = w.shape[0]
    out, csum, csq = matmul_stats(x.reshape(N * Ho * Wo, C), w[:, :, 0, 0].T)
    return out, csum, csq, (N, Ho, Wo, O)


def extract_patches(x, kh, kw, stride, pad, dilation):
    N, H, W, C = x.shape
    Ho = (H + 2 * pad - dilation * (kh - 1) - 1) // stride + 1
    Wo = (W + 2 * pad - dilation * (kw - 1) - 1) // stride + 1
    xp = jnp.pad(x, ((0, 0), (pad, pad), (pad, pad), (0, 0)))
    cols = []
    for i in range(kh):
        for j in range(kw):
            ii, jj = i * dilation, j * dilation
            cols.append(xp[:, ii: ii + stride * (Ho - 1) + 1: stride,
                           jj: jj + stride * (Wo - 1) + 1: stride, :])
    patches = jnp.stack(cols, axis=3)            # (N, Ho, Wo, kh*kw, C)
    return patches.reshape(N * Ho * Wo, kh * kw * C), (N, Ho, Wo)


def conv_im2col_raw(x, w, stride, pad, dilation):
    """Only used for the 7x7 stem (Cin=3): im2col keeps the MXU K-dim lane-dense."""
    O, I, kh, kw = w.shape
    patches, (N, Ho, Wo) = extract_patches(x.astype(F32), kh, kw, stride, pad,
                                           dilation)
    wmat = jnp.transpose(w, (2, 3, 1, 0)).reshape(kh * kw * I, O)
    out, csum, csq = matmul_stats(patches, wmat)
    return out, csum, csq, (N, Ho, Wo, O)


# ---------------------------------------------------------------------------
# Fused BatchNorm(scale/shift) + activation (+ residual) elementwise passes
# ---------------------------------------------------------------------------

def bn_scale_shift(csum, csq, rows, gamma, beta, eps=EPS):
    mean = csum / rows
    var = jnp.maximum(csq / rows - mean * mean, 0.0)    # guard f32 cancellation
    scale = gamma / jnp.sqrt(var + eps)
    return scale, beta - mean * scale


def _affine2d_kernel(x_ref, sc_ref, sh_ref, o_ref, *, act):
    y = x_ref[...] * sc_ref[...] + sh_ref[...]
    if act == "relu":
        y = jnp.maximum(y, 0.0)
    o_ref[...] = y


def _affine2d_add_kernel(x_ref, sc_ref, sh_ref, r_ref, o_ref, *, act):
    y = x_ref[...] * sc_ref[...] + sh_ref[...] + r_ref[...]
    if act == "relu":
        y = jnp.maximum(y, 0.0)
    o_ref[...] = y


def _affine2d_res_kernel(x_ref, sc_ref, sh_ref, r_ref, rsc_ref, rsh_ref, o_ref,
                         *, act):
    y = (x_ref[...] * sc_ref[...] + sh_ref[...]
         + r_ref[...] * rsc_ref[...] + rsh_ref[...])
    if act == "relu":
        y = jnp.maximum(y, 0.0)
    o_ref[...] = y


def affine2d(x, scale, shift, act="none", res=None, res_scale=None,
             res_shift=None):
    R, C = x.shape
    tr = _pick(R, 1024, 8)
    grid = (R // tr,)
    row_spec = pl.BlockSpec((tr, C), lambda i: (i, 0))
    vec_spec = pl.BlockSpec((1, C), lambda i: (0, 0))
    sc = scale.reshape(1, C).astype(F32)
    sh = shift.reshape(1, C).astype(F32)
    if res is None:
        return pl.pallas_call(
            functools.partial(_affine2d_kernel, act=act),
            out_shape=jax.ShapeDtypeStruct((R, C), F32),
            grid_spec=pltpu.PrefetchScalarGridSpec(
                num_scalar_prefetch=0, grid=grid,
                in_specs=[row_spec, vec_spec, vec_spec],
                out_specs=row_spec),
            compiler_params=_cp("parallel"),
        )(x, sc, sh)
    if res_scale is None:     # identity residual: BN affine + add + act
        return pl.pallas_call(
            functools.partial(_affine2d_add_kernel, act=act),
            out_shape=jax.ShapeDtypeStruct((R, C), F32),
            grid_spec=pltpu.PrefetchScalarGridSpec(
                num_scalar_prefetch=0, grid=grid,
                in_specs=[row_spec, vec_spec, vec_spec, row_spec],
                out_specs=row_spec),
            compiler_params=_cp("parallel"),
        )(x, sc, sh, res)
    return pl.pallas_call(
        functools.partial(_affine2d_res_kernel, act=act),
        out_shape=jax.ShapeDtypeStruct((R, C), F32),
        grid_spec=pltpu.PrefetchScalarGridSpec(
            num_scalar_prefetch=0, grid=grid,
            in_specs=[row_spec, vec_spec, vec_spec, row_spec, vec_spec, vec_spec],
            out_specs=row_spec),
        compiler_params=_cp("parallel"),
    )(x, sc, sh, res,
      res_scale.reshape(1, C).astype(F32), res_shift.reshape(1, C).astype(F32))


def _affine4d_kernel(x_ref, sc_ref, sh_ref, o_ref, *, act, Wo):
    y = x_ref[0, :, :Wo, :] * sc_ref[...] + sh_ref[...]
    if act == "relu":
        y = jnp.maximum(y, 0.0)
    o_ref[0] = y


def affine4d_slice(x4, scale, shift, Wo, act="relu"):
    """BN affine + act for the direct-conv path; also strips the padded width."""
    N, Ho, Lw, C = x4.shape
    return pl.pallas_call(
        functools.partial(_affine4d_kernel, act=act, Wo=Wo),
        out_shape=jax.ShapeDtypeStruct((N, Ho, Wo, C), F32),
        grid_spec=pltpu.PrefetchScalarGridSpec(
            num_scalar_prefetch=0, grid=(N,),
            in_specs=[pl.BlockSpec((1, Ho, Lw, C), lambda n: (n, 0, 0, 0)),
                      pl.BlockSpec((1, C), lambda n: (0, 0)),
                      pl.BlockSpec((1, C), lambda n: (0, 0))],
            out_specs=pl.BlockSpec((1, Ho, Wo, C), lambda n: (n, 0, 0, 0))),
        compiler_params=_cp("parallel"),
    )(x4, scale.reshape(1, C).astype(F32), shift.reshape(1, C).astype(F32))


def _affine_mean_kernel(x_ref, sc_ref, sh_ref, o_ref, ps_ref):
    y = jnp.maximum(x_ref[...] * sc_ref[...] + sh_ref[...], 0.0)
    o_ref[...] = y
    ps_ref[...] = jnp.sum(y, axis=1, keepdims=True)


def affine_relu_frame_mean(x, scale, shift, n, S, C):
    """Fused BN affine + ReLU with a per-frame spatial-sum epilogue: produces
    the activated feature map AND the TAM theta (adaptive_avg_pool2d) in one
    HBM pass (saves a full read of the conv1 output per TA-block)."""
    x3 = x.reshape(n, S, C)
    tS = _pick(S, 1024, 8)
    gS = S // tS
    y, ps = pl.pallas_call(
        _affine_mean_kernel,
        out_shape=(jax.ShapeDtypeStruct((n, S, C), F32),
                   jax.ShapeDtypeStruct((n, gS, C), F32)),
        grid_spec=pltpu.PrefetchScalarGridSpec(
            num_scalar_prefetch=0, grid=(n, gS),
            in_specs=[pl.BlockSpec((1, tS, C), lambda f, s: (f, s, 0)),
                      pl.BlockSpec((1, 1, C), lambda f, s: (0, 0, 0)),
                      pl.BlockSpec((1, 1, C), lambda f, s: (0, 0, 0))],
            out_specs=[pl.BlockSpec((1, tS, C), lambda f, s: (f, s, 0)),
                       pl.BlockSpec((1, 1, C), lambda f, s: (f, s, 0))]),
        compiler_params=_cp("parallel", "parallel"),
    )(x3, scale.reshape(1, 1, C).astype(F32), shift.reshape(1, 1, C).astype(F32))
    theta = jnp.sum(ps, axis=1) / float(S)               # (n, C) per-frame mean
    return y, theta


def conv_bn_act(x, p, stride=1, pad=0, dilation=1, act="relu"):
    """ConvModule: conv (bias=False) -> BN (training-mode batch stats) -> act."""
    O, I, kh, kw = p["w"].shape
    if kh == 1 and kw == 1:
        raw, cs, cq, (N, Ho, Wo, O) = conv1x1_raw(x, p["w"], stride)
        sc, sh = bn_scale_shift(cs, cq, N * Ho * Wo, p["gamma"], p["beta"])
        return affine2d(raw, sc, sh, act).reshape(N, Ho, Wo, O)
    if I < 32:     # stem
        raw, cs, cq, (N, Ho, Wo, O) = conv_im2col_raw(x, p["w"], stride, pad,
                                                      dilation)
        sc, sh = bn_scale_shift(cs, cq, N * Ho * Wo, p["gamma"], p["beta"])
        return affine2d(raw, sc, sh, act).reshape(N, Ho, Wo, O)
    raw, cs, cq, (N, Ho, Wo, Lw, O) = conv_kxk_raw(x, p["w"], stride, pad,
                                                   dilation)
    sc, sh = bn_scale_shift(cs, cq, N * Ho * Wo, p["gamma"], p["beta"])
    return affine4d_slice(raw.reshape(N, Ho, Lw, O), sc, sh, Wo, act)


# ---------------------------------------------------------------------------
# MaxPool 3x3 stride 2 pad 1 — single blocked kernel, 9-tap max in VMEM
# ---------------------------------------------------------------------------

def _maxpool_kernel(x_ref, o_ref, *, Ho, Wo):
    acc = None
    for i in range(3):
        for j in range(3):
            pi, qi = i % 2, i // 2
            pj, qj = j % 2, j // 2
            win = x_ref[0, pi * 2 + pj, qi:qi + Ho, qj:qj + Wo, :]
            acc = win if acc is None else jnp.maximum(acc, win)
    o_ref[0] = acc


def maxpool_3x3_s2_p1(x):
    N, H, W, C = x.shape
    Ho = (H + 2 - 3) // 2 + 1
    Wo = (W + 2 - 3) // 2 + 1
    Lh, Lw = Ho + 1, Wo + 1
    neg = jnp.finfo(F32).min
    xp = jnp.pad(x, ((0, 0), (1, 1), (1, 1), (0, 0)), constant_values=neg)
    phases = []
    for r in range(2):
        for cph in range(2):
            ph = xp[:, r::2, cph::2, :][:, :Lh, :Lw, :]
            ph = jnp.pad(ph, ((0, 0), (0, Lh - ph.shape[1]),
                              (0, Lw - ph.shape[2]), (0, 0)),
                         constant_values=neg)
            phases.append(ph)
    xph = jnp.stack(phases, axis=1)                     # (N, 4, Lh, Lw, C)
    return pl.pallas_call(
        functools.partial(_maxpool_kernel, Ho=Ho, Wo=Wo),
        out_shape=jax.ShapeDtypeStruct((N, Ho, Wo, C), F32),
        grid_spec=pltpu.PrefetchScalarGridSpec(
            num_scalar_prefetch=0, grid=(N,),
            in_specs=[pl.BlockSpec((1, 4, Lh, Lw, C),
                                   lambda n: (n, 0, 0, 0, 0))],
            out_specs=pl.BlockSpec((1, Ho, Wo, C), lambda n: (n, 0, 0, 0))),
        compiler_params=_cp("parallel"),
    )(xph)


# ---------------------------------------------------------------------------
# TAM: fused G+L branches kernel + single-pass adaptive temporal mix
# ---------------------------------------------------------------------------

def _tam_gl_kernel(thg_ref, lpat_ref, gw1_ref, gg_ref, gb_ref, gw2_ref,
                   lw1_ref, lg_ref, lb_ref, lw2_ref, ker_ref, la_ref):
    # ---- G branch: Linear -> BN1d -> ReLU -> Linear -> Softmax --------------
    g1 = jnp.dot(gw1_ref[...], thg_ref[...], preferred_element_type=jnp.float32)
    m = jnp.mean(g1, axis=1, keepdims=True)
    v = jnp.maximum(jnp.mean(g1 * g1, axis=1, keepdims=True) - m * m, 0.0)
    g1 = (g1 - m) * jax.lax.rsqrt(v + EPS) * gg_ref[...] + gb_ref[...]
    g1 = jnp.maximum(g1, 0.0)
    g2 = jnp.dot(gw2_ref[...], g1, preferred_element_type=jnp.float32)
    g2 = g2 - jnp.max(g2, axis=0, keepdims=True)
    e = jnp.exp(g2)
    ker_ref[...] = e / jnp.sum(e, axis=0, keepdims=True)
    # ---- L branch: Conv1d(k=3) -> BN1d -> ReLU -> Conv1d(k=1) -> Sigmoid ----
    l1 = jnp.dot(lpat_ref[...], lw1_ref[...], preferred_element_type=jnp.float32)
    m1 = jnp.mean(l1, axis=0, keepdims=True)
    v1 = jnp.maximum(jnp.mean(l1 * l1, axis=0, keepdims=True) - m1 * m1, 0.0)
    l1 = (l1 - m1) * jax.lax.rsqrt(v1 + EPS) * lg_ref[...] + lb_ref[...]
    l1 = jnp.maximum(l1, 0.0)
    l2 = jnp.dot(l1, lw2_ref[...], preferred_element_type=jnp.float32)
    la_ref[...] = 1.0 / (1.0 + jnp.exp(-l2))


def _tam_mix_kernel(x_ref, c_ref, o_ref):
    x = x_ref[0]                                    # (T, tS, c)
    c0 = c_ref[0, :, 0, :][:, None, :]
    c1 = c_ref[0, :, 1, :][:, None, :]
    c2 = c_ref[0, :, 2, :][:, None, :]
    xm = jnp.concatenate([x[:1], x[:-1]], axis=0)   # frame t-1 (edge clamped,
    xp = jnp.concatenate([x[1:], x[-1:]], axis=0)   #  coefficient is 0 there)
    o_ref[0] = c0 * xm + c1 * x + c2 * xp


def tam_forward(x, theta_frames, p, T):
    """TAM: x is (n, h, w, c) with n = num_batches * num_segments (frame-major);
    theta_frames is the per-frame spatial mean (n, c) (adaptive_avg_pool2d)."""
    n, h, w, c = x.shape
    nb = n // T
    S = h * w
    theta = theta_frames.reshape(nb, T, c)

    # tiny wrapper-side views so the fused kernel needs no in-kernel reshapes
    thg = jnp.transpose(theta, (1, 0, 2)).reshape(T, nb * c)
    thl = jnp.pad(theta, ((0, 0), (1, 1), (0, 0)))
    lpat = jnp.concatenate([thl[:, j:j + T, :] for j in range(3)],
                           axis=-1).reshape(nb * T, 3 * c)
    A = p["g_w1"].shape[0]
    K = p["g_w2"].shape[0]
    cb = p["l_w1"].shape[0]
    lw1 = jnp.transpose(p["l_w1"], (2, 1, 0)).reshape(3 * c, cb)
    lw2 = p["l_w2"][:, :, 0].T

    ker, la = pl.pallas_call(
        _tam_gl_kernel,
        out_shape=(jax.ShapeDtypeStruct((K, nb * c), F32),
                   jax.ShapeDtypeStruct((nb * T, c), F32)),
    )(thg, lpat, p["g_w1"], p["g_gamma"].reshape(A, 1),
      p["g_beta"].reshape(A, 1), p["g_w2"], lw1,
      p["l_gamma"].reshape(1, cb), p["l_beta"].reshape(1, cb), lw2)

    ker3 = ker.reshape(K, nb, c)
    la_pad = jnp.pad(la.reshape(nb, T, c), ((0, 0), (1, 1), (0, 0)))
    coef = jnp.stack([ker3[j][:, None, :] * la_pad[:, j:j + T, :]
                      for j in range(3)], axis=2)   # (nb, T, 3, c), tiny

    x4 = x.reshape(nb, T, S, c)
    tS = _pick(S, 512, 8)
    y = pl.pallas_call(
        _tam_mix_kernel,
        out_shape=jax.ShapeDtypeStruct((nb, T, S, c), F32),
        grid_spec=pltpu.PrefetchScalarGridSpec(
            num_scalar_prefetch=0, grid=(nb, S // tS),
            in_specs=[pl.BlockSpec((1, T, tS, c), lambda b, s: (b, 0, s, 0)),
                      pl.BlockSpec((1, T, 3, c), lambda b, s: (b, 0, 0, 0))],
            out_specs=pl.BlockSpec((1, T, tS, c), lambda b, s: (b, 0, s, 0))),
        compiler_params=_cp("parallel", "parallel"),
    )(x4, coef)
    return y.reshape(n, h, w, c)


# ---------------------------------------------------------------------------
# TA-Block (Bottleneck with TAM) and full network forward
# ---------------------------------------------------------------------------

def tablock_forward(x, p, stride, dilation, T):
    # conv1: 1x1 + BN + ReLU, with the TAM spatial mean fused into the affine
    raw1, s1, q1, (N, H1, W1, C1) = conv1x1_raw(x, p["conv1"]["w"], 1)
    sc1, sh1 = bn_scale_shift(s1, q1, N * H1 * W1,
                              p["conv1"]["gamma"], p["conv1"]["beta"])
    y1, theta = affine_relu_frame_mean(raw1, sc1, sh1, N, H1 * W1, C1)
    # TAM
    out = tam_forward(y1.reshape(N, H1, W1, C1), theta, p["tam"], T)
    # conv2: 3x3 (stride / dilation) + BN + ReLU
    out = conv_bn_act(out, p["conv2"], stride=stride, pad=dilation,
                      dilation=dilation, act="relu")
    # conv3: 1x1 + BN fused with residual add (+ downsample BN) + ReLU
    raw3, s3, q3, (N, Ho, Wo, O) = conv1x1_raw(out, p["conv3"]["w"], 1)
    R = N * Ho * Wo
    sc3, sh3 = bn_scale_shift(s3, q3, R, p["conv3"]["gamma"], p["conv3"]["beta"])
    if "down" in p:
        rawd, sd, qd, _ = conv1x1_raw(x, p["down"]["w"], stride)
        scd, shd = bn_scale_shift(sd, qd, R, p["down"]["gamma"],
                                  p["down"]["beta"])
        y = affine2d(raw3, sc3, sh3, act="relu", res=rawd,
                     res_scale=scd, res_shift=shd)
    else:
        y = affine2d(raw3, sc3, sh3, act="relu", res=x.reshape(R, O))
    return y.reshape(N, Ho, Wo, O)


def tanet_forward(params, x, *, num_segments, strides, dilations):
    """Matches TANetAdapt.forward: collapse leading dims, stem, maxpool, stages."""
    img_shape = x.shape[-3:]
    x = x.reshape((-1,) + img_shape)                   # (N, C, H, W), N = batch*T
    x = jnp.transpose(x, (0, 2, 3, 1)).astype(F32)     # NCHW -> NHWC
    x = conv_bn_act(x, params["stem"], stride=2, pad=3, act="relu")   # 7x7 s2 p3
    x = maxpool_3x3_s2_p1(x)
    for si, stage in enumerate(params["layers"]):
        for bi, blk in enumerate(stage):
            bstride = strides[si] if bi == 0 else 1
            x = tablock_forward(x, blk, bstride, dilations[si], num_segments)
    return jnp.transpose(x, (0, 3, 1, 2))              # back to NCHW


# ---------------------------------------------------------------------------
# Deterministic parameter construction (shapes per the module's __init__)
# ---------------------------------------------------------------------------

ARCH_SETTINGS = {50: (3, 4, 6, 3), 101: (3, 4, 23, 3), 152: (3, 8, 36, 3)}


def _kaiming_conv(key, cout, cin, kh, kw):
    fan_out = cout * kh * kw                 # kaiming_normal_, fan_out, relu
    return jax.random.normal(key, (cout, cin, kh, kw), F32) * math.sqrt(2.0 / fan_out)


def _conv_bn(key, cin, cout, k):
    return {"w": _kaiming_conv(key, cout, cin, k, k),
            "gamma": jnp.ones((cout,), F32),      # constant_init(norm, 1, bias=0)
            "beta": jnp.zeros((cout,), F32)}


def _tam_params(key, c, T, alpha=2, beta=4, kadapt=3, std=0.02):
    k1, k2, k3, k4 = jax.random.split(key, 4)
    cb = c // beta
    return {"g_w1": std * jax.random.normal(k1, (T * alpha, T), F32),
            "g_gamma": jnp.ones((T * alpha,), F32),
            "g_beta": jnp.zeros((T * alpha,), F32),
            "g_w2": std * jax.random.normal(k2, (kadapt, T * alpha), F32),
            "l_w1": std * jax.random.normal(k3, (cb, c, 3), F32),
            "l_gamma": jnp.ones((cb,), F32),
            "l_beta": jnp.zeros((cb,), F32),
            "l_w2": std * jax.random.normal(k4, (c, cb, 1), F32)}


def init_params(key, *, depth, num_stages, num_segments, strides, in_channels=3):
    stage_blocks = ARCH_SETTINGS[depth][:num_stages]
    keys = iter(jax.random.split(key, 1 + sum(stage_blocks) * 5))
    params = {"stem": _conv_bn(next(keys), in_channels, 64, 7), "layers": []}
    inplanes = 64
    for i, nblocks in enumerate(stage_blocks):
        planes = 64 * 2 ** i
        stage = []
        for b in range(nblocks):
            blk = {"conv1": _conv_bn(next(keys), inplanes, planes, 1),
                   "tam": _tam_params(next(keys), planes, num_segments),
                   "conv2": _conv_bn(next(keys), planes, planes, 3),
                   "conv3": _conv_bn(next(keys), planes, planes * 4, 1)}
            if b == 0 and (strides[i] != 1 or inplanes != planes * 4):
                blk["down"] = _conv_bn(next(keys), inplanes, planes * 4, 1)
            stage.append(blk)
            inplanes = planes * 4
        params["layers"].append(stage)
    return params


# ---------------------------------------------------------------------------

if __name__ == "__main__":
    depth = 50
    num_segments = 4
    num_stages = 1          # small instantiation: stage_blocks = (3,)
    strides = (1,)
    dilations = (1,)

    root = jax.random.PRNGKey(0)
    pkey, xkey = jax.random.split(root)
    params = init_params(pkey, depth=depth, num_stages=num_stages,
                         num_segments=num_segments, strides=strides)

    # video input (batches, segments, C, H, W); forward flattens to (-1, C, H, W)
    x = jax.random.normal(xkey, (1, num_segments, 3, 16, 16), F32)

    fwd = jax.jit(functools.partial(tanet_forward, num_segments=num_segments,
                                    strides=strides, dilations=dilations))
    out = fwd(params, x)
    out = jax.block_until_ready(out)
    assert out.shape == (num_segments, 256, 4, 4), out.shape
    assert bool(jnp.all(jnp.isfinite(out)))
    print("KERNEL_OK")
</pallas_src>

<mosaic_0001>
module attributes {stable_mosaic.version = 11 : i64} {
  func.func @_matmul_stats_kernel(%arg0: i32, %arg1: i32, %arg2: i32, %arg3: memref<256x147xf32, #tpu.memory_space<vmem>>, %arg4: memref<147x64xf32, #tpu.memory_space<vmem>>, %arg5: memref<256x64xf32, #tpu.memory_space<vmem>>, %arg6: memref<1x2x64xf32, #tpu.memory_space<vmem>>, %arg7: memref<256x64xf32, #tpu.memory_space<vmem>>) attributes {dimension_semantics = [#tpu.dimension_semantics<parallel>, #tpu.dimension_semantics<parallel>, #tpu.dimension_semantics<arbitrary>], iteration_bounds = array<i64: 1, 1, 1>, scalar_prefetch = 0 : i64, scratch_operands = 1 : i64, tpu.core_type = #tpu.core_type<tc>, window_params = [{transform_indices = @transform_0, window_bounds = array<i64: 256, 147>}, {transform_indices = @transform_1, window_bounds = array<i64: 147, 64>}, {transform_indices = @transform_2, window_bounds = array<i64: 256, 64>}, {transform_indices = @transform_3, window_bounds = array<i64: 1, 2, 64>}]} {
    %c0_i32 = arith.constant 0 : i32
    %0 = arith.cmpi eq, %arg2, %c0_i32 : i32
    %1 = arith.extui %0 : i1 to i32
    %c0_i32_0 = arith.constant 0 : i32
    %2 = arith.cmpi ne, %1, %c0_i32_0 : i32
    scf.if %2 {
      %cst_10 = arith.constant 0.000000e+00 : f32
      %12 = vector.broadcast %cst_10 : f32 to vector<256x64xf32>
      %c0_11 = arith.constant 0 : index
      %c0_12 = arith.constant 0 : index
      %13 = vector.load %arg7[%c0_11, %c0_12] : memref<256x64xf32, #tpu.memory_space<vmem>>, vector<256x64xf32>
      tpu.vector_store %arg7[%c0_11, %c0_12], %12 {strides = array<i32>} : memref<256x64xf32, #tpu.memory_space<vmem>>, vector<256x64xf32>,
    } else {
    }
    %c0 = arith.constant 0 : index
    %c0_1 = arith.constant 0 : index
    %3 = vector.load %arg7[%c0, %c0_1] : memref<256x64xf32, #tpu.memory_space<vmem>>, vector<256x64xf32>
    %c0_2 = arith.constant 0 : index
    %c0_3 = arith.constant 0 : index
    %4 = vector.load %arg3[%c0_2, %c0_3] : memref<256x147xf32, #tpu.memory_space<vmem>>, vector<256x147xf32>
    %c0_4 = arith.constant 0 : index
    %c0_5 = arith.constant 0 : index
    %5 = vector.load %arg4[%c0_4, %c0_5] : memref<147x64xf32, #tpu.memory_space<vmem>>, vector<147x64xf32>
    %cst = arith.constant dense<0.000000e+00> : vector<256x64xf32>
    %6 = tpu.matmul %4, %5, %cst {dimension_numbers = #tpu.dot_dimension_numbers<[1], [0], [0], [1], [0, 0, 1, 1], [], []>} : vector<256x147xf32>, vector<147x64xf32>, vector<256x64xf32> -> vector<256x64xf32>
    %7 = arith.addf %3, %6 : vector<256x64xf32>
    %c0_6 = arith.constant 0 : index
    %c0_7 = arith.constant 0 : index
    %8 = vector.load %arg7[%c0_6, %c0_7] : memref<256x64xf32, #tpu.memory_space<vmem>>, vector<256x64xf32>
    tpu.vector_store %arg7[%c0_6, %c0_7], %7 {strides = array<i32>} : memref<256x64xf32, #tpu.memory_space<vmem>>, vector<256x64xf32>,
    %c0_i32_8 = arith.constant 0 : i32
    %9 = arith.cmpi eq, %arg2, %c0_i32_8 : i32
    %10 = arith.extui %9 : i1 to i32
    %c0_i32_9 = arith.constant 0 : i32
    %11 = arith.cmpi ne, %10, %c0_i32_9 : i32
    scf.if %11 {
      %c0_10 = arith.constant 0 : index
      %c0_11 = arith.constant 0 : index
      %12 = vector.load %arg7[%c0_10, %c0_11] : memref<256x64xf32, #tpu.memory_space<vmem>>, vector<256x64xf32>
      %c0_12 = arith.constant 0 : index
      %c0_13 = arith.constant 0 : index
      %13 = vector.load %arg5[%c0_12, %c0_13] : memref<256x64xf32, #tpu.memory_space<vmem>>, vector<256x64xf32>
      tpu.vector_store %arg5[%c0_12, %c0_13], %12 {strides = array<i32>} : memref<256x64xf32, #tpu.memory_space<vmem>>, vector<256x64xf32>,
      %cst_14 = arith.constant dense<0.000000e+00> : vector<64xf32>
      %14 = vector.multi_reduction <add>, %12, %cst_14 [0] : vector<256x64xf32> to vector<64xf32>
      %15 = vector.shape_cast %14 : vector<64xf32> to vector<1x64xf32>
      %c0_15 = arith.constant 0 : index
      %c0_16 = arith.constant 0 : index
      %c0_17 = arith.constant 0 : index
      %16 = vector.load %arg6[%c0_15, %c0_16, %c0_17] : memref<1x2x64xf32, #tpu.memory_space<vmem>>, vector<1x1x64xf32>
      %17 = vector.shape_cast %16 : vector<1x1x64xf32> to vector<1x64xf32>
      %18 = vector.shape_cast %15 : vector<1x64xf32> to vector<1x1x64xf32>
      tpu.vector_store %arg6[%c0_15, %c0_16, %c0_17], %18 {strides = array<i32>} : memref<1x2x64xf32, #tpu.memory_space<vmem>>, vector<1x1x64xf32>,
      %19 = arith.mulf %12, %12 : vector<256x64xf32>
      %cst_18 = arith.constant dense<0.000000e+00> : vector<64xf32>
      %20 = vector.multi_reduction <add>, %19, %cst_18 [0] : vector<256x64xf32> to vector<64xf32>
      %21 = vector.shape_cast %20 : vector<64xf32> to vector<1x64xf32>
      %c0_19 = arith.constant 0 : index
      %c1 = arith.constant 1 : index
      %c0_20 = arith.constant 0 : index
      %22 = vector.load %arg6[%c0_19, %c1, %c0_20] : memref<1x2x64xf32, #tpu.memory_space<vmem>>, vector<1x1x64xf32>
      %23 = vector.shape_cast %22 : vector<1x1x64xf32> to vector<1x64xf32>
      %24 = vector.shape_cast %21 : vector<1x64xf32> to vector<1x1x64xf32>
      tpu.vector_store %arg6[%c0_19, %c1, %c0_20], %24 {strides = array<i32>} : memref<1x2x64xf32, #tpu.memory_space<vmem>>, vector<1x1x64xf32>,
    } else {
    }
    return
  }
  func.func @transform_0(%arg0: i32, %arg1: i32, %arg2: i32) -> (i32, i32) {
    %c0_i32 = arith.constant 0 : i32
    return %arg0, %arg2 : i32, i32
  }
  func.func @transform_1(%arg0: i32, %arg1: i32, %arg2: i32) -> (i32, i32) {
    %c0_i32 = arith.constant 0 : i32
    return %arg2, %arg1 : i32, i32
  }
  func.func @transform_2(%arg0: i32, %arg1: i32, %arg2: i32) -> (i32, i32) {
    %c0_i32 = arith.constant 0 : i32
    return %arg0, %arg1 : i32, i32
  }
  func.func @transform_3(%arg0: i32, %arg1: i32, %arg2: i32) -> (i32, i32, i32) {
    %c0_i32 = arith.constant 0 : i32
    %c0_i32_0 = arith.constant 0 : i32
    return %arg0, %c0_i32, %arg1 : i32, i32, i32
  }
}

module attributes {stable_mosaic.version = 11 : i64} {
  func.func @_affine2d_kernel(%arg0: i32, %arg1: memref<256x64xf32, #tpu.memory_space<vmem>>, %arg2: memref<1x64xf32, #tpu.memory_space<vmem>>, %arg3: memref<1x64xf32, #tpu.memory_space<vmem>>, %arg4: memref<256x64xf32, #tpu.memory_space<vmem>>) attributes {dimension_semantics = [#tpu.dimension_semantics<parallel>], iteration_bounds = array<i64: 1>, scalar_prefetch = 0 : i64, scratch_operands = 0 : i64, tpu.core_type = #tpu.core_type<tc>, window_params = [{transform_indices = @transform_0, window_bounds = array<i64: 256, 64>}, {pipeline_mode = #tpu.pipeline_mode<synchronous>, transform_indices = @transform_1, window_bounds = array<i64: 1, 64>}, {pipeline_mode = #tpu.pipeline_mode<synchronous>, transform_indices = @transform_2, window_bounds = array<i64: 1, 64>}, {transform_indices = @transform_3, window_bounds = array<i64: 256, 64>}]} {
    %c0 = arith.constant 0 : index
    %c0_0 = arith.constant 0 : index
    %0 = vector.load %arg1[%c0, %c0_0] : memref<256x64xf32, #tpu.memory_space<vmem>>, vector<256x64xf32>
    %c0_1 = arith.constant 0 : index
    %c0_2 = arith.constant 0 : index
    %1 = vector.load %arg2[%c0_1, %c0_2] : memref<1x64xf32, #tpu.memory_space<vmem>>, vector<1x64xf32>
    %2 = vector.broadcast %1 : vector<1x64xf32> to vector<256x64xf32>
    %3 = arith.mulf %0, %2 : vector<256x64xf32>
    %c0_3 = arith.constant 0 : index
    %c0_4 = arith.constant 0 : index
    %4 = vector.load %arg3[%c0_3, %c0_4] : memref<1x64xf32, #tpu.memory_space<vmem>>, vector<1x64xf32>
    %5 = vector.broadcast %4 : vector<1x64xf32> to vector<256x64xf32>
    %6 = arith.addf %3, %5 : vector<256x64xf32>
    %cst = arith.constant 0.000000e+00 : f32
    %7 = vector.broadcast %cst : f32 to vector<256x64xf32>
    %8 = arith.maximumf %6, %7 : vector<256x64xf32>
    %c0_5 = arith.constant 0 : index
    %c0_6 = arith.constant 0 : index
    %9 = vector.load %arg4[%c0_5, %c0_6] : memref<256x64xf32, #tpu.memory_space<vmem>>, vector<256x64xf32>
    tpu.vector_store %arg4[%c0_5, %c0_6], %8 {strides = array<i32>} : memref<256x64xf32, #tpu.memory_space<vmem>>, vector<256x64xf32>,
    return
  }
  func.func @transform_0(%arg0: i32) -> (i32, i32) {
    %c0_i32 = arith.constant 0 : i32
    %c0_i32_0 = arith.constant 0 : i32
    return %arg0, %c0_i32 : i32, i32
  }
  func.func @transform_1(%arg0: i32) -> (i32, i32) {
    %c0_i32 = arith.constant 0 : i32
    %c0_i32_0 = arith.constant 0 : i32
    %c0_i32_1 = arith.constant 0 : i32
    return %c0_i32, %c0_i32_0 : i32, i32
  }
  func.func @transform_2(%arg0: i32) -> (i32, i32) {
    %c0_i32 = arith.constant 0 : i32
    %c0_i32_0 = arith.constant 0 : i32
    %c0_i32_1 = arith.constant 0 : i32
    return %c0_i32, %c0_i32_0 : i32, i32
  }
  func.func @transform_3(%arg0: i32) -> (i32, i32) {
    %c0_i32 = arith.constant 0 : i32
    %c0_i32_0 = arith.constant 0 : i32
    return %arg0, %c0_i32 : i32, i32
  }
}

module attributes {stable_mosaic.version = 11 : i64} {
  func.func @_maxpool_kernel(%arg0: i32, %arg1: memref<1x4x5x5x64xf32, #tpu.memory_space<vmem>>, %arg2: memref<1x4x4x64xf32, #tpu.memory_space<vmem>>) attributes {dimension_semantics = [#tpu.dimension_semantics<parallel>], iteration_bounds = array<i64: 4>, scalar_prefetch = 0 : i64, scratch_operands = 0 : i64, tpu.core_type = #tpu.core_type<tc>, window_params = [{transform_indices = @transform_0, window_bounds = array<i64: 1, 4, 5, 5, 64>}, {transform_indices = @transform_1, window_bounds = array<i64: 1, 4, 4, 64>}]} {
    %c0 = arith.constant 0 : index
    %c0_0 = arith.constant 0 : index
    %c0_1 = arith.constant 0 : index
    %c0_2 = arith.constant 0 : index
    %c0_3 = arith.constant 0 : index
    %0 = vector.load %arg1[%c0, %c0_0, %c0_1, %c0_2, %c0_3] : memref<1x4x5x5x64xf32, #tpu.memory_space<vmem>>, vector<1x1x4x4x64xf32>
    %1 = vector.shape_cast %0 : vector<1x1x4x4x64xf32> to vector<4x4x64xf32>
    %c0_4 = arith.constant 0 : index
    %c1 = arith.constant 1 : index
    %c0_5 = arith.constant 0 : index
    %c0_6 = arith.constant 0 : index
    %c0_7 = arith.constant 0 : index
    %2 = vector.load %arg1[%c0_4, %c1, %c0_5, %c0_6, %c0_7] : memref<1x4x5x5x64xf32, #tpu.memory_space<vmem>>, vector<1x1x4x4x64xf32>
    %3 = vector.shape_cast %2 : vector<1x1x4x4x64xf32> to vector<4x4x64xf32>
    %4 = arith.maximumf %1, %3 : vector<4x4x64xf32>
    %c0_8 = arith.constant 0 : index
    %c0_9 = arith.constant 0 : index
    %c0_10 = arith.constant 0 : index
    %c1_11 = arith.constant 1 : index
    %c0_12 = arith.constant 0 : index
    %5 = vector.load %arg1[%c0_8, %c0_9, %c0_10, %c1_11, %c0_12] : memref<1x4x5x5x64xf32, #tpu.memory_space<vmem>>, vector<1x1x4x4x64xf32>
    %6 = vector.shape_cast %5 : vector<1x1x4x4x64xf32> to vector<4x4x64xf32>
    %7 = arith.maximumf %4, %6 : vector<4x4x64xf32>
    %c0_13 = arith.constant 0 : index
    %c2 = arith.constant 2 : index
    %c0_14 = arith.constant 0 : index
    %c0_15 = arith.constant 0 : index
    %c0_16 = arith.constant 0 : index
    %8 = vector.load %arg1[%c0_13, %c2, %c0_14, %c0_15, %c0_16] : memref<1x4x5x5x64xf32, #tpu.memory_space<vmem>>, vector<1x1x4x4x64xf32>
    %9 = vector.shape_cast %8 : vector<1x1x4x4x64xf32> to vector<4x4x64xf32>
    %10 = arith.maximumf %7, %9 : vector<4x4x64xf32>
    %c0_17 = arith.constant 0 : index
    %c3 = arith.constant 3 : index
    %c0_18 = arith.constant 0 : index
    %c0_19 = arith.constant 0 : index
    %c0_20 = arith.constant 0 : index
    %11 = vector.load %arg1[%c0_17, %c3, %c0_18, %c0_19, %c0_20] : memref<1x4x5x5x64xf32, #tpu.memory_space<vmem>>, vector<1x1x4x4x64xf32>
    %12 = vector.shape_cast %11 : vector<1x1x4x4x64xf32> to vector<4x4x64xf32>
    %13 = arith.maximumf %10, %12 : vector<4x4x64xf32>
    %c0_21 = arith.constant 0 : index
    %c2_22 = arith.constant 2 : index
    %c0_23 = arith.constant 0 : index
    %c1_24 = arith.constant 1 : index
    %c0_25 = arith.constant 0 : index
    %14 = vector.load %arg1[%c0_21, %c2_22, %c0_23, %c1_24, %c0_25] : memref<1x4x5x5x64xf32, #tpu.memory_space<vmem>>, vector<1x1x4x4x64xf32>
    %15 = vector.shape_cast %14 : vector<1x1x4x4x64xf32> to vector<4x4x64xf32>
    %16 = arith.maximumf %13, %15 : vector<4x4x64xf32>
    %c0_26 = arith.constant 0 : index
    %c0_27 = arith.constant 0 : index
    %c1_28 = arith.constant 1 : index
    %c0_29 = arith.constant 0 : index
    %c0_30 = arith.constant 0 : index
    %17 = vector.load %arg1[%c0_26, %c0_27, %c1_28, %c0_29, %c0_30] : memref<1x4x5x5x64xf32, #tpu.memory_space<vmem>>, vector<1x1x4x4x64xf32>
    %18 = vector.shape_cast %17 : vector<1x1x4x4x64xf32> to vector<4x4x64xf32>
    %19 = arith.maximumf %16, %18 : vector<4x4x64xf32>
    %c0_31 = arith.constant 0 : index
    %c1_32 = arith.constant 1 : index
    %c1_33 = arith.constant 1 : index
    %c0_34 = arith.constant 0 : index
    %c0_35 = arith.constant 0 : index
    %20 = vector.load %arg1[%c0_31, %c1_32, %c1_33, %c0_34, %c0_35] : memref<1x4x5x5x64xf32, #tpu.memory_space<vmem>>, vector<1x1x4x4x64xf32>
    %21 = vector.shape_cast %20 : vector<1x1x4x4x64xf32> to vector<4x4x64xf32>
    %22 = arith.maximumf %19, %21 : vector<4x4x64xf32>
    %c0_36 = arith.constant 0 : index
    %c0_37 = arith.constant 0 : index
    %c1_38 = arith.constant 1 : index
    %c1_39 = arith.constant 1 : index
    %c0_40 = arith.constant 0 : index
    %23 = vector.load %arg1[%c0_36, %c0_37, %c1_38, %c1_39, %c0_40] : memref<1x4x5x5x64xf32, #tpu.memory_space<vmem>>, vector<1x1x4x4x64xf32>
    %24 = vector.shape_cast %23 : vector<1x1x4x4x64xf32> to vector<4x4x64xf32>
    %25 = arith.maximumf %22, %24 : vector<4x4x64xf32>
    %c0_41 = arith.constant 0 : index
    %c0_42 = arith.constant 0 : index
    %c0_43 = arith.constant 0 : index
    %c0_44 = arith.constant 0 : index
    %26 = vector.load %arg2[%c0_41, %c0_42, %c0_43, %c0_44] : memref<1x4x4x64xf32, #tpu.memory_space<vmem>>, vector<1x4x4x64xf32>
    %27 = vector.shape_cast %26 : vector<1x4x4x64xf32> to vector<4x4x64xf32>
    %28 = vector.shape_cast %25 : vector<4x4x64xf32> to vector<1x4x4x64xf32>
    tpu.vector_store %arg2[%c0_41, %c0_42, %c0_43, %c0_44], %28 {strides = array<i32>} : memref<1x4x4x64xf32, #tpu.memory_space<vmem>>, vector<1x4x4x64xf32>,
    return
  }
  func.func @transform_0(%arg0: i32) -> (i32, i32, i32, i32, i32) {
    %c0_i32 = arith.constant 0 : i32
    %c0_i32_0 = arith.constant 0 : i32
    %c0_i32_1 = arith.constant 0 : i32
    %c0_i32_2 = arith.constant 0 : i32
    %c0_i32_3 = arith.constant 0 : i32
    return %arg0, %c0_i32, %c0_i32_0, %c0_i32_1, %c0_i32_2 : i32, i32, i32, i32, i32
  }
  func.func @transform_1(%arg0: i32) -> (i32, i32, i32, i32) {
    %c0_i32 = arith.constant 0 : i32
    %c0_i32_0 = arith.constant 0 : i32
    %c0_i32_1 = arith.constant 0 : i32
    %c0_i32_2 = arith.constant 0 : i32
    return %arg0, %c0_i32, %c0_i32_0, %c0_i32_1 : i32, i32, i32, i32
  }
}

module attributes {stable_mosaic.version = 11 : i64} {
  func.func @_matmul_stats_kernel(%arg0: i32, %arg1: i32, %arg2: i32, %arg3: memref<64x64xf32, #tpu.memory_space<vmem>>, %arg4: memref<64x256xf32, #tpu.memory_space<vmem>>, %arg5: memref<64x256xf32, #tpu.memory_space<vmem>>, %arg6: memref<1x2x256xf32, #tpu.memory_space<vmem>>, %arg7: memref<64x256xf32, #tpu.memory_space<vmem>>) attributes {dimension_semantics = [#tpu.dimension_semantics<parallel>, #tpu.dimension_semantics<parallel>, #tpu.dimension_semantics<arbitrary>], iteration_bounds = array<i64: 1, 1, 1>, scalar_prefetch = 0 : i64, scratch_operands = 1 : i64, tpu.core_type = #tpu.core_type<tc>, window_params = [{transform_indices = @transform_0, window_bounds = array<i64: 64, 64>}, {transform_indices = @transform_1, window_bounds = array<i64: 64, 256>}, {transform_indices = @transform_2, window_bounds = array<i64: 64, 256>}, {transform_indices = @transform_3, window_bounds = array<i64: 1, 2, 256>}]} {
    %c0_i32 = arith.constant 0 : i32
    %0 = arith.cmpi eq, %arg2, %c0_i32 : i32
    %1 = arith.extui %0 : i1 to i32
    %c0_i32_0 = arith.constant 0 : i32
    %2 = arith.cmpi ne, %1, %c0_i32_0 : i32
    scf.if %2 {
      %cst_10 = arith.constant 0.000000e+00 : f32
      %12 = vector.broadcast %cst_10 : f32 to vector<64x256xf32>
      %c0_11 = arith.constant 0 : index
      %c0_12 = arith.constant 0 : index
      %13 = vector.load %arg7[%c0_11, %c0_12] : memref<64x256xf32, #tpu.memory_space<vmem>>, vector<64x256xf32>
      tpu.vector_store %arg7[%c0_11, %c0_12], %12 {strides = array<i32>} : memref<64x256xf32, #tpu.memory_space<vmem>>, vector<64x256xf32>,
    } else {
    }
    %c0 = arith.constant 0 : index
    %c0_1 = arith.constant 0 : index
    %3 = vector.load %arg7[%c0, %c0_1] : memref<64x256xf32, #tpu.memory_space<vmem>>, vector<64x256xf32>
    %c0_2 = arith.constant 0 : index
    %c0_3 = arith.constant 0 : index
    %4 = vector.load %arg3[%c0_2, %c0_3] : memref<64x64xf32, #tpu.memory_space<vmem>>, vector<64x64xf32>
    %c0_4 = arith.constant 0 : index
    %c0_5 = arith.constant 0 : index
    %5 = vector.load %arg4[%c0_4, %c0_5] : memref<64x256xf32, #tpu.memory_space<vmem>>, vector<64x256xf32>
    %cst = arith.constant dense<0.000000e+00> : vector<64x256xf32>
    %6 = tpu.matmul %4, %5, %cst {dimension_numbers = #tpu.dot_dimension_numbers<[1], [0], [0], [1], [0, 0, 1, 1], [], []>} : vector<64x64xf32>, vector<64x256xf32>, vector<64x256xf32> -> vector<64x256xf32>
    %7 = arith.addf %3, %6 : vector<64x256xf32>
    %c0_6 = arith.constant 0 : index
    %c0_7 = arith.constant 0 : index
    %8 = vector.load %arg7[%c0_6, %c0_7] : memref<64x256xf32, #tpu.memory_space<vmem>>, vector<64x256xf32>
    tpu.vector_store %arg7[%c0_6, %c0_7], %7 {strides = array<i32>} : memref<64x256xf32, #tpu.memory_space<vmem>>, vector<64x256xf32>,
    %c0_i32_8 = arith.constant 0 : i32
    %9 = arith.cmpi eq, %arg2, %c0_i32_8 : i32
    %10 = arith.extui %9 : i1 to i32
    %c0_i32_9 = arith.constant 0 : i32
    %11 = arith.cmpi ne, %10, %c0_i32_9 : i32
    scf.if %11 {
      %c0_10 = arith.constant 0 : index
      %c0_11 = arith.constant 0 : index
      %12 = vector.load %arg7[%c0_10, %c0_11] : memref<64x256xf32, #tpu.memory_space<vmem>>, vector<64x256xf32>
      %c0_12 = arith.constant 0 : index
      %c0_13 = arith.constant 0 : index
      %13 = vector.load %arg5[%c0_12, %c0_13] : memref<64x256xf32, #tpu.memory_space<vmem>>, vector<64x256xf32>
      tpu.vector_store %arg5[%c0_12, %c0_13], %12 {strides = array<i32>} : memref<64x256xf32, #tpu.memory_space<vmem>>, vector<64x256xf32>,
      %cst_14 = arith.constant dense<0.000000e+00> : vector<256xf32>
      %14 = vector.multi_reduction <add>, %12, %cst_14 [0] : vector<64x256xf32> to vector<256xf32>
      %15 = vector.shape_cast %14 : vector<256xf32> to vector<1x256xf32>
      %c0_15 = arith.constant 0 : index
      %c0_16 = arith.constant 0 : index
      %c0_17 = arith.constant 0 : index
      %16 = vector.load %arg6[%c0_15, %c0_16, %c0_17] : memref<1x2x256xf32, #tpu.memory_space<vmem>>, vector<1x1x256xf32>
      %17 = vector.shape_cast %16 : vector<1x1x256xf32> to vector<1x256xf32>
      %18 = vector.shape_cast %15 : vector<1x256xf32> to vector<1x1x256xf32>
      tpu.vector_store %arg6[%c0_15, %c0_16, %c0_17], %18 {strides = array<i32>} : memref<1x2x256xf32, #tpu.memory_space<vmem>>, vector<1x1x256xf32>,
      %19 = arith.mulf %12, %12 : vector<64x256xf32>
      %cst_18 = arith.constant dense<0.000000e+00> : vector<256xf32>
      %20 = vector.multi_reduction <add>, %19, %cst_18 [0] : vector<64x256xf32> to vector<256xf32>
      %21 = vector.shape_cast %20 : vector<256xf32> to vector<1x256xf32>
      %c0_19 = arith.constant 0 : index
      %c1 = arith.constant 1 : index
      %c0_20 = arith.constant 0 : index
      %22 = vector.load %arg6[%c0_19, %c1, %c0_20] : memref<1x2x256xf32, #tpu.memory_space<vmem>>, vector<1x1x256xf32>
      %23 = vector.shape_cast %22 : vector<1x1x256xf32> to vector<1x256xf32>
      %24 = vector.shape_cast %21 : vector<1x256xf32> to vector<1x1x256xf32>
      tpu.vector_store %arg6[%c0_19, %c1, %c0_20], %24 {strides = array<i32>} : memref<1x2x256xf32, #tpu.memory_space<vmem>>, vector<1x1x256xf32>,
    } else {
    }
    return
  }
  func.func @transform_0(%arg0: i32, %arg1: i32, %arg2: i32) -> (i32, i32) {
    %c0_i32 = arith.constant 0 : i32
    return %arg0, %arg2 : i32, i32
  }
  func.func @transform_1(%arg0: i32, %arg1: i32, %arg2: i32) -> (i32, i32) {
    %c0_i32 = arith.constant 0 : i32
    return %arg2, %arg1 : i32, i32
  }
  func.func @transform_2(%arg0: i32, %arg1: i32, %arg2: i32) -> (i32, i32) {
    %c0_i32 = arith.constant 0 : i32
    return %arg0, %arg1 : i32, i32
  }
  func.func @transform_3(%arg0: i32, %arg1: i32, %arg2: i32) -> (i32, i32, i32) {
    %c0_i32 = arith.constant 0 : i32
    %c0_i32_0 = arith.constant 0 : i32
    return %arg0, %c0_i32, %arg1 : i32, i32, i32
  }
}

module attributes {stable_mosaic.version = 11 : i64} {
  func.func @_matmul_stats_kernel(%arg0: i32, %arg1: i32, %arg2: i32, %arg3: memref<64x64xf32, #tpu.memory_space<vmem>>, %arg4: memref<64x64xf32, #tpu.memory_space<vmem>>, %arg5: memref<64x64xf32, #tpu.memory_space<vmem>>, %arg6: memref<1x2x64xf32, #tpu.memory_space<vmem>>, %arg7: memref<64x64xf32, #tpu.memory_space<vmem>>) attributes {dimension_semantics = [#tpu.dimension_semantics<parallel>, #tpu.dimension_semantics<parallel>, #tpu.dimension_semantics<arbitrary>], iteration_bounds = array<i64: 1, 1, 1>, scalar_prefetch = 0 : i64, scratch_operands = 1 : i64, tpu.core_type = #tpu.core_type<tc>, window_params = [{transform_indices = @transform_0, window_bounds = array<i64: 64, 64>}, {transform_indices = @transform_1, window_bounds = array<i64: 64, 64>}, {transform_indices = @transform_2, window_bounds = array<i64: 64, 64>}, {transform_indices = @transform_3, window_bounds = array<i64: 1, 2, 64>}]} {
    %c0_i32 = arith.constant 0 : i32
    %0 = arith.cmpi eq, %arg2, %c0_i32 : i32
    %1 = arith.extui %0 : i1 to i32
    %c0_i32_0 = arith.constant 0 : i32
    %2 = arith.cmpi ne, %1, %c0_i32_0 : i32
    scf.if %2 {
      %cst_10 = arith.constant 0.000000e+00 : f32
      %12 = vector.broadcast %cst_10 : f32 to vector<64x64xf32>
      %c0_11 = arith.constant 0 : index
      %c0_12 = arith.constant 0 : index
      %13 = vector.load %arg7[%c0_11, %c0_12] : memref<64x64xf32, #tpu.memory_space<vmem>>, vector<64x64xf32>
      tpu.vector_store %arg7[%c0_11, %c0_12], %12 {strides = array<i32>} : memref<64x64xf32, #tpu.memory_space<vmem>>, vector<64x64xf32>,
    } else {
    }
    %c0 = arith.constant 0 : index
    %c0_1 = arith.constant 0 : index
    %3 = vector.load %arg7[%c0, %c0_1] : memref<64x64xf32, #tpu.memory_space<vmem>>, vector<64x64xf32>
    %c0_2 = arith.constant 0 : index
    %c0_3 = arith.constant 0 : index
    %4 = vector.load %arg3[%c0_2, %c0_3] : memref<64x64xf32, #tpu.memory_space<vmem>>, vector<64x64xf32>
    %c0_4 = arith.constant 0 : index
    %c0_5 = arith.constant 0 : index
    %5 = vector.load %arg4[%c0_4, %c0_5] : memref<64x64xf32, #tpu.memory_space<vmem>>, vector<64x64xf32>
    %cst = arith.constant dense<0.000000e+00> : vector<64x64xf32>
    %6 = tpu.matmul %4, %5, %cst {dimension_numbers = #tpu.dot_dimension_numbers<[1], [0], [0], [1], [0, 0, 1, 1], [], []>} : vector<64x64xf32>, vector<64x64xf32>, vector<64x64xf32> -> vector<64x64xf32>
    %7 = arith.addf %3, %6 : vector<64x64xf32>
    %c0_6 = arith.constant 0 : index
    %c0_7 = arith.constant 0 : index
    %8 = vector.load %arg7[%c0_6, %c0_7] : memref<64x64xf32, #tpu.memory_space<vmem>>, vector<64x64xf32>
    tpu.vector_store %arg7[%c0_6, %c0_7], %7 {strides = array<i32>} : memref<64x64xf32, #tpu.memory_space<vmem>>, vector<64x64xf32>,
    %c0_i32_8 = arith.constant 0 : i32
    %9 = arith.cmpi eq, %arg2, %c0_i32_8 : i32
    %10 = arith.extui %9 : i1 to i32
    %c0_i32_9 = arith.constant 0 : i32
    %11 = arith.cmpi ne, %10, %c0_i32_9 : i32
    scf.if %11 {
      %c0_10 = arith.constant 0 : index
      %c0_11 = arith.constant 0 : index
      %12 = vector.load %arg7[%c0_10, %c0_11] : memref<64x64xf32, #tpu.memory_space<vmem>>, vector<64x64xf32>
      %c0_12 = arith.constant 0 : index
      %c0_13 = arith.constant 0 : index
      %13 = vector.load %arg5[%c0_12, %c0_13] : memref<64x64xf32, #tpu.memory_space<vmem>>, vector<64x64xf32>
      tpu.vector_store %arg5[%c0_12, %c0_13], %12 {strides = array<i32>} : memref<64x64xf32, #tpu.memory_space<vmem>>, vector<64x64xf32>,
      %cst_14 = arith.constant dense<0.000000e+00> : vector<64xf32>
      %14 = vector.multi_reduction <add>, %12, %cst_14 [0] : vector<64x64xf32> to vector<64xf32>
      %15 = vector.shape_cast %14 : vector<64xf32> to vector<1x64xf32>
      %c0_15 = arith.constant 0 : index
      %c0_16 = arith.constant 0 : index
      %c0_17 = arith.constant 0 : index
      %16 = vector.load %arg6[%c0_15, %c0_16, %c0_17] : memref<1x2x64xf32, #tpu.memory_space<vmem>>, vector<1x1x64xf32>
      %17 = vector.shape_cast %16 : vector<1x1x64xf32> to vector<1x64xf32>
      %18 = vector.shape_cast %15 : vector<1x64xf32> to vector<1x1x64xf32>
      tpu.vector_store %arg6[%c0_15, %c0_16, %c0_17], %18 {strides = array<i32>} : memref<1x2x64xf32, #tpu.memory_space<vmem>>, vector<1x1x64xf32>,
      %19 = arith.mulf %12, %12 : vector<64x64xf32>
      %cst_18 = arith.constant dense<0.000000e+00> : vector<64xf32>
      %20 = vector.multi_reduction <add>, %19, %cst_18 [0] : vector<64x64xf32> to vector<64xf32>
      %21 = vector.shape_cast %20 : vector<64xf32> to vector<1x64xf32>
      %c0_19 = arith.constant 0 : index
      %c1 = arith.constant 1 : index
      %c0_20 = arith.constant 0 : index
      %22 = vector.load %arg6[%c0_19, %c1, %c0_20] : memref<1x2x64xf32, #tpu.memory_space<vmem>>, vector<1x1x64xf32>
      %23 = vector.shape_cast %22 : vector<1x1x64xf32> to vector<1x64xf32>
      %24 = vector.shape_cast %21 : vector<1x64xf32> to vector<1x1x64xf32>
      tpu.vector_store %arg6[%c0_19, %c1, %c0_20], %24 {strides = array<i32>} : memref<1x2x64xf32, #tpu.memory_space<vmem>>, vector<1x1x64xf32>,
    } else {
    }
    return
  }
  func.func @transform_0(%arg0: i32, %arg1: i32, %arg2: i32) -> (i32, i32) {
    %c0_i32 = arith.constant 0 : i32
    return %arg0, %arg2 : i32, i32
  }
  func.func @transform_1(%arg0: i32, %arg1: i32, %arg2: i32) -> (i32, i32) {
    %c0_i32 = arith.constant 0 : i32
    return %arg2, %arg1 : i32, i32
  }
  func.func @transform_2(%arg0: i32, %arg1: i32, %arg2: i32) -> (i32, i32) {
    %c0_i32 = arith.constant 0 : i32
    return %arg0, %arg1 : i32, i32
  }
  func.func @transform_3(%arg0: i32, %arg1: i32, %arg2: i32) -> (i32, i32, i32) {
    %c0_i32 = arith.constant 0 : i32
    %c0_i32_0 = arith.constant 0 : i32
    return %arg0, %c0_i32, %arg1 : i32, i32, i32
  }
}

module attributes {stable_mosaic.version = 11 : i64} {
  func.func @_affine_mean_kernel(%arg0: i32, %arg1: i32, %arg2: memref<1x16x64xf32, #tpu.memory_space<vmem>>, %arg3: memref<1x1x64xf32, #tpu.memory_space<vmem>>, %arg4: memref<1x1x64xf32, #tpu.memory_space<vmem>>, %arg5: memref<1x16x64xf32, #tpu.memory_space<vmem>>, %arg6: memref<1x1x64xf32, #tpu.memory_space<vmem>>) attributes {dimension_semantics = [#tpu.dimension_semantics<parallel>, #tpu.dimension_semantics<parallel>], iteration_bounds = array<i64: 4, 1>, scalar_prefetch = 0 : i64, scratch_operands = 0 : i64, tpu.core_type = #tpu.core_type<tc>, window_params = [{transform_indices = @transform_0, window_bounds = array<i64: 1, 16, 64>}, {pipeline_mode = #tpu.pipeline_mode<synchronous>, transform_indices = @transform_1, window_bounds = array<i64: 1, 1, 64>}, {pipeline_mode = #tpu.pipeline_mode<synchronous>, transform_indices = @transform_2, window_bounds = array<i64: 1, 1, 64>}, {transform_indices = @transform_3, window_bounds = array<i64: 1, 16, 64>}, {transform_indices = @transform_4, window_bounds = array<i64: 1, 1, 64>}]} {
    %c0 = arith.constant 0 : index
    %c0_0 = arith.constant 0 : index
    %c0_1 = arith.constant 0 : index
    %0 = vector.load %arg2[%c0, %c0_0, %c0_1] : memref<1x16x64xf32, #tpu.memory_space<vmem>>, vector<1x16x64xf32>
    %c0_2 = arith.constant 0 : index
    %c0_3 = arith.constant 0 : index
    %c0_4 = arith.constant 0 : index
    %1 = vector.load %arg3[%c0_2, %c0_3, %c0_4] : memref<1x1x64xf32, #tpu.memory_space<vmem>>, vector<1x1x64xf32>
    %2 = vector.broadcast %1 : vector<1x1x64xf32> to vector<1x16x64xf32>
    %3 = arith.mulf %0, %2 : vector<1x16x64xf32>
    %c0_5 = arith.constant 0 : index
    %c0_6 = arith.constant 0 : index
    %c0_7 = arith.constant 0 : index
    %4 = vector.load %arg4[%c0_5, %c0_6, %c0_7] : memref<1x1x64xf32, #tpu.memory_space<vmem>>, vector<1x1x64xf32>
    %5 = vector.broadcast %4 : vector<1x1x64xf32> to vector<1x16x64xf32>
    %6 = arith.addf %3, %5 : vector<1x16x64xf32>
    %cst = arith.constant 0.000000e+00 : f32
    %7 = vector.broadcast %cst : f32 to vector<1x16x64xf32>
    %8 = arith.maximumf %6, %7 : vector<1x16x64xf32>
    %c0_8 = arith.constant 0 : index
    %c0_9 = arith.constant 0 : index
    %c0_10 = arith.constant 0 : index
    %9 = vector.load %arg5[%c0_8, %c0_9, %c0_10] : memref<1x16x64xf32, #tpu.memory_space<vmem>>, vector<1x16x64xf32>
    tpu.vector_store %arg5[%c0_8, %c0_9, %c0_10], %8 {strides = array<i32>} : memref<1x16x64xf32, #tpu.memory_space<vmem>>, vector<1x16x64xf32>,
    %cst_11 = arith.constant dense<0.000000e+00> : vector<1x64xf32>
    %10 = vector.multi_reduction <add>, %8, %cst_11 [1] : vector<1x16x64xf32> to vector<1x64xf32>
    %11 = vector.shape_cast %10 : vector<1x64xf32> to vector<1x1x64xf32>
    %c0_12 = arith.constant 0 : index
    %c0_13 = arith.constant 0 : index
    %c0_14 = arith.constant 0 : index
    %12 = vector.load %arg6[%c0_12, %c0_13, %c0_14] : memref<1x1x64xf32, #tpu.memory_space<vmem>>, vector<1x1x64xf32>
    tpu.vector_store %arg6[%c0_12, %c0_13, %c0_14], %11 {strides = array<i32>} : memref<1x1x64xf32, #tpu.memory_space<vmem>>, vector<1x1x64xf32>,
    return
  }
  func.func @transform_0(%arg0: i32, %arg1: i32) -> (i32, i32, i32) {
    %c0_i32 = arith.constant 0 : i32
    %c0_i32_0 = arith.constant 0 : i32
    return %arg0, %arg1, %c0_i32 : i32, i32, i32
  }
  func.func @transform_1(%arg0: i32, %arg1: i32) -> (i32, i32, i32) {
    %c0_i32 = arith.constant 0 : i32
    %c0_i32_0 = arith.constant 0 : i32
    %c0_i32_1 = arith.constant 0 : i32
    %c0_i32_2 = arith.constant 0 : i32
    return %c0_i32, %c0_i32_0, %c0_i32_1 : i32, i32, i32
  }
  func.func @transform_2(%arg0: i32, %arg1: i32) -> (i32, i32, i32) {
    %c0_i32 = arith.constant 0 : i32
    %c0_i32_0 = arith.constant 0 : i32
    %c0_i32_1 = arith.constant 0 : i32
    %c0_i32_2 = arith.constant 0 : i32
    return %c0_i32, %c0_i32_0, %c0_i32_1 : i32, i32, i32
  }
  func.func @transform_3(%arg0: i32, %arg1: i32) -> (i32, i32, i32) {
    %c0_i32 = arith.constant 0 : i32
    %c0_i32_0 = arith.constant 0 : i32
    return %arg0, %arg1, %c0_i32 : i32, i32, i32
  }
  func.func @transform_4(%arg0: i32, %arg1: i32) -> (i32, i32, i32) {
    %c0_i32 = arith.constant 0 : i32
    %c0_i32_0 = arith.constant 0 : i32
    return %arg0, %arg1, %c0_i32 : i32, i32, i32
  }
}

module attributes {stable_mosaic.version = 11 : i64} {
  func.func @_tam_gl_kernel(%arg0: memref<4x64xf32, #tpu.memory_space<vmem>>, %arg1: memref<4x192xf32, #tpu.memory_space<vmem>>, %arg2: memref<8x4xf32, #tpu.memory_space<vmem>>, %arg3: memref<8x1xf32, #tpu.memory_space<vmem>>, %arg4: memref<8x1xf32, #tpu.memory_space<vmem>>, %arg5: memref<3x8xf32, #tpu.memory_space<vmem>>, %arg6: memref<192x16xf32, #tpu.memory_space<vmem>>, %arg7: memref<1x16xf32, #tpu.memory_space<vmem>>, %arg8: memref<1x16xf32, #tpu.memory_space<vmem>>, %arg9: memref<16x64xf32, #tpu.memory_space<vmem>>, %arg10: memref<3x64xf32, #tpu.memory_space<vmem>>, %arg11: memref<4x64xf32, #tpu.memory_space<vmem>>) attributes {dimension_semantics = [], scalar_prefetch = 0 : i64, scratch_operands = 0 : i64, tpu.core_type = #tpu.core_type<tc>} {
    %c0 = arith.constant 0 : index
    %c0_0 = arith.constant 0 : index
    %0 = vector.load %arg2[%c0, %c0_0] : memref<8x4xf32, #tpu.memory_space<vmem>>, vector<8x4xf32>
    %c0_1 = arith.constant 0 : index
    %c0_2 = arith.constant 0 : index
    %1 = vector.load %arg0[%c0_1, %c0_2] : memref<4x64xf32, #tpu.memory_space<vmem>>, vector<4x64xf32>
    %cst = arith.constant dense<0.000000e+00> : vector<8x64xf32>
    %2 = tpu.matmul %0, %1, %cst {dimension_numbers = #tpu.dot_dimension_numbers<[1], [0], [0], [1], [0, 0, 1, 1], [], []>} : vector<8x4xf32>, vector<4x64xf32>, vector<8x64xf32> -> vector<8x64xf32>
    %cst_3 = arith.constant dense<0.000000e+00> : vector<8xf32>
    %3 = vector.multi_reduction <add>, %2, %cst_3 [1] : vector<8x64xf32> to vector<8xf32>
    %4 = vector.shape_cast %3 : vector<8xf32> to vector<8x1xf32>
    %cst_4 = arith.constant 6.400000e+01 : f32
    %5 = vector.broadcast %cst_4 : f32 to vector<8x1xf32>
    %6 = arith.divf %4, %5 : vector<8x1xf32>
    %7 = arith.mulf %2, %2 : vector<8x64xf32>
    %cst_5 = arith.constant dense<0.000000e+00> : vector<8xf32>
    %8 = vector.multi_reduction <add>, %7, %cst_5 [1] : vector<8x64xf32> to vector<8xf32>
    %9 = vector.shape_cast %8 : vector<8xf32> to vector<8x1xf32>
    %cst_6 = arith.constant 6.400000e+01 : f32
    %10 = vector.broadcast %cst_6 : f32 to vector<8x1xf32>
    %11 = arith.divf %9, %10 : vector<8x1xf32>
    %12 = arith.mulf %6, %6 : vector<8x1xf32>
    %13 = arith.subf %11, %12 : vector<8x1xf32>
    %cst_7 = arith.constant 0.000000e+00 : f32
    %14 = vector.broadcast %cst_7 : f32 to vector<8x1xf32>
    %15 = arith.maximumf %13, %14 : vector<8x1xf32>
    %16 = vector.broadcast %6 : vector<8x1xf32> to vector<8x64xf32>
    %17 = arith.subf %2, %16 : vector<8x64xf32>
    %cst_8 = arith.constant 9.99999974E-6 : f32
    %18 = vector.broadcast %cst_8 : f32 to vector<8x1xf32>
    %19 = arith.addf %15, %18 : vector<8x1xf32>
    %20 = math.rsqrt %19 : vector<8x1xf32>
    %21 = vector.broadcast %20 : vector<8x1xf32> to vector<8x64xf32>
    %22 = arith.mulf %17, %21 : vector<8x64xf32>
    %c0_9 = arith.constant 0 : index
    %c0_10 = arith.constant 0 : index
    %23 = vector.load %arg3[%c0_9, %c0_10] : memref<8x1xf32, #tpu.memory_space<vmem>>, vector<8x1xf32>
    %24 = vector.broadcast %23 : vector<8x1xf32> to vector<8x64xf32>
    %25 = arith.mulf %22, %24 : vector<8x64xf32>
    %c0_11 = arith.constant 0 : index
    %c0_12 = arith.constant 0 : index
    %26 = vector.load %arg4[%c0_11, %c0_12] : memref<8x1xf32, #tpu.memory_space<vmem>>, vector<8x1xf32>
    %27 = vector.broadcast %26 : vector<8x1xf32> to vector<8x64xf32>
    %28 = arith.addf %25, %27 : vector<8x64xf32>
    %cst_13 = arith.constant 0.000000e+00 : f32
    %29 = vector.broadcast %cst_13 : f32 to vector<8x64xf32>
    %30 = arith.maximumf %28, %29 : vector<8x64xf32>
    %c0_14 = arith.constant 0 : index
    %c0_15 = arith.constant 0 : index
    %31 = vector.load %arg5[%c0_14, %c0_15] : memref<3x8xf32, #tpu.memory_space<vmem>>, vector<3x8xf32>
    %cst_16 = arith.constant dense<0.000000e+00> : vector<3x64xf32>
    %32 = tpu.matmul %31, %30, %cst_16 {dimension_numbers = #tpu.dot_dimension_numbers<[1], [0], [0], [1], [0, 0, 1, 1], [], []>} : vector<3x8xf32>, vector<8x64xf32>, vector<3x64xf32> -> vector<3x64xf32>
    %cst_17 = arith.constant dense<0xFF800000> : vector<64xf32>
    %33 = vector.multi_reduction <maximumf>, %32, %cst_17 [0] : vector<3x64xf32> to vector<64xf32>
    %34 = vector.shape_cast %33 : vector<64xf32> to vector<1x64xf32>
    %35 = vector.broadcast %34 : vector<1x64xf32> to vector<3x64xf32>
    %36 = arith.subf %32, %35 : vector<3x64xf32>
    %37 = math.exp %36 : vector<3x64xf32>
    %cst_18 = arith.constant dense<0.000000e+00> : vector<64xf32>
    %38 = vector.multi_reduction <add>, %37, %cst_18 [0] : vector<3x64xf32> to vector<64xf32>
    %39 = vector.shape_cast %38 : vector<64xf32> to vector<1x64xf32>
    %40 = vector.broadcast %39 : vector<1x64xf32> to vector<3x64xf32>
    %41 = arith.divf %37, %40 : vector<3x64xf32>
    %c0_19 = arith.constant 0 : index
    %c0_20 = arith.constant 0 : index
    %42 = vector.load %arg10[%c0_19, %c0_20] : memref<3x64xf32, #tpu.memory_space<vmem>>, vector<3x64xf32>
    tpu.vector_store %arg10[%c0_19, %c0_20], %41 {strides = array<i32>} : memref<3x64xf32, #tpu.memory_space<vmem>>, vector<3x64xf32>,
    %c0_21 = arith.constant 0 : index
    %c0_22 = arith.constant 0 : index
    %43 = vector.load %arg1[%c0_21, %c0_22] : memref<4x192xf32, #tpu.memory_space<vmem>>, vector<4x192xf32>
    %c0_23 = arith.constant 0 : index
    %c0_24 = arith.constant 0 : index
    %44 = vector.load %arg6[%c0_23, %c0_24] : memref<192x16xf32, #tpu.memory_space<vmem>>, vector<192x16xf32>
    %cst_25 = arith.constant dense<0.000000e+00> : vector<4x16xf32>
    %45 = tpu.matmul %43, %44, %cst_25 {dimension_numbers = #tpu.dot_dimension_numbers<[1], [0], [0], [1], [0, 0, 1, 1], [], []>} : vector<4x192xf32>, vector<192x16xf32>, vector<4x16xf32> -> vector<4x16xf32>
    %cst_26 = arith.constant dense<0.000000e+00> : vector<16xf32>
    %46 = vector.multi_reduction <add>, %45, %cst_26 [0] : vector<4x16xf32> to vector<16xf32>
    %47 = vector.shape_cast %46 : vector<16xf32> to vector<1x16xf32>
    %cst_27 = arith.constant 4.000000e+00 : f32
    %48 = vector.broadcast %cst_27 : f32 to vector<1x16xf32>
    %49 = arith.divf %47, %48 : vector<1x16xf32>
    %50 = arith.mulf %45, %45 : vector<4x16xf32>
    %cst_28 = arith.constant dense<0.000000e+00> : vector<16xf32>
    %51 = vector.multi_reduction <add>, %50, %cst_28 [0] : vector<4x16xf32> to vector<16xf32>
    %52 = vector.shape_cast %51 : vector<16xf32> to vector<1x16xf32>
    %cst_29 = arith.constant 4.000000e+00 : f32
    %53 = vector.broadcast %cst_29 : f32 to vector<1x16xf32>
    %54 = arith.divf %52, %53 : vector<1x16xf32>
    %55 = arith.mulf %49, %49 : vector<1x16xf32>
    %56 = arith.subf %54, %55 : vector<1x16xf32>
    %cst_30 = arith.constant 0.000000e+00 : f32
    %57 = vector.broadcast %cst_30 : f32 to vector<1x16xf32>
    %58 = arith.maximumf %56, %57 : vector<1x16xf32>
    %59 = vector.broadcast %49 : vector<1x16xf32> to vector<4x16xf32>
    %60 = arith.subf %45, %59 : vector<4x16xf32>
    %cst_31 = arith.constant 9.99999974E-6 : f32
    %61 = vector.broadcast %cst_31 : f32 to vector<1x16xf32>
    %62 = arith.addf %58, %61 : vector<1x16xf32>
    %63 = math.rsqrt %62 : vector<1x16xf32>
    %64 = vector.broadcast %63 : vector<1x16xf32> to vector<4x16xf32>
    %65 = arith.mulf %60, %64 : vector<4x16xf32>
    %c0_32 = arith.constant 0 : index
    %c0_33 = arith.constant 0 : index
    %66 = vector.load %arg7[%c0_32, %c0_33] : memref<1x16xf32, #tpu.memory_space<vmem>>, vector<1x16xf32>
    %67 = vector.broadcast %66 : vector<1x16xf32> to vector<4x16xf32>
    %68 = arith.mulf %65, %67 : vector<4x16xf32>
    %c0_34 = arith.constant 0 : index
    %c0_35 = arith.constant 0 : index
    %69 = vector.load %arg8[%c0_34, %c0_35] : memref<1x16xf32, #tpu.memory_space<vmem>>, vector<1x16xf32>
    %70 = vector.broadcast %69 : vector<1x16xf32> to vector<4x16xf32>
    %71 = arith.addf %68, %70 : vector<4x16xf32>
    %cst_36 = arith.constant 0.000000e+00 : f32
    %72 = vector.broadcast %cst_36 : f32 to vector<4x16xf32>
    %73 = arith.maximumf %71, %72 : vector<4x16xf32>
    %c0_37 = arith.constant 0 : index
    %c0_38 = arith.constant 0 : index
    %74 = vector.load %arg9[%c0_37, %c0_38] : memref<16x64xf32, #tpu.memory_space<vmem>>, vector<16x64xf32>
    %cst_39 = arith.constant dense<0.000000e+00> : vector<4x64xf32>
    %75 = tpu.matmul %73, %74, %cst_39 {dimension_numbers = #tpu.dot_dimension_numbers<[1], [0], [0], [1], [0, 0, 1, 1], [], []>} : vector<4x16xf32>, vector<16x64xf32>, vector<4x64xf32> -> vector<4x64xf32>
    %cst_40 = arith.constant 0.000000e+00 : f32
    %76 = vector.broadcast %cst_40 : f32 to vector<4x64xf32>
    %77 = arith.subf %76, %75 : vector<4x64xf32>
    %78 = math.exp %77 : vector<4x64xf32>
    %cst_41 = arith.constant 1.000000e+00 : f32
    %79 = vector.broadcast %cst_41 : f32 to vector<4x64xf32>
    %80 = arith.addf %79, %78 : vector<4x64xf32>
    %cst_42 = arith.constant 1.000000e+00 : f32
    %81 = vector.broadcast %cst_42 : f32 to vector<4x64xf32>
    %82 = arith.divf %81, %80 : vector<4x64xf32>
    %c0_43 = arith.constant 0 : index
    %c0_44 = arith.constant 0 : index
    %83 = vector.load %arg11[%c0_43, %c0_44] : memref<4x64xf32, #tpu.memory_space<vmem>>, vector<4x64xf32>
    tpu.vector_store %arg11[%c0_43, %c0_44], %82 {strides = array<i32>} : memref<4x64xf32, #tpu.memory_space<vmem>>, vector<4x64xf32>,
    return
  }
}

module attributes {stable_mosaic.version = 11 : i64} {
  func.func @_tam_mix_kernel(%arg0: i32, %arg1: i32, %arg2: memref<1x4x16x64xf32, #tpu.memory_space<vmem>>, %arg3: memref<1x4x3x64xf32, #tpu.memory_space<vmem>>, %arg4: memref<1x4x16x64xf32, #tpu.memory_space<vmem>>) attributes {dimension_semantics = [#tpu.dimension_semantics<parallel>, #tpu.dimension_semantics<parallel>], iteration_bounds = array<i64: 1, 1>, scalar_prefetch = 0 : i64, scratch_operands = 0 : i64, tpu.core_type = #tpu.core_type<tc>, window_params = [{transform_indices = @transform_0, window_bounds = array<i64: 1, 4, 16, 64>}, {transform_indices = @transform_1, window_bounds = array<i64: 1, 4, 3, 64>}, {transform_indices = @transform_2, window_bounds = array<i64: 1, 4, 16, 64>}]} {
    %c0 = arith.constant 0 : index
    %c0_0 = arith.constant 0 : index
    %c0_1 = arith.constant 0 : index
    %c0_2 = arith.constant 0 : index
    %0 = vector.load %arg2[%c0, %c0_0, %c0_1, %c0_2] : memref<1x4x16x64xf32, #tpu.memory_space<vmem>>, vector<1x4x16x64xf32>
    %1 = vector.shape_cast %0 : vector<1x4x16x64xf32> to vector<4x16x64xf32>
    %c0_3 = arith.constant 0 : index
    %c0_4 = arith.constant 0 : index
    %c0_5 = arith.constant 0 : index
    %c0_6 = arith.constant 0 : index
    %2 = vector.load %arg3[%c0_3, %c0_4, %c0_5, %c0_6] : memref<1x4x3x64xf32, #tpu.memory_space<vmem>>, vector<1x4x1x64xf32>
    %3 = vector.shape_cast %2 : vector<1x4x1x64xf32> to vector<4x64xf32>
    %4 = vector.shape_cast %3 : vector<4x64xf32> to vector<4x1x64xf32>
    %c0_7 = arith.constant 0 : index
    %c0_8 = arith.constant 0 : index
    %c1 = arith.constant 1 : index
    %c0_9 = arith.constant 0 : index
    %5 = vector.load %arg3[%c0_7, %c0_8, %c1, %c0_9] : memref<1x4x3x64xf32, #tpu.memory_space<vmem>>, vector<1x4x1x64xf32>
    %6 = vector.shape_cast %5 : vector<1x4x1x64xf32> to vector<4x64xf32>
    %7 = vector.shape_cast %6 : vector<4x64xf32> to vector<4x1x64xf32>
    %c0_10 = arith.constant 0 : index
    %c0_11 = arith.constant 0 : index
    %c2 = arith.constant 2 : index
    %c0_12 = arith.constant 0 : index
    %8 = vector.load %arg3[%c0_10, %c0_11, %c2, %c0_12] : memref<1x4x3x64xf32, #tpu.memory_space<vmem>>, vector<1x4x1x64xf32>
    %9 = vector.shape_cast %8 : vector<1x4x1x64xf32> to vector<4x64xf32>
    %10 = vector.shape_cast %9 : vector<4x64xf32> to vector<4x1x64xf32>
    %11 = vector.extract_strided_slice %1 {offsets = [0, 0, 0], sizes = [1, 16, 64], strides = [1, 1, 1]} : vector<4x16x64xf32> to vector<1x16x64xf32>
    %12 = vector.extract_strided_slice %1 {offsets = [0, 0, 0], sizes = [3, 16, 64], strides = [1, 1, 1]} : vector<4x16x64xf32> to vector<3x16x64xf32>
    %13 = tpu.concatenate %11, %12 in 0 : vector<1x16x64xf32>, vector<3x16x64xf32> -> vector<4x16x64xf32>
    %14 = vector.extract_strided_slice %1 {offsets = [1, 0, 0], sizes = [3, 16, 64], strides = [1, 1, 1]} : vector<4x16x64xf32> to vector<3x16x64xf32>
    %15 = vector.extract_strided_slice %1 {offsets = [3, 0, 0], sizes = [1, 16, 64], strides = [1, 1, 1]} : vector<4x16x64xf32> to vector<1x16x64xf32>
    %16 = tpu.concatenate %14, %15 in 0 : vector<3x16x64xf32>, vector<1x16x64xf32> -> vector<4x16x64xf32>
    %17 = vector.broadcast %4 : vector<4x1x64xf32> to vector<4x16x64xf32>
    %18 = arith.mulf %17, %13 : vector<4x16x64xf32>
    %19 = vector.broadcast %7 : vector<4x1x64xf32> to vector<4x16x64xf32>
    %20 = arith.mulf %19, %1 : vector<4x16x64xf32>
    %21 = arith.addf %18, %20 : vector<4x16x64xf32>
    %22 = vector.broadcast %10 : vector<4x1x64xf32> to vector<4x16x64xf32>
    %23 = arith.mulf %22, %16 : vector<4x16x64xf32>
    %24 = arith.addf %21, %23 : vector<4x16x64xf32>
    %c0_13 = arith.constant 0 : index
    %c0_14 = arith.constant 0 : index
    %c0_15 = arith.constant 0 : index
    %c0_16 = arith.constant 0 : index
    %25 = vector.load %arg4[%c0_13, %c0_14, %c0_15, %c0_16] : memref<1x4x16x64xf32, #tpu.memory_space<vmem>>, vector<1x4x16x64xf32>
    %26 = vector.shape_cast %25 : vector<1x4x16x64xf32> to vector<4x16x64xf32>
    %27 = vector.shape_cast %24 : vector<4x16x64xf32> to vector<1x4x16x64xf32>
    tpu.vector_store %arg4[%c0_13, %c0_14, %c0_15, %c0_16], %27 {strides = array<i32>} : memref<1x4x16x64xf32, #tpu.memory_space<vmem>>, vector<1x4x16x64xf32>,
    return
  }
  func.func @transform_0(%arg0: i32, %arg1: i32) -> (i32, i32, i32, i32) {
    %c0_i32 = arith.constant 0 : i32
    %c0_i32_0 = arith.constant 0 : i32
    %c0_i32_1 = arith.constant 0 : i32
    return %arg0, %c0_i32, %arg1, %c0_i32_0 : i32, i32, i32, i32
  }
  func.func @transform_1(%arg0: i32, %arg1: i32) -> (i32, i32, i32, i32) {
    %c0_i32 = arith.constant 0 : i32
    %c0_i32_0 = arith.constant 0 : i32
    %c0_i32_1 = arith.constant 0 : i32
    %c0_i32_2 = arith.constant 0 : i32
    return %arg0, %c0_i32, %c0_i32_0, %c0_i32_1 : i32, i32, i32, i32
  }
  func.func @transform_2(%arg0: i32, %arg1: i32) -> (i32, i32, i32, i32) {
    %c0_i32 = arith.constant 0 : i32
    %c0_i32_0 = arith.constant 0 : i32
    %c0_i32_1 = arith.constant 0 : i32
    return %arg0, %c0_i32, %arg1, %c0_i32_0 : i32, i32, i32, i32
  }
}

module attributes {stable_mosaic.version = 11 : i64} {
  func.func @_conv_tap_kernel(%arg0: i32, %arg1: i32, %arg2: memref<1x1x38x64xf32, #tpu.memory_space<vmem>>, %arg3: memref<3x3x64x64xf32, #tpu.memory_space<vmem>>, %arg4: memref<1x24x64xf32, #tpu.memory_space<vmem>>, %arg5: memref<1x2x64xf32, #tpu.memory_space<vmem>>, %arg6: memref<24x64xf32, #tpu.memory_space<vmem>>) attributes {dimension_semantics = [#tpu.dimension_semantics<parallel>, #tpu.dimension_semantics<parallel>], iteration_bounds = array<i64: 1, 4>, scalar_prefetch = 0 : i64, scratch_operands = 1 : i64, tpu.core_type = #tpu.core_type<tc>, window_params = [{transform_indices = @transform_0, window_bounds = array<i64: 1, 1, 38, 64>}, {transform_indices = @transform_1, window_bounds = array<i64: 3, 3, 64, 64>}, {transform_indices = @transform_2, window_bounds = array<i64: 1, 24, 64>}, {transform_indices = @transform_3, window_bounds = array<i64: 1, 2, 64>}]} {
    %c0 = arith.constant 0 : index
    %c0_0 = arith.constant 0 : index
    %c0_1 = arith.constant 0 : index
    %c0_2 = arith.constant 0 : index
    %0 = vector.load %arg2[%c0, %c0_0, %c0_1, %c0_2] : memref<1x1x38x64xf32, #tpu.memory_space<vmem>>, vector<1x1x24x64xf32>
    %1 = vector.shape_cast %0 : vector<1x1x24x64xf32> to vector<24x64xf32>
    %c0_3 = arith.constant 0 : index
    %c0_4 = arith.constant 0 : index
    %c0_5 = arith.constant 0 : index
    %c0_6 = arith.constant 0 : index
    %2 = vector.load %arg3[%c0_3, %c0_4, %c0_5, %c0_6] : memref<3x3x64x64xf32, #tpu.memory_space<vmem>>, vector<1x1x64x64xf32>
    %3 = vector.shape_cast %2 : vector<1x1x64x64xf32> to vector<64x64xf32>
    %cst = arith.constant dense<0.000000e+00> : vector<24x64xf32>
    %4 = tpu.matmul %1, %3, %cst {dimension_numbers = #tpu.dot_dimension_numbers<[1], [0], [0], [1], [0, 0, 1, 1], [], []>} : vector<24x64xf32>, vector<64x64xf32>, vector<24x64xf32> -> vector<24x64xf32>
    %c0_7 = arith.constant 0 : index
    %c0_8 = arith.constant 0 : index
    %5 = vector.load %arg6[%c0_7, %c0_8] : memref<24x64xf32, #tpu.memory_space<vmem>>, vector<24x64xf32>
    tpu.vector_store %arg6[%c0_7, %c0_8], %4 {strides = array<i32>} : memref<24x64xf32, #tpu.memory_space<vmem>>, vector<24x64xf32>,
    %c0_9 = arith.constant 0 : index
    %c0_10 = arith.constant 0 : index
    %c1 = arith.constant 1 : index
    %c0_11 = arith.constant 0 : index
    %6 = vector.load %arg2[%c0_9, %c0_10, %c1, %c0_11] : memref<1x1x38x64xf32, #tpu.memory_space<vmem>>, vector<1x1x24x64xf32>
    %7 = vector.shape_cast %6 : vector<1x1x24x64xf32> to vector<24x64xf32>
    %c0_12 = arith.constant 0 : index
    %c1_13 = arith.constant 1 : index
    %c0_14 = arith.constant 0 : index
    %c0_15 = arith.constant 0 : index
    %8 = vector.load %arg3[%c0_12, %c1_13, %c0_14, %c0_15] : memref<3x3x64x64xf32, #tpu.memory_space<vmem>>, vector<1x1x64x64xf32>
    %9 = vector.shape_cast %8 : vector<1x1x64x64xf32> to vector<64x64xf32>
    %cst_16 = arith.constant dense<0.000000e+00> : vector<24x64xf32>
    %10 = tpu.matmul %7, %9, %cst_16 {dimension_numbers = #tpu.dot_dimension_numbers<[1], [0], [0], [1], [0, 0, 1, 1], [], []>} : vector<24x64xf32>, vector<64x64xf32>, vector<24x64xf32> -> vector<24x64xf32>
    %c0_17 = arith.constant 0 : index
    %c0_18 = arith.constant 0 : index
    %11 = vector.load %arg6[%c0_17, %c0_18] : memref<24x64xf32, #tpu.memory_space<vmem>>, vector<24x64xf32>
    %12 = arith.addf %11, %10 : vector<24x64xf32>
    %c0_19 = arith.constant 0 : index
    %c0_20 = arith.constant 0 : index
    %13 = vector.load %arg6[%c0_19, %c0_20] : memref<24x64xf32, #tpu.memory_space<vmem>>, vector<24x64xf32>
    tpu.vector_store %arg6[%c0_19, %c0_20], %12 {strides = array<i32>} : memref<24x64xf32, #tpu.memory_space<vmem>>, vector<24x64xf32>,
    %c0_21 = arith.constant 0 : index
    %c0_22 = arith.constant 0 : index
    %c2 = arith.constant 2 : index
    %c0_23 = arith.constant 0 : index
    %14 = vector.load %arg2[%c0_21, %c0_22, %c2, %c0_23] : memref<1x1x38x64xf32, #tpu.memory_space<vmem>>, vector<1x1x24x64xf32>
    %15 = vector.shape_cast %14 : vector<1x1x24x64xf32> to vector<24x64xf32>
    %c0_24 = arith.constant 0 : index
    %c2_25 = arith.constant 2 : index
    %c0_26 = arith.constant 0 : index
    %c0_27 = arith.constant 0 : index
    %16 = vector.load %arg3[%c0_24, %c2_25, %c0_26, %c0_27] : memref<3x3x64x64xf32, #tpu.memory_space<vmem>>, vector<1x1x64x64xf32>
    %17 = vector.shape_cast %16 : vector<1x1x64x64xf32> to vector<64x64xf32>
    %cst_28 = arith.constant dense<0.000000e+00> : vector<24x64xf32>
    %18 = tpu.matmul %15, %17, %cst_28 {dimension_numbers = #tpu.dot_dimension_numbers<[1], [0], [0], [1], [0, 0, 1, 1], [], []>} : vector<24x64xf32>, vector<64x64xf32>, vector<24x64xf32> -> vector<24x64xf32>
    %c0_29 = arith.constant 0 : index
    %c0_30 = arith.constant 0 : index
    %19 = vector.load %arg6[%c0_29, %c0_30] : memref<24x64xf32, #tpu.memory_space<vmem>>, vector<24x64xf32>
    %20 = arith.addf %19, %18 : vector<24x64xf32>
    %c0_31 = arith.constant 0 : index
    %c0_32 = arith.constant 0 : index
    %21 = vector.load %arg6[%c0_31, %c0_32] : memref<24x64xf32, #tpu.memory_space<vmem>>, vector<24x64xf32>
    tpu.vector_store %arg6[%c0_31, %c0_32], %20 {strides = array<i32>} : memref<24x64xf32, #tpu.memory_space<vmem>>, vector<24x64xf32>,
    %c0_33 = arith.constant 0 : index
    %c0_34 = arith.constant 0 : index
    %c6 = arith.constant 6 : index
    %c0_35 = arith.constant 0 : index
    %22 = vector.load %arg2[%c0_33, %c0_34, %c6, %c0_35] : memref<1x1x38x64xf32, #tpu.memory_space<vmem>>, vector<1x1x24x64xf32>
    %23 = vector.shape_cast %22 : vector<1x1x24x64xf32> to vector<24x64xf32>
    %c1_36 = arith.constant 1 : index
    %c0_37 = arith.constant 0 : index
    %c0_38 = arith.constant 0 : index
    %c0_39 = arith.constant 0 : index
    %24 = vector.load %arg3[%c1_36, %c0_37, %c0_38, %c0_39] : memref<3x3x64x64xf32, #tpu.memory_space<vmem>>, vector<1x1x64x64xf32>
    %25 = vector.shape_cast %24 : vector<1x1x64x64xf32> to vector<64x64xf32>
    %cst_40 = arith.constant dense<0.000000e+00> : vector<24x64xf32>
    %26 = tpu.matmul %23, %25, %cst_40 {dimension_numbers = #tpu.dot_dimension_numbers<[1], [0], [0], [1], [0, 0, 1, 1], [], []>} : vector<24x64xf32>, vector<64x64xf32>, vector<24x64xf32> -> vector<24x64xf32>
    %c0_41 = arith.constant 0 : index
    %c0_42 = arith.constant 0 : index
    %27 = vector.load %arg6[%c0_41, %c0_42] : memref<24x64xf32, #tpu.memory_space<vmem>>, vector<24x64xf32>
    %28 = arith.addf %27, %26 : vector<24x64xf32>
    %c0_43 = arith.constant 0 : index
    %c0_44 = arith.constant 0 : index
    %29 = vector.load %arg6[%c0_43, %c0_44] : memref<24x64xf32, #tpu.memory_space<vmem>>, vector<24x64xf32>
    tpu.vector_store %arg6[%c0_43, %c0_44], %28 {strides = array<i32>} : memref<24x64xf32, #tpu.memory_space<vmem>>, vector<24x64xf32>,
    %c0_45 = arith.constant 0 : index
    %c0_46 = arith.constant 0 : index
    %c7 = arith.constant 7 : index
    %c0_47 = arith.constant 0 : index
    %30 = vector.load %arg2[%c0_45, %c0_46, %c7, %c0_47] : memref<1x1x38x64xf32, #tpu.memory_space<vmem>>, vector<1x1x24x64xf32>
    %31 = vector.shape_cast %30 : vector<1x1x24x64xf32> to vector<24x64xf32>
    %c1_48 = arith.constant 1 : index
    %c1_49 = arith.constant 1 : index
    %c0_50 = arith.constant 0 : index
    %c0_51 = arith.constant 0 : index
    %32 = vector.load %arg3[%c1_48, %c1_49, %c0_50, %c0_51] : memref<3x3x64x64xf32, #tpu.memory_space<vmem>>, vector<1x1x64x64xf32>
    %33 = vector.shape_cast %32 : vector<1x1x64x64xf32> to vector<64x64xf32>
    %cst_52 = arith.constant dense<0.000000e+00> : vector<24x64xf32>
    %34 = tpu.matmul %31, %33, %cst_52 {dimension_numbers = #tpu.dot_dimension_numbers<[1], [0], [0], [1], [0, 0, 1, 1], [], []>} : vector<24x64xf32>, vector<64x64xf32>, vector<24x64xf32> -> vector<24x64xf32>
    %c0_53 = arith.constant 0 : index
    %c0_54 = arith.constant 0 : index
    %35 = vector.load %arg6[%c0_53, %c0_54] : memref<24x64xf32, #tpu.memory_space<vmem>>, vector<24x64xf32>
    %36 = arith.addf %35, %34 : vector<24x64xf32>
    %c0_55 = arith.constant 0 : index
    %c0_56 = arith.constant 0 : index
    %37 = vector.load %arg6[%c0_55, %c0_56] : memref<24x64xf32, #tpu.memory_space<vmem>>, vector<24x64xf32>
    tpu.vector_store %arg6[%c0_55, %c0_56], %36 {strides = array<i32>} : memref<24x64xf32, #tpu.memory_space<vmem>>, vector<24x64xf32>,
    %c0_57 = arith.constant 0 : index
    %c0_58 = arith.constant 0 : index
    %c8 = arith.constant 8 : index
    %c0_59 = arith.constant 0 : index
    %38 = vector.load %arg2[%c0_57, %c0_58, %c8, %c0_59] : memref<1x1x38x64xf32, #tpu.memory_space<vmem>>, vector<1x1x24x64xf32>
    %39 = vector.shape_cast %38 : vector<1x1x24x64xf32> to vector<24x64xf32>
    %c1_60 = arith.constant 1 : index
    %c2_61 = arith.constant 2 : index
    %c0_62 = arith.constant 0 : index
    %c0_63 = arith.constant 0 : index
    %40 = vector.load %arg3[%c1_60, %c2_61, %c0_62, %c0_63] : memref<3x3x64x64xf32, #tpu.memory_space<vmem>>, vector<1x1x64x64xf32>
    %41 = vector.shape_cast %40 : vector<1x1x64x64xf32> to vector<64x64xf32>
    %cst_64 = arith.constant dense<0.000000e+00> : vector<24x64xf32>
    %42 = tpu.matmul %39, %41, %cst_64 {dimension_numbers = #tpu.dot_dimension_numbers<[1], [0], [0], [1], [0, 0, 1, 1], [], []>} : vector<24x64xf32>, vector<64x64xf32>, vector<24x64xf32> -> vector<24x64xf32>
    %c0_65 = arith.constant 0 : index
    %c0_66 = arith.constant 0 : index
    %43 = vector.load %arg6[%c0_65, %c0_66] : memref<24x64xf32, #tpu.memory_space<vmem>>, vector<24x64xf32>
    %44 = arith.addf %43, %42 : vector<24x64xf32>
    %c0_67 = arith.constant 0 : index
    %c0_68 = arith.constant 0 : index
    %45 = vector.load %arg6[%c0_67, %c0_68] : memref<24x64xf32, #tpu.memory_space<vmem>>, vector<24x64xf32>
    tpu.vector_store %arg6[%c0_67, %c0_68], %44 {strides = array<i32>} : memref<24x64xf32, #tpu.memory_space<vmem>>, vector<24x64xf32>,
    %c0_69 = arith.constant 0 : index
    %c0_70 = arith.constant 0 : index
    %c12 = arith.constant 12 : index
    %c0_71 = arith.constant 0 : index
    %46 = vector.load %arg2[%c0_69, %c0_70, %c12, %c0_71] : memref<1x1x38x64xf32, #tpu.memory_space<vmem>>, vector<1x1x24x64xf32>
    %47 = vector.shape_cast %46 : vector<1x1x24x64xf32> to vector<24x64xf32>
    %c2_72 = arith.constant 2 : index
    %c0_73 = arith.constant 0 : index
    %c0_74 = arith.constant 0 : index
    %c0_75 = arith.constant 0 : index
    %48 = vector.load %arg3[%c2_72, %c0_73, %c0_74, %c0_75] : memref<3x3x64x64xf32, #tpu.memory_space<vmem>>, vector<1x1x64x64xf32>
    %49 = vector.shape_cast %48 : vector<1x1x64x64xf32> to vector<64x64xf32>
    %cst_76 = arith.constant dense<0.000000e+00> : vector<24x64xf32>
    %50 = tpu.matmul %47, %49, %cst_76 {dimension_numbers = #tpu.dot_dimension_numbers<[1], [0], [0], [1], [0, 0, 1, 1], [], []>} : vector<24x64xf32>, vector<64x64xf32>, vector<24x64xf32> -> vector<24x64xf32>
    %c0_77 = arith.constant 0 : index
    %c0_78 = arith.constant 0 : index
    %51 = vector.load %arg6[%c0_77, %c0_78] : memref<24x64xf32, #tpu.memory_space<vmem>>, vector<24x64xf32>
    %52 = arith.addf %51, %50 : vector<24x64xf32>
    %c0_79 = arith.constant 0 : index
    %c0_80 = arith.constant 0 : index
    %53 = vector.load %arg6[%c0_79, %c0_80] : memref<24x64xf32, #tpu.memory_space<vmem>>, vector<24x64xf32>
    tpu.vector_store %arg6[%c0_79, %c0_80], %52 {strides = array<i32>} : memref<24x64xf32, #tpu.memory_space<vmem>>, vector<24x64xf32>,
    %c0_81 = arith.constant 0 : index
    %c0_82 = arith.constant 0 : index
    %c13 = arith.constant 13 : index
    %c0_83 = arith.constant 0 : index
    %54 = vector.load %arg2[%c0_81, %c0_82, %c13, %c0_83] : memref<1x1x38x64xf32, #tpu.memory_space<vmem>>, vector<1x1x24x64xf32>
    %55 = vector.shape_cast %54 : vector<1x1x24x64xf32> to vector<24x64xf32>
    %c2_84 = arith.constant 2 : index
    %c1_85 = arith.constant 1 : index
    %c0_86 = arith.constant 0 : index
    %c0_87 = arith.constant 0 : index
    %56 = vector.load %arg3[%c2_84, %c1_85, %c0_86, %c0_87] : memref<3x3x64x64xf32, #tpu.memory_space<vmem>>, vector<1x1x64x64xf32>
    %57 = vector.shape_cast %56 : vector<1x1x64x64xf32> to vector<64x64xf32>
    %cst_88 = arith.constant dense<0.000000e+00> : vector<24x64xf32>
    %58 = tpu.matmul %55, %57, %cst_88 {dimension_numbers = #tpu.dot_dimension_numbers<[1], [0], [0], [1], [0, 0, 1, 1], [], []>} : vector<24x64xf32>, vector<64x64xf32>, vector<24x64xf32> -> vector<24x64xf32>
    %c0_89 = arith.constant 0 : index
    %c0_90 = arith.constant 0 : index
    %59 = vector.load %arg6[%c0_89, %c0_90] : memref<24x64xf32, #tpu.memory_space<vmem>>, vector<24x64xf32>
    %60 = arith.addf %59, %58 : vector<24x64xf32>
    %c0_91 = arith.constant 0 : index
    %c0_92 = arith.constant 0 : index
    %61 = vector.load %arg6[%c0_91, %c0_92] : memref<24x64xf32, #tpu.memory_space<vmem>>, vector<24x64xf32>
    tpu.vector_store %arg6[%c0_91, %c0_92], %60 {strides = array<i32>} : memref<24x64xf32, #tpu.memory_space<vmem>>, vector<24x64xf32>,
    %c0_93 = arith.constant 0 : index
    %c0_94 = arith.constant 0 : index
    %c14 = arith.constant 14 : index
    %c0_95 = arith.constant 0 : index
    %62 = vector.load %arg2[%c0_93, %c0_94, %c14, %c0_95] : memref<1x1x38x64xf32, #tpu.memory_space<vmem>>, vector<1x1x24x64xf32>
    %63 = vector.shape_cast %62 : vector<1x1x24x64xf32> to vector<24x64xf32>
    %c2_96 = arith.constant 2 : index
    %c2_97 = arith.constant 2 : index
    %c0_98 = arith.constant 0 : index
    %c0_99 = arith.constant 0 : index
    %64 = vector.load %arg3[%c2_96, %c2_97, %c0_98, %c0_99] : memref<3x3x64x64xf32, #tpu.memory_space<vmem>>, vector<1x1x64x64xf32>
    %65 = vector.shape_cast %64 : vector<1x1x64x64xf32> to vector<64x64xf32>
    %cst_100 = arith.constant dense<0.000000e+00> : vector<24x64xf32>
    %66 = tpu.matmul %63, %65, %cst_100 {dimension_numbers = #tpu.dot_dimension_numbers<[1], [0], [0], [1], [0, 0, 1, 1], [], []>} : vector<24x64xf32>, vector<64x64xf32>, vector<24x64xf32> -> vector<24x64xf32>
    %c0_101 = arith.constant 0 : index
    %c0_102 = arith.constant 0 : index
    %67 = vector.load %arg6[%c0_101, %c0_102] : memref<24x64xf32, #tpu.memory_space<vmem>>, vector<24x64xf32>
    %68 = arith.addf %67, %66 : vector<24x64xf32>
    %c0_103 = arith.constant 0 : index
    %c0_104 = arith.constant 0 : index
    %69 = vector.load %arg6[%c0_103, %c0_104] : memref<24x64xf32, #tpu.memory_space<vmem>>, vector<24x64xf32>
    tpu.vector_store %arg6[%c0_103, %c0_104], %68 {strides = array<i32>} : memref<24x64xf32, #tpu.memory_space<vmem>>, vector<24x64xf32>,
    %c0_105 = arith.constant 0 : index
    %c0_106 = arith.constant 0 : index
    %70 = vector.load %arg6[%c0_105, %c0_106] : memref<24x64xf32, #tpu.memory_space<vmem>>, vector<24x64xf32>
    %c0_107 = arith.constant 0 : index
    %c0_108 = arith.constant 0 : index
    %c0_109 = arith.constant 0 : index
    %71 = vector.load %arg4[%c0_107, %c0_108, %c0_109] : memref<1x24x64xf32, #tpu.memory_space<vmem>>, vector<1x24x64xf32>
    %72 = vector.shape_cast %71 : vector<1x24x64xf32> to vector<24x64xf32>
    %73 = vector.shape_cast %70 : vector<24x64xf32> to vector<1x24x64xf32>
    tpu.vector_store %arg4[%c0_107, %c0_108, %c0_109], %73 {strides = array<i32>} : memref<1x24x64xf32, #tpu.memory_space<vmem>>, vector<1x24x64xf32>,
    %74 = tpu.iota {dimensions = array<i32: 0>} : vector<24x1xi32>
    %c6_i32 = arith.constant 6 : i32
    %c0_i32 = arith.constant 0 : i32
    %75 = arith.cmpi eq, %c6_i32, %c0_i32 : i32
    %c1_i32 = arith.constant 1 : i32
    %76 = arith.select %75, %c1_i32, %c6_i32 : i32
    %77 = vector.broadcast %76 : i32 to vector<24x1xi32>
    %78 = arith.remsi %74, %77 : vector<24x1xi32>
    %c0_i32_110 = arith.constant 0 : i32
    %79 = vector.broadcast %c0_i32_110 : i32 to vector<24x1xi32>
    %80 = arith.cmpi ne, %78, %79 : vector<24x1xi32>
    %c0_i32_111 = arith.constant 0 : i32
    %81 = vector.broadcast %c0_i32_111 : i32 to vector<24x1xi32>
    %82 = arith.cmpi slt, %78, %81 : vector<24x1xi32>
    %c0_i32_112 = arith.constant 0 : i32
    %83 = arith.cmpi slt, %76, %c0_i32_112 : i32
    %84 = vector.broadcast %83 : i1 to vector<24x1xi1>
    %85 = vector.broadcast %84 : vector<24x1xi1> to vector<24x1xi1>
    %86 = arith.xori %82, %85 : vector<24x1xi1>
    %87 = arith.andi %86, %80 : vector<24x1xi1>
    %88 = vector.broadcast %76 : i32 to vector<24x1xi32>
    %89 = arith.addi %78, %88 : vector<24x1xi32>
    %90 = arith.select %87, %89, %78 : vector<24x1xi1>, vector<24x1xi32>
    %c4_i32 = arith.constant 4 : i32
    %91 = vector.broadcast %c4_i32 : i32 to vector<24x1xi32>
    %92 = arith.cmpi slt, %90, %91 : vector<24x1xi32>
    %cst_113 = arith.constant 0.000000e+00 : f32
    %93 = vector.shape_cast %92 : vector<24x1xi1> to vector<24x1xi1>
    %94 = vector.broadcast %93 : vector<24x1xi1> to vector<24x64xi1>
    %95 = vector.broadcast %cst_113 : f32 to vector<24x64xf32>
    %96 = arith.select %94, %70, %95 : vector<24x64xi1>, vector<24x64xf32>
    %cst_114 = arith.constant dense<0.000000e+00> : vector<64xf32>
    %97 = vector.multi_reduction <add>, %96, %cst_114 [0] : vector<24x64xf32> to vector<64xf32>
    %98 = vector.shape_cast %97 : vector<64xf32> to vector<1x64xf32>
    %c0_115 = arith.constant 0 : index
    %c0_116 = arith.constant 0 : index
    %c0_117 = arith.constant 0 : index
    %99 = vector.load %arg5[%c0_115, %c0_116, %c0_117] : memref<1x2x64xf32, #tpu.memory_space<vmem>>, vector<1x1x64xf32>
    %100 = vector.shape_cast %99 : vector<1x1x64xf32> to vector<1x64xf32>
    %101 = vector.shape_cast %98 : vector<1x64xf32> to vector<1x1x64xf32>
    tpu.vector_store %arg5[%c0_115, %c0_116, %c0_117], %101 {strides = array<i32>} : memref<1x2x64xf32, #tpu.memory_space<vmem>>, vector<1x1x64xf32>,
    %102 = arith.mulf %96, %96 : vector<24x64xf32>
    %cst_118 = arith.constant dense<0.000000e+00> : vector<64xf32>
    %103 = vector.multi_reduction <add>, %102, %cst_118 [0] : vector<24x64xf32> to vector<64xf32>
    %104 = vector.shape_cast %103 : vector<64xf32> to vector<1x64xf32>
    %c0_119 = arith.constant 0 : index
    %c1_120 = arith.constant 1 : index
    %c0_121 = arith.constant 0 : index
    %105 = vector.load %arg5[%c0_119, %c1_120, %c0_121] : memref<1x2x64xf32, #tpu.memory_space<vmem>>, vector<1x1x64xf32>
    %106 = vector.shape_cast %105 : vector<1x1x64xf32> to vector<1x64xf32>
    %107 = vector.shape_cast %104 : vector<1x64xf32> to vector<1x1x64xf32>
    tpu.vector_store %arg5[%c0_119, %c1_120, %c0_121], %107 {strides = array<i32>} : memref<1x2x64xf32, #tpu.memory_space<vmem>>, vector<1x1x64xf32>,
    return
  }
  func.func @transform_0(%arg0: i32, %arg1: i32) -> (i32, i32, i32, i32) {
    %c0_i32 = arith.constant 0 : i32
    %c0_i32_0 = arith.constant 0 : i32
    %c0_i32_1 = arith.constant 0 : i32
    %c0_i32_2 = arith.constant 0 : i32
    return %arg1, %c0_i32, %c0_i32_0, %c0_i32_1 : i32, i32, i32, i32
  }
  func.func @transform_1(%arg0: i32, %arg1: i32) -> (i32, i32, i32, i32) {
    %c0_i32 = arith.constant 0 : i32
    %c0_i32_0 = arith.constant 0 : i32
    %c0_i32_1 = arith.constant 0 : i32
    %c0_i32_2 = arith.constant 0 : i32
    return %c0_i32, %c0_i32_0, %c0_i32_1, %arg0 : i32, i32, i32, i32
  }
  func.func @transform_2(%arg0: i32, %arg1: i32) -> (i32, i32, i32) {
    %c0_i32 = arith.constant 0 : i32
    %c0_i32_0 = arith.constant 0 : i32
    return %arg1, %c0_i32, %arg0 : i32, i32, i32
  }
  func.func @transform_3(%arg0: i32, %arg1: i32) -> (i32, i32, i32) {
    %c0_i32 = arith.constant 0 : i32
    %c0_i32_0 = arith.constant 0 : i32
    return %arg1, %c0_i32, %arg0 : i32, i32, i32
  }
}

module attributes {stable_mosaic.version = 11 : i64} {
  func.func @_affine4d_kernel(%arg0: i32, %arg1: memref<1x4x6x64xf32, #tpu.memory_space<vmem>>, %arg2: memref<1x64xf32, #tpu.memory_space<vmem>>, %arg3: memref<1x64xf32, #tpu.memory_space<vmem>>, %arg4: memref<1x4x4x64xf32, #tpu.memory_space<vmem>>) attributes {dimension_semantics = [#tpu.dimension_semantics<parallel>], iteration_bounds = array<i64: 4>, scalar_prefetch = 0 : i64, scratch_operands = 0 : i64, tpu.core_type = #tpu.core_type<tc>, window_params = [{transform_indices = @transform_0, window_bounds = array<i64: 1, 4, 6, 64>}, {pipeline_mode = #tpu.pipeline_mode<synchronous>, transform_indices = @transform_1, window_bounds = array<i64: 1, 64>}, {pipeline_mode = #tpu.pipeline_mode<synchronous>, transform_indices = @transform_2, window_bounds = array<i64: 1, 64>}, {transform_indices = @transform_3, window_bounds = array<i64: 1, 4, 4, 64>}]} {
    %c0 = arith.constant 0 : index
    %c0_0 = arith.constant 0 : index
    %c0_1 = arith.constant 0 : index
    %c0_2 = arith.constant 0 : index
    %0 = vector.load %arg1[%c0, %c0_0, %c0_1, %c0_2] : memref<1x4x6x64xf32, #tpu.memory_space<vmem>>, vector<1x4x4x64xf32>
    %1 = vector.shape_cast %0 : vector<1x4x4x64xf32> to vector<4x4x64xf32>
    %c0_3 = arith.constant 0 : index
    %c0_4 = arith.constant 0 : index
    %2 = vector.load %arg2[%c0_3, %c0_4] : memref<1x64xf32, #tpu.memory_space<vmem>>, vector<1x64xf32>
    %3 = vector.shape_cast %2 : vector<1x64xf32> to vector<1x1x64xf32>
    %4 = vector.broadcast %3 : vector<1x1x64xf32> to vector<4x4x64xf32>
    %5 = arith.mulf %1, %4 : vector<4x4x64xf32>
    %c0_5 = arith.constant 0 : index
    %c0_6 = arith.constant 0 : index
    %6 = vector.load %arg3[%c0_5, %c0_6] : memref<1x64xf32, #tpu.memory_space<vmem>>, vector<1x64xf32>
    %7 = vector.shape_cast %6 : vector<1x64xf32> to vector<1x1x64xf32>
    %8 = vector.broadcast %7 : vector<1x1x64xf32> to vector<4x4x64xf32>
    %9 = arith.addf %5, %8 : vector<4x4x64xf32>
    %cst = arith.constant 0.000000e+00 : f32
    %10 = vector.broadcast %cst : f32 to vector<4x4x64xf32>
    %11 = arith.maximumf %9, %10 : vector<4x4x64xf32>
    %c0_7 = arith.constant 0 : index
    %c0_8 = arith.constant 0 : index
    %c0_9 = arith.constant 0 : index
    %c0_10 = arith.constant 0 : index
    %12 = vector.load %arg4[%c0_7, %c0_8, %c0_9, %c0_10] : memref<1x4x4x64xf32, #tpu.memory_space<vmem>>, vector<1x4x4x64xf32>
    %13 = vector.shape_cast %12 : vector<1x4x4x64xf32> to vector<4x4x64xf32>
    %14 = vector.shape_cast %11 : vector<4x4x64xf32> to vector<1x4x4x64xf32>
    tpu.vector_store %arg4[%c0_7, %c0_8, %c0_9, %c0_10], %14 {strides = array<i32>} : memref<1x4x4x64xf32, #tpu.memory_space<vmem>>, vector<1x4x4x64xf32>,
    return
  }
  func.func @transform_0(%arg0: i32) -> (i32, i32, i32, i32) {
    %c0_i32 = arith.constant 0 : i32
    %c0_i32_0 = arith.constant 0 : i32
    %c0_i32_1 = arith.constant 0 : i32
    %c0_i32_2 = arith.constant 0 : i32
    return %arg0, %c0_i32, %c0_i32_0, %c0_i32_1 : i32, i32, i32, i32
  }
  func.func @transform_1(%arg0: i32) -> (i32, i32) {
    %c0_i32 = arith.constant 0 : i32
    %c0_i32_0 = arith.constant 0 : i32
    %c0_i32_1 = arith.constant 0 : i32
    return %c0_i32, %c0_i32_0 : i32, i32
  }
  func.func @transform_2(%arg0: i32) -> (i32, i32) {
    %c0_i32 = arith.constant 0 : i32
    %c0_i32_0 = arith.constant 0 : i32
    %c0_i32_1 = arith.constant 0 : i32
    return %c0_i32, %c0_i32_0 : i32, i32
  }
  func.func @transform_3(%arg0: i32) -> (i32, i32, i32, i32) {
    %c0_i32 = arith.constant 0 : i32
    %c0_i32_0 = arith.constant 0 : i32
    %c0_i32_1 = arith.constant 0 : i32
    %c0_i32_2 = arith.constant 0 : i32
    return %arg0, %c0_i32, %c0_i32_0, %c0_i32_1 : i32, i32, i32, i32
  }
}

module attributes {stable_mosaic.version = 11 : i64} {
  func.func @_affine2d_res_kernel(%arg0: i32, %arg1: memref<64x256xf32, #tpu.memory_space<vmem>>, %arg2: memref<1x256xf32, #tpu.memory_space<vmem>>, %arg3: memref<1x256xf32, #tpu.memory_space<vmem>>, %arg4: memref<64x256xf32, #tpu.memory_space<vmem>>, %arg5: memref<1x256xf32, #tpu.memory_space<vmem>>, %arg6: memref<1x256xf32, #tpu.memory_space<vmem>>, %arg7: memref<64x256xf32, #tpu.memory_space<vmem>>) attributes {dimension_semantics = [#tpu.dimension_semantics<parallel>], iteration_bounds = array<i64: 1>, scalar_prefetch = 0 : i64, scratch_operands = 0 : i64, tpu.core_type = #tpu.core_type<tc>, window_params = [{transform_indices = @transform_0, window_bounds = array<i64: 64, 256>}, {pipeline_mode = #tpu.pipeline_mode<synchronous>, transform_indices = @transform_1, window_bounds = array<i64: 1, 256>}, {pipeline_mode = #tpu.pipeline_mode<synchronous>, transform_indices = @transform_2, window_bounds = array<i64: 1, 256>}, {transform_indices = @transform_3, window_bounds = array<i64: 64, 256>}, {pipeline_mode = #tpu.pipeline_mode<synchronous>, transform_indices = @transform_4, window_bounds = array<i64: 1, 256>}, {pipeline_mode = #tpu.pipeline_mode<synchronous>, transform_indices = @transform_5, window_bounds = array<i64: 1, 256>}, {transform_indices = @transform_6, window_bounds = array<i64: 64, 256>}]} {
    %c0 = arith.constant 0 : index
    %c0_0 = arith.constant 0 : index
    %0 = vector.load %arg1[%c0, %c0_0] : memref<64x256xf32, #tpu.memory_space<vmem>>, vector<64x256xf32>
    %c0_1 = arith.constant 0 : index
    %c0_2 = arith.constant 0 : index
    %1 = vector.load %arg2[%c0_1, %c0_2] : memref<1x256xf32, #tpu.memory_space<vmem>>, vector<1x256xf32>
    %2 = vector.broadcast %1 : vector<1x256xf32> to vector<64x256xf32>
    %3 = arith.mulf %0, %2 : vector<64x256xf32>
    %c0_3 = arith.constant 0 : index
    %c0_4 = arith.constant 0 : index
    %4 = vector.load %arg3[%c0_3, %c0_4] : memref<1x256xf32, #tpu.memory_space<vmem>>, vector<1x256xf32>
    %5 = vector.broadcast %4 : vector<1x256xf32> to vector<64x256xf32>
    %6 = arith.addf %3, %5 : vector<64x256xf32>
    %c0_5 = arith.constant 0 : index
    %c0_6 = arith.constant 0 : index
    %7 = vector.load %arg4[%c0_5, %c0_6] : memref<64x256xf32, #tpu.memory_space<vmem>>, vector<64x256xf32>
    %c0_7 = arith.constant 0 : index
    %c0_8 = arith.constant 0 : index
    %8 = vector.load %arg5[%c0_7, %c0_8] : memref<1x256xf32, #tpu.memory_space<vmem>>, vector<1x256xf32>
    %9 = vector.broadcast %8 : vector<1x256xf32> to vector<64x256xf32>
    %10 = arith.mulf %7, %9 : vector<64x256xf32>
    %11 = arith.addf %6, %10 : vector<64x256xf32>
    %c0_9 = arith.constant 0 : index
    %c0_10 = arith.constant 0 : index
    %12 = vector.load %arg6[%c0_9, %c0_10] : memref<1x256xf32, #tpu.memory_space<vmem>>, vector<1x256xf32>
    %13 = vector.broadcast %12 : vector<1x256xf32> to vector<64x256xf32>
    %14 = arith.addf %11, %13 : vector<64x256xf32>
    %cst = arith.constant 0.000000e+00 : f32
    %15 = vector.broadcast %cst : f32 to vector<64x256xf32>
    %16 = arith.maximumf %14, %15 : vector<64x256xf32>
    %c0_11 = arith.constant 0 : index
    %c0_12 = arith.constant 0 : index
    %17 = vector.load %arg7[%c0_11, %c0_12] : memref<64x256xf32, #tpu.memory_space<vmem>>, vector<64x256xf32>
    tpu.vector_store %arg7[%c0_11, %c0_12], %16 {strides = array<i32>} : memref<64x256xf32, #tpu.memory_space<vmem>>, vector<64x256xf32>,
    return
  }
  func.func @transform_0(%arg0: i32) -> (i32, i32) {
    %c0_i32 = arith.constant 0 : i32
    %c0_i32_0 = arith.constant 0 : i32
    return %arg0, %c0_i32 : i32, i32
  }
  func.func @transform_1(%arg0: i32) -> (i32, i32) {
    %c0_i32 = arith.constant 0 : i32
    %c0_i32_0 = arith.constant 0 : i32
    %c0_i32_1 = arith.constant 0 : i32
    return %c0_i32, %c0_i32_0 : i32, i32
  }
  func.func @transform_2(%arg0: i32) -> (i32, i32) {
    %c0_i32 = arith.constant 0 : i32
    %c0_i32_0 = arith.constant 0 : i32
    %c0_i32_1 = arith.constant 0 : i32
    return %c0_i32, %c0_i32_0 : i32, i32
  }
  func.func @transform_3(%arg0: i32) -> (i32, i32) {
    %c0_i32 = arith.constant 0 : i32
    %c0_i32_0 = arith.constant 0 : i32
    return %arg0, %c0_i32 : i32, i32
  }
  func.func @transform_4(%arg0: i32) -> (i32, i32) {
    %c0_i32 = arith.constant 0 : i32
    %c0_i32_0 = arith.constant 0 : i32
    %c0_i32_1 = arith.constant 0 : i32
    return %c0_i32, %c0_i32_0 : i32, i32
  }
  func.func @transform_5(%arg0: i32) -> (i32, i32) {
    %c0_i32 = arith.constant 0 : i32
    %c0_i32_0 = arith.constant 0 : i32
    %c0_i32_1 = arith.constant 0 : i32
    return %c0_i32, %c0_i32_0 : i32, i32
  }
  func.func @transform_6(%arg0: i32) -> (i32, i32) {
    %c0_i32 = arith.constant 0 : i32
    %c0_i32_0 = arith.constant 0 : i32
    return %arg0, %c0_i32 : i32, i32
  }
}

module attributes {stable_mosaic.version = 11 : i64} {
  func.func @_matmul_stats_kernel(%arg0: i32, %arg1: i32, %arg2: i32, %arg3: memref<64x256xf32, #tpu.memory_space<vmem>>, %arg4: memref<256x64xf32, #tpu.memory_space<vmem>>, %arg5: memref<64x64xf32, #tpu.memory_space<vmem>>, %arg6: memref<1x2x64xf32, #tpu.memory_space<vmem>>, %arg7: memref<64x64xf32, #tpu.memory_space<vmem>>) attributes {dimension_semantics = [#tpu.dimension_semantics<parallel>, #tpu.dimension_semantics<parallel>, #tpu.dimension_semantics<arbitrary>], iteration_bounds = array<i64: 1, 1, 1>, scalar_prefetch = 0 : i64, scratch_operands = 1 : i64, tpu.core_type = #tpu.core_type<tc>, window_params = [{transform_indices = @transform_0, window_bounds = array<i64: 64, 256>}, {transform_indices = @transform_1, window_bounds = array<i64: 256, 64>}, {transform_indices = @transform_2, window_bounds = array<i64: 64, 64>}, {transform_indices = @transform_3, window_bounds = array<i64: 1, 2, 64>}]} {
    %c0_i32 = arith.constant 0 : i32
    %0 = arith.cmpi eq, %arg2, %c0_i32 : i32
    %1 = arith.extui %0 : i1 to i32
    %c0_i32_0 = arith.constant 0 : i32
    %2 = arith.cmpi ne, %1, %c0_i32_0 : i32
    scf.if %2 {
      %cst_10 = arith.constant 0.000000e+00 : f32
      %12 = vector.broadcast %cst_10 : f32 to vector<64x64xf32>
      %c0_11 = arith.constant 0 : index
      %c0_12 = arith.constant 0 : index
      %13 = vector.load %arg7[%c0_11, %c0_12] : memref<64x64xf32, #tpu.memory_space<vmem>>, vector<64x64xf32>
      tpu.vector_store %arg7[%c0_11, %c0_12], %12 {strides = array<i32>} : memref<64x64xf32, #tpu.memory_space<vmem>>, vector<64x64xf32>,
    } else {
    }
    %c0 = arith.constant 0 : index
    %c0_1 = arith.constant 0 : index
    %3 = vector.load %arg7[%c0, %c0_1] : memref<64x64xf32, #tpu.memory_space<vmem>>, vector<64x64xf32>
    %c0_2 = arith.constant 0 : index
    %c0_3 = arith.constant 0 : index
    %4 = vector.load %arg3[%c0_2, %c0_3] : memref<64x256xf32, #tpu.memory_space<vmem>>, vector<64x256xf32>
    %c0_4 = arith.constant 0 : index
    %c0_5 = arith.constant 0 : index
    %5 = vector.load %arg4[%c0_4, %c0_5] : memref<256x64xf32, #tpu.memory_space<vmem>>, vector<256x64xf32>
    %cst = arith.constant dense<0.000000e+00> : vector<64x64xf32>
    %6 = tpu.matmul %4, %5, %cst {dimension_numbers = #tpu.dot_dimension_numbers<[1], [0], [0], [1], [0, 0, 1, 1], [], []>} : vector<64x256xf32>, vector<256x64xf32>, vector<64x64xf32> -> vector<64x64xf32>
    %7 = arith.addf %3, %6 : vector<64x64xf32>
    %c0_6 = arith.constant 0 : index
    %c0_7 = arith.constant 0 : index
    %8 = vector.load %arg7[%c0_6, %c0_7] : memref<64x64xf32, #tpu.memory_space<vmem>>, vector<64x64xf32>
    tpu.vector_store %arg7[%c0_6, %c0_7], %7 {strides = array<i32>} : memref<64x64xf32, #tpu.memory_space<vmem>>, vector<64x64xf32>,
    %c0_i32_8 = arith.constant 0 : i32
    %9 = arith.cmpi eq, %arg2, %c0_i32_8 : i32
    %10 = arith.extui %9 : i1 to i32
    %c0_i32_9 = arith.constant 0 : i32
    %11 = arith.cmpi ne, %10, %c0_i32_9 : i32
    scf.if %11 {
      %c0_10 = arith.constant 0 : index
      %c0_11 = arith.constant 0 : index
      %12 = vector.load %arg7[%c0_10, %c0_11] : memref<64x64xf32, #tpu.memory_space<vmem>>, vector<64x64xf32>
      %c0_12 = arith.constant 0 : index
      %c0_13 = arith.constant 0 : index
      %13 = vector.load %arg5[%c0_12, %c0_13] : memref<64x64xf32, #tpu.memory_space<vmem>>, vector<64x64xf32>
      tpu.vector_store %arg5[%c0_12, %c0_13], %12 {strides = array<i32>} : memref<64x64xf32, #tpu.memory_space<vmem>>, vector<64x64xf32>,
      %cst_14 = arith.constant dense<0.000000e+00> : vector<64xf32>
      %14 = vector.multi_reduction <add>, %12, %cst_14 [0] : vector<64x64xf32> to vector<64xf32>
      %15 = vector.shape_cast %14 : vector<64xf32> to vector<1x64xf32>
      %c0_15 = arith.constant 0 : index
      %c0_16 = arith.constant 0 : index
      %c0_17 = arith.constant 0 : index
      %16 = vector.load %arg6[%c0_15, %c0_16, %c0_17] : memref<1x2x64xf32, #tpu.memory_space<vmem>>, vector<1x1x64xf32>
      %17 = vector.shape_cast %16 : vector<1x1x64xf32> to vector<1x64xf32>
      %18 = vector.shape_cast %15 : vector<1x64xf32> to vector<1x1x64xf32>
      tpu.vector_store %arg6[%c0_15, %c0_16, %c0_17], %18 {strides = array<i32>} : memref<1x2x64xf32, #tpu.memory_space<vmem>>, vector<1x1x64xf32>,
      %19 = arith.mulf %12, %12 : vector<64x64xf32>
      %cst_18 = arith.constant dense<0.000000e+00> : vector<64xf32>
      %20 = vector.multi_reduction <add>, %19, %cst_18 [0] : vector<64x64xf32> to vector<64xf32>
      %21 = vector.shape_cast %20 : vector<64xf32> to vector<1x64xf32>
      %c0_19 = arith.constant 0 : index
      %c1 = arith.constant 1 : index
      %c0_20 = arith.constant 0 : index
      %22 = vector.load %arg6[%c0_19, %c1, %c0_20] : memref<1x2x64xf32, #tpu.memory_space<vmem>>, vector<1x1x64xf32>
      %23 = vector.shape_cast %22 : vector<1x1x64xf32> to vector<1x64xf32>
      %24 = vector.shape_cast %21 : vector<1x64xf32> to vector<1x1x64xf32>
      tpu.vector_store %arg6[%c0_19, %c1, %c0_20], %24 {strides = array<i32>} : memref<1x2x64xf32, #tpu.memory_space<vmem>>, vector<1x1x64xf32>,
    } else {
    }
    return
  }
  func.func @transform_0(%arg0: i32, %arg1: i32, %arg2: i32) -> (i32, i32) {
    %c0_i32 = arith.constant 0 : i32
    return %arg0, %arg2 : i32, i32
  }
  func.func @transform_1(%arg0: i32, %arg1: i32, %arg2: i32) -> (i32, i32) {
    %c0_i32 = arith.constant 0 : i32
    return %arg2, %arg1 : i32, i32
  }
  func.func @transform_2(%arg0: i32, %arg1: i32, %arg2: i32) -> (i32, i32) {
    %c0_i32 = arith.constant 0 : i32
    return %arg0, %arg1 : i32, i32
  }
  func.func @transform_3(%arg0: i32, %arg1: i32, %arg2: i32) -> (i32, i32, i32) {
    %c0_i32 = arith.constant 0 : i32
    %c0_i32_0 = arith.constant 0 : i32
    return %arg0, %c0_i32, %arg1 : i32, i32, i32
  }
}

module attributes {stable_mosaic.version = 11 : i64} {
  func.func @_affine2d_add_kernel(%arg0: i32, %arg1: memref<64x256xf32, #tpu.memory_space<vmem>>, %arg2: memref<1x256xf32, #tpu.memory_space<vmem>>, %arg3: memref<1x256xf32, #tpu.memory_space<vmem>>, %arg4: memref<64x256xf32, #tpu.memory_space<vmem>>, %arg5: memref<64x256xf32, #tpu.memory_space<vmem>>) attributes {dimension_semantics = [#tpu.dimension_semantics<parallel>], iteration_bounds = array<i64: 1>, scalar_prefetch = 0 : i64, scratch_operands = 0 : i64, tpu.core_type = #tpu.core_type<tc>, window_params = [{transform_indices = @transform_0, window_bounds = array<i64: 64, 256>}, {pipeline_mode = #tpu.pipeline_mode<synchronous>, transform_indices = @transform_1, window_bounds = array<i64: 1, 256>}, {pipeline_mode = #tpu.pipeline_mode<synchronous>, transform_indices = @transform_2, window_bounds = array<i64: 1, 256>}, {transform_indices = @transform_3, window_bounds = array<i64: 64, 256>}, {transform_indices = @transform_4, window_bounds = array<i64: 64, 256>}]} {
    %c0 = arith.constant 0 : index
    %c0_0 = arith.constant 0 : index
    %0 = vector.load %arg1[%c0, %c0_0] : memref<64x256xf32, #tpu.memory_space<vmem>>, vector<64x256xf32>
    %c0_1 = arith.constant 0 : index
    %c0_2 = arith.constant 0 : index
    %1 = vector.load %arg2[%c0_1, %c0_2] : memref<1x256xf32, #tpu.memory_space<vmem>>, vector<1x256xf32>
    %2 = vector.broadcast %1 : vector<1x256xf32> to vector<64x256xf32>
    %3 = arith.mulf %0, %2 : vector<64x256xf32>
    %c0_3 = arith.constant 0 : index
    %c0_4 = arith.constant 0 : index
    %4 = vector.load %arg3[%c0_3, %c0_4] : memref<1x256xf32, #tpu.memory_space<vmem>>, vector<1x256xf32>
    %5 = vector.broadcast %4 : vector<1x256xf32> to vector<64x256xf32>
    %6 = arith.addf %3, %5 : vector<64x256xf32>
    %c0_5 = arith.constant 0 : index
    %c0_6 = arith.constant 0 : index
    %7 = vector.load %arg4[%c0_5, %c0_6] : memref<64x256xf32, #tpu.memory_space<vmem>>, vector<64x256xf32>
    %8 = arith.addf %6, %7 : vector<64x256xf32>
    %cst = arith.constant 0.000000e+00 : f32
    %9 = vector.broadcast %cst : f32 to vector<64x256xf32>
    %10 = arith.maximumf %8, %9 : vector<64x256xf32>
    %c0_7 = arith.constant 0 : index
    %c0_8 = arith.constant 0 : index
    %11 = vector.load %arg5[%c0_7, %c0_8] : memref<64x256xf32, #tpu.memory_space<vmem>>, vector<64x256xf32>
    tpu.vector_store %arg5[%c0_7, %c0_8], %10 {strides = array<i32>} : memref<64x256xf32, #tpu.memory_space<vmem>>, vector<64x256xf32>,
    return
  }
  func.func @transform_0(%arg0: i32) -> (i32, i32) {
    %c0_i32 = arith.constant 0 : i32
    %c0_i32_0 = arith.constant 0 : i32
    return %arg0, %c0_i32 : i32, i32
  }
  func.func @transform_1(%arg0: i32) -> (i32, i32) {
    %c0_i32 = arith.constant 0 : i32
    %c0_i32_0 = arith.constant 0 : i32
    %c0_i32_1 = arith.constant 0 : i32
    return %c0_i32, %c0_i32_0 : i32, i32
  }
  func.func @transform_2(%arg0: i32) -> (i32, i32) {
    %c0_i32 = arith.constant 0 : i32
    %c0_i32_0 = arith.constant 0 : i32
    %c0_i32_1 = arith.constant 0 : i32
    return %c0_i32, %c0_i32_0 : i32, i32
  }
  func.func @transform_3(%arg0: i32) -> (i32, i32) {
    %c0_i32 = arith.constant 0 : i32
    %c0_i32_0 = arith.constant 0 : i32
    return %arg0, %c0_i32 : i32, i32
  }
  func.func @transform_4(%arg0: i32) -> (i32, i32) {
    %c0_i32 = arith.constant 0 : i32
    %c0_i32_0 = arith.constant 0 : i32
    return %arg0, %c0_i32 : i32, i32
  }
}

</mosaic_0001>

<bundles_post_ra>
// kernel: tanet_forward.29
= control target key start
LH: loop header
LB: loop body
LE: loop exit
PB: predicated region body
PF: predicated region fallthrough
CT: control target
= control target key end

     0   :  { %vm156_vm0 = vcmask 523264   ;;  %s513_s0 = inlined_call_operand.vmem [shape: f32[256,64], index: 0, kind: input, shape index: {}]   ;;  %s514_s1 = inlined_call_operand.vmem [shape: f32[1,64], index: 1, kind: input, shape index: {}]   ;;  %s515_s2 = inlined_call_operand.vmem [shape: f32[1,64], index: 2, kind: input, shape index: {}]   ;;  %s516_s3 = inlined_call_operand.vmem [shape: f32[256,64], index: 3, kind: output, shape index: {}]  }
   0x1   :  { %v14_v0 = vld [vmem:[%s513_s0] sm:$0xff]  ;;  %v15_v4 = vld [vmem:[%s513_s0 + $0x8] sm:$0xff]  ;;  %v16_v5 = vld [vmem:[%s513_s0 + $0x10] sm:$0xff] }
   0x2   :  { %v221_v1 = vld [vmem:[%s514_s1] ss:$0 sm:$0xff]  ;;  %v17_v6 = vld [vmem:[%s513_s0 + $0x18] sm:$0xff]  ;;  %v19_v11 = vld [vmem:[%s513_s0 + $0x28] sm:$0xff] }
   0x3   :  { %v226_v2 = vld [vmem:[%s515_s2] ss:$0 sm:$0xff]  ;;  %v53_v3 = vmul.f32 %v221_v1, %v14_v0  ;;  %v54_v7 = vmul.f32 %v221_v1, %v15_v4  ;;  %v55_v8 = vmul.f32 %v221_v1, %v16_v5  ;;  %v56_v9 = vmul.f32 %v221_v1, %v17_v6  ;;  %v20_v12 = vld [vmem:[%s513_s0 + $0x30] sm:$0xff]  ;;  %v21_v17 = vld [vmem:[%s513_s0 + $0x38] sm:$0xff] }
   0x4   :  { %v18_v10 = vld [vmem:[%s513_s0 + $0x20] sm:$0xff]  ;;  %v58_v15 = vmul.f32 %v221_v1, %v19_v11  ;;  %v59_v16 = vmul.f32 %v221_v1, %v20_v12  ;;  %v60_v21 = vmul.f32 %v221_v1, %v21_v17  ;;  %v23_v27 = vld [vmem:[%s513_s0 + $0x48] sm:$0xff]  ;;  %v24_v28 = vld [vmem:[%s513_s0 + $0x50] sm:$0xff] }
   0x5   :  { %v92_v13 = vadd.f32 %v226_v2, %v53_v3  ;;  %v57_v14 = vmul.f32 %v221_v1, %v18_v10  ;;  %v93_v18 = vadd.f32 %v226_v2, %v54_v7  ;;  %v94_v19 = vadd.f32 %v226_v2, %v55_v8  ;;  %v22_v22 = vld [vmem:[%s513_s0 + $0x40] sm:$0xff]  ;;  %v25_v29 = vld [vmem:[%s513_s0 + $0x58] sm:$0xff]  ;;  %v27_v35 = vld [vmem:[%s513_s0 + $0x68] sm:$0xff] }
   0x6   :  { %v95_v20 = vadd.f32 %v226_v2, %v56_v9  ;;  %v97_v25 = vadd.f32 %v226_v2, %v58_v15  ;;  %v98_v26 = vadd.f32 %v226_v2, %v59_v16  ;;  %v99_v33 = vadd.f32 %v226_v2, %v60_v21  ;;  %v26_v34 = vld [vmem:[%s513_s0 + $0x60] sm:$0xff]  ;;  %v28_v36 = vld [vmem:[%s513_s0 + $0x70] sm:$0xff]  ;;  %v29_v41 = vld [vmem:[%s513_s0 + $0x78] sm:$0xff] }
   0x7   :  { %v124_v23 = vmax.f32 %v92_v13, 0.0  ;;  %v96_v24 = vadd.f32 %v226_v2, %v57_v14  ;;  %v125_v30 = vmax.f32 %v93_v18, 0.0  ;;  %v126_v31 = vmax.f32 %v94_v19, 0.0  ;;  %v30_v54 = vld [vmem:[%s513_s0 + $0x80] sm:$0xff]  ;;  %v31_v59 = vld [vmem:[%s513_s0 + $0x88] sm:$0xff]  ;;  %v32_v60 = vld [vmem:[%s513_s0 + $0x90] sm:$0xff] }
   0x8   :  { %v127_v32 = vmax.f32 %v95_v20, 0.0  ;;  %v129_v38 = vmax.f32 %v97_v25, 0.0  ;;  %v130_v39 = vmax.f32 %v98_v26, 0.0  ;;  %v61_v40 = vmul.f32 %v221_v1, %v22_v22  ;;  %v33_v61 = vld [vmem:[%s513_s0 + $0x98] sm:$0xff]  ;;  %v34_v4 = vld [vmem:[%s513_s0 + $0xa0] sm:$0xff]  ;;  %v35_v5 = vld [vmem:[%s513_s0 + $0xa8] sm:$0xff] }
   0x9   :  { %157 = vst.msk [vmem:[%s516_s3] sm:$0xff] %vm156_vm0, %v124_v23  ;;  %v128_v37 = vmax.f32 %v96_v24, 0.0  ;;  %158 = vst.msk [vmem:[%s516_s3 + $0x8] sm:$0xff] %vm156_vm0, %v125_v30  ;;  %v131_v42 = vmax.f32 %v99_v33, 0.0  ;;  %v62_v43 = vmul.f32 %v221_v1, %v23_v27  ;;  %v63_v44 = vmul.f32 %v221_v1, %v24_v28  ;;  %v36_v6 = vld [vmem:[%s513_s0 + $0xb0] sm:$0xff]  ;;  %v37_v11 = vld [vmem:[%s513_s0 + $0xb8] sm:$0xff] }
   0xa   :  { %159 = vst.msk [vmem:[%s516_s3 + $0x10] sm:$0xff] %vm156_vm0, %v126_v31  ;;  %160 = vst.msk [vmem:[%s516_s3 + $0x18] sm:$0xff] %vm156_vm0, %v127_v32  ;;  %v64_v45 = vmul.f32 %v221_v1, %v25_v29  ;;  %v100_v46 = vadd.f32 %v226_v2, %v61_v40  ;;  %v65_v47 = vmul.f32 %v221_v1, %v26_v34  ;;  %v38_v24 = vld [vmem:[%s513_s0 + $0xc0] sm:$0xff]  ;;  %v39_v29 = vld [vmem:[%s513_s0 + $0xc8] sm:$0xff] }
   0xb   :  { %161 = vst.msk [vmem:[%s516_s3 + $0x20] sm:$0xff] %vm156_vm0, %v128_v37  ;;  %162 = vst.msk [vmem:[%s516_s3 + $0x28] sm:$0xff] %vm156_vm0, %v129_v38  ;;  %v66_v48 = vmul.f32 %v221_v1, %v27_v35  ;;  %v67_v49 = vmul.f32 %v221_v1, %v28_v36  ;;  %v101_v50 = vadd.f32 %v226_v2, %v62_v43  ;;  %v40_v30 = vld [vmem:[%s513_s0 + $0xd0] sm:$0xff]  ;;  %v41_v31 = vld [vmem:[%s513_s0 + $0xd8] sm:$0xff] }
   0xc   :  { %163 = vst.msk [vmem:[%s516_s3 + $0x30] sm:$0xff] %vm156_vm0, %v130_v39  ;;  %164 = vst.msk [vmem:[%s516_s3 + $0x38] sm:$0xff] %vm156_vm0, %v131_v42  ;;  %v102_v51 = vadd.f32 %v226_v2, %v63_v44  ;;  %v103_v52 = vadd.f32 %v226_v2, %v64_v45  ;;  %v68_v53 = vmul.f32 %v221_v1, %v29_v41  ;;  %v132_v55 = vmax.f32 %v100_v46, 0.0  ;;  %v42_v36 = vld [vmem:[%s513_s0 + $0xe0] sm:$0xff]  ;;  %v43_v37 = vld [vmem:[%s513_s0 + $0xe8] sm:$0xff] }
   0xd   :  { %v104_v56 = vadd.f32 %v226_v2, %v65_v47  ;;  %v105_v57 = vadd.f32 %v226_v2, %v66_v48  ;;  %v106_v58 = vadd.f32 %v226_v2, %v67_v49  ;;  %v133_v62 = vmax.f32 %v101_v50, 0.0  ;;  %v44_v38 = vld [vmem:[%s513_s0 + $0xf0] sm:$0xff]  ;;  %v45_v43 = vld [vmem:[%s513_s0 + $0xf8] sm:$0xff] }
   0xe   :  { %v134_v63 = vmax.f32 %v102_v51, 0.0  ;;  %v135_v0 = vmax.f32 %v103_v52, 0.0  ;;  %v107_v3 = vadd.f32 %v226_v2, %v68_v53  ;;  %165 = vst.msk [vmem:[%s516_s3 + $0x40] sm:$0xff] %vm156_vm0, %v132_v55  ;;  %v69_v10 = vmul.f32 %v221_v1, %v30_v54 }
   0xf   :  { %v136_v7 = vmax.f32 %v104_v56, 0.0  ;;  %v137_v8 = vmax.f32 %v105_v57, 0.0  ;;  %v138_v9 = vmax.f32 %v106_v58, 0.0  ;;  %166 = vst.msk [vmem:[%s516_s3 + $0x48] sm:$0xff] %vm156_vm0, %v133_v62  ;;  %v70_v13 = vmul.f32 %v221_v1, %v31_v59 }
  0x10   :  { %167 = vst.msk [vmem:[%s516_s3 + $0x50] sm:$0xff] %vm156_vm0, %v134_v63  ;;  %168 = vst.msk [vmem:[%s516_s3 + $0x58] sm:$0xff] %vm156_vm0, %v135_v0  ;;  %v139_v12 = vmax.f32 %v107_v3, 0.0  ;;  %v71_v14 = vmul.f32 %v221_v1, %v32_v60  ;;  %v72_v15 = vmul.f32 %v221_v1, %v33_v61  ;;  %v108_v16 = vadd.f32 %v226_v2, %v69_v10 }
  0x11   :  { %169 = vst.msk [vmem:[%s516_s3 + $0x60] sm:$0xff] %vm156_vm0, %v136_v7  ;;  %170 = vst.msk [vmem:[%s516_s3 + $0x68] sm:$0xff] %vm156_vm0, %v137_v8  ;;  %v73_v17 = vmul.f32 %v221_v1, %v34_v4  ;;  %v74_v18 = vmul.f32 %v221_v1, %v35_v5  ;;  %v75_v19 = vmul.f32 %v221_v1, %v36_v6 }
  0x12   :  { %171 = vst.msk [vmem:[%s516_s3 + $0x70] sm:$0xff] %vm156_vm0, %v138_v9  ;;  %172 = vst.msk [vmem:[%s516_s3 + $0x78] sm:$0xff] %vm156_vm0, %v139_v12  ;;  %v109_v20 = vadd.f32 %v226_v2, %v70_v13  ;;  %v110_v21 = vadd.f32 %v226_v2, %v71_v14  ;;  %v111_v22 = vadd.f32 %v226_v2, %v72_v15  ;;  %v140_v25 = vmax.f32 %v108_v16, 0.0 }
  0x13   :  { %v76_v23 = vmul.f32 %v221_v1, %v37_v11  ;;  %v112_v26 = vadd.f32 %v226_v2, %v73_v17  ;;  %v113_v27 = vadd.f32 %v226_v2, %v74_v18  ;;  %v114_v28 = vadd.f32 %v226_v2, %v75_v19 }
  0x14   :  { %v141_v32 = vmax.f32 %v109_v20, 0.0  ;;  %v142_v33 = vmax.f32 %v110_v21, 0.0  ;;  %v143_v34 = vmax.f32 %v111_v22, 0.0  ;;  %173 = vst.msk [vmem:[%s516_s3 + $0x80] sm:$0xff] %vm156_vm0, %v140_v25  ;;  %v77_v42 = vmul.f32 %v221_v1, %v38_v24 }
  0x15   :  { %v115_v35 = vadd.f32 %v226_v2, %v76_v23  ;;  %v144_v39 = vmax.f32 %v112_v26, 0.0  ;;  %v145_v40 = vmax.f32 %v113_v27, 0.0  ;;  %v146_v41 = vmax.f32 %v114_v28, 0.0 }
  0x16   :  { %174 = vst.msk [vmem:[%s516_s3 + $0x88] sm:$0xff] %vm156_vm0, %v141_v32  ;;  %175 = vst.msk [vmem:[%s516_s3 + $0x90] sm:$0xff] %vm156_vm0, %v142_v33  ;;  %v78_v45 = vmul.f32 %v221_v1, %v39_v29  ;;  %v79_v46 = vmul.f32 %v221_v1, %v40_v30  ;;  %v80_v47 = vmul.f32 %v221_v1, %v41_v31 }
  0x17   :  { %176 = vst.msk [vmem:[%s516_s3 + $0x98] sm:$0xff] %vm156_vm0, %v143_v34  ;;  %v147_v44 = vmax.f32 %v115_v35, 0.0  ;;  %177 = vst.msk [vmem:[%s516_s3 + $0xa0] sm:$0xff] %vm156_vm0, %v144_v39  ;;  %v116_v48 = vadd.f32 %v226_v2, %v77_v42  ;;  %v81_v49 = vmul.f32 %v221_v1, %v42_v36  ;;  %v82_v50 = vmul.f32 %v221_v1, %v43_v37 }
  0x18   :  { %178 = vst.msk [vmem:[%s516_s3 + $0xa8] sm:$0xff] %vm156_vm0, %v145_v40  ;;  %179 = vst.msk [vmem:[%s516_s3 + $0xb0] sm:$0xff] %vm156_vm0, %v146_v41  ;;  %v83_v51 = vmul.f32 %v221_v1, %v44_v38  ;;  %v117_v52 = vadd.f32 %v226_v2, %v78_v45  ;;  %v118_v53 = vadd.f32 %v226_v2, %v79_v46 }
  0x19   :  { %180 = vst.msk [vmem:[%s516_s3 + $0xb8] sm:$0xff] %vm156_vm0, %v147_v44  ;;  %v119_v54 = vadd.f32 %v226_v2, %v80_v47  ;;  %v84_v55 = vmul.f32 %v221_v1, %v45_v43  ;;  %v148_v56 = vmax.f32 %v116_v48, 0.0  ;;  %v120_v57 = vadd.f32 %v226_v2, %v81_v49 }
  0x1a   :  { %v121_v58 = vadd.f32 %v226_v2, %v82_v50  ;;  %v122_v59 = vadd.f32 %v226_v2, %v83_v51  ;;  %v149_v60 = vmax.f32 %v117_v52, 0.0  ;;  %v150_v61 = vmax.f32 %v118_v53, 0.0 }
  0x1b   :  { %v151_v62 = vmax.f32 %v119_v54, 0.0  ;;  %v123_v63 = vadd.f32 %v226_v2, %v84_v55  ;;  %181 = vst.msk [vmem:[%s516_s3 + $0xc0] sm:$0xff] %vm156_vm0, %v148_v56  ;;  %v152_v0 = vmax.f32 %v120_v57, 0.0 }
  0x1c   :  { %v153_v3 = vmax.f32 %v121_v58, 0.0  ;;  %v154_v1 = vmax.f32 %v122_v59, 0.0  ;;  %182 = vst.msk [vmem:[%s516_s3 + $0xc8] sm:$0xff] %vm156_vm0, %v149_v60  ;;  %183 = vst.msk [vmem:[%s516_s3 + $0xd0] sm:$0xff] %vm156_vm0, %v150_v61 }
  0x1d   :  { %184 = vst.msk [vmem:[%s516_s3 + $0xd8] sm:$0xff] %vm156_vm0, %v151_v62  ;;  %v155_v2 = vmax.f32 %v123_v63, 0.0  ;;  %185 = vst.msk [vmem:[%s516_s3 + $0xe0] sm:$0xff] %vm156_vm0, %v152_v0 }
  0x1e   :  { %186 = vst.msk [vmem:[%s516_s3 + $0xe8] sm:$0xff] %vm156_vm0, %v153_v3  ;;  %187 = vst.msk [vmem:[%s516_s3 + $0xf0] sm:$0xff] %vm156_vm0, %v154_v1 }
  0x1f   :  { %188 = vst.msk [vmem:[%s516_s3 + $0xf8] sm:$0xff] %vm156_vm0, %v155_v2 }

// kernel: tanet_forward.28
= control target key start
LH: loop header
LB: loop body
LE: loop exit
PB: predicated region body
PF: predicated region fallthrough
CT: control target
= control target key end

     0   :  { %v886_v0 = vmov 0.0|0.0   ;;  %vm17_vm0 = vcmask 523264   ;;  %v887_v6 = vmov 0.0   ;;  %vm165_vm1 = vcmask 154624   ;;  %s1659_s1 = inlined_call_operand.vmem [shape: f32[147,64], index: 1, kind: input, shape index: {}]   ;;  %s1660_s0 = inlined_call_operand.vmem [shape: f32[256,147], index: 0, kind: input, shape index: {}]   ;;  %s1661_s2 = inlined_call_operand.vmem [shape: f32[256,64], index: 2, kind: output, shape index: {0}]   ;;  %s1662_s3 = inlined_call_operand.vmem [shape: f32[1,2,64], index: 3, kind: output, shape index: {1}]  }
   0x1   :  { %837 = vmatprep.subr.bf16.mxu0 %v886_v0  ;;  %v146_v1 = vld [vmem:[%s1659_s1] sm:$0xff]  ;;  %v147_v2 = vld [vmem:[%s1659_s1 + $0x8] sm:$0xff]  ;;  %v148_v3 = vld [vmem:[%s1659_s1 + $0x10] sm:$0xff]  ;;  %864 = vmatprep.subr.bf16.mxu1 %v886_v0  ;;  %18 = vst.msk [vmem:[#allocation2] sm:$0xff] %vm17_vm0, %v887_v6  ;;  %vm262_vm2 = vcmask 1042432   ;;  %vm692_vm3 = vcmask 516096  }
   0x2   :  { %v838_v4 = vpack.c.bf16 %v147_v2, %v146_v1  ;;  %v149_v5 = vld [vmem:[%s1659_s1 + $0x18] sm:$0xff]  ;;  %19 = vst.msk [vmem:[#allocation2 + $0x8] sm:$0xff] %vm17_vm0, %v887_v6  ;;  %20 = vst.msk [vmem:[#allocation2 + $0x10] sm:$0xff] %vm17_vm0, %v887_v6  ;;  %v150_v8 = vld [vmem:[%s1659_s1 + $0x20] sm:$0xff] }
   0x3   :  { %21 = vst.msk [vmem:[#allocation2 + $0x18] sm:$0xff] %vm17_vm0, %v887_v6  ;;  %22 = vst.msk [vmem:[#allocation2 + $0x20] sm:$0xff] %vm17_vm0, %v887_v6  ;;  %v841_v7 = vpack.c.bf16 %v149_v5, %v148_v3  ;;  %v151_v9 = vld [vmem:[%s1659_s1 + $0x28] sm:$0xff]  ;;  %v152_v12 = vld [vmem:[%s1659_s1 + $0x30] sm:$0xff] }
   0x4   :  { %23 = vst.msk [vmem:[#allocation2 + $0x28] sm:$0xff] %vm17_vm0, %v887_v6  ;;  %24 = vst.msk [vmem:[#allocation2 + $0x30] sm:$0xff] %vm17_vm0, %v887_v6  ;;  %839 = vmatpush1.bf16.msra.mxu0 %v838_v4  ;;  %874 = vmatpush1.bf16.msra.mxu1 %v838_v4  ;;  %v83_v10 = vld [vmem:[%s1660_s0 + $0x8] sm:$0xff]  ;;  %v844_v11 = vpack.c.bf16 %v151_v9, %v150_v8  ;;  %v153_v13 = vld [vmem:[%s1659_s1 + $0x38] sm:$0xff] }
   0x5   :  { %25 = vst.msk [vmem:[#allocation2 + $0x38] sm:$0xff] %vm17_vm0, %v887_v6  ;;  %26 = vst.msk [vmem:[#allocation2 + $0x40] sm:$0xff] %vm17_vm0, %v887_v6  ;;  %840 = vmatprep.subr.bf16.mxu0 %v886_v0  ;;  %865 = vmatprep.subr.bf16.mxu1 %v886_v0  ;;  %v847_v14 = vpack.c.bf16 %v153_v13, %v152_v12  ;;  %v115_v15 = vld [vmem:[%s1660_s0 + $0x108] sm:$0xff]  ;;  %v154_v16 = vld [vmem:[%s1659_s1 + $0x40] sm:$0xff] }
   0x6   :  { %27 = vst.msk [vmem:[#allocation2 + $0x48] sm:$0xff] %vm17_vm0, %v887_v6  ;;  %28 = vst.msk [vmem:[#allocation2 + $0x50] sm:$0xff] %vm17_vm0, %v887_v6  ;;  %805 = vmatprep.mubr.msk.f32.mxu0 %vm165_vm1, %v83_v10  ;;  %v155_v17 = vld [vmem:[%s1659_s1 + $0x48] sm:$0xff]  ;;  %821 = vmatprep.mubr.msk.f32.mxu1 %vm165_vm1, %v115_v15  ;;  %v156_v19 = vld [vmem:[%s1659_s1 + $0x50] sm:$0xff] }
   0x7   :  { %29 = vst.msk [vmem:[#allocation2 + $0x58] sm:$0xff] %vm17_vm0, %v887_v6  ;;  %30 = vst.msk [vmem:[#allocation2 + $0x60] sm:$0xff] %vm17_vm0, %v887_v6  ;;  %v850_v18 = vpack.c.bf16 %v155_v17, %v154_v16  ;;  %v157_v20 = vld [vmem:[%s1659_s1 + $0x58] sm:$0xff]  ;;  %v158_v22 = vld [vmem:[%s1659_s1 + $0x60] sm:$0xff] }
   0x8   :  { %31 = vst.msk [vmem:[#allocation2 + $0x68] sm:$0xff] %vm17_vm0, %v887_v6  ;;  %32 = vst.msk [vmem:[#allocation2 + $0x70] sm:$0xff] %vm17_vm0, %v887_v6  ;;  %842 = vmatpush1.bf16.msra.mxu0 %v841_v7  ;;  %875 = vmatpush1.bf16.msra.mxu1 %v841_v7  ;;  %v853_v21 = vpack.c.bf16 %v157_v20, %v156_v19  ;;  %v159_v23 = vld [vmem:[%s1659_s1 + $0x68] sm:$0xff]  ;;  %v160_v25 = vld [vmem:[%s1659_s1 + $0x70] sm:$0xff] }
   0x9   :  { %33 = vst.msk [vmem:[#allocation2 + $0x78] sm:$0xff] %vm17_vm0, %v887_v6  ;;  %34 = vst.msk [vmem:[#allocation2 + $0x80] sm:$0xff] %vm17_vm0, %v887_v6  ;;  %843 = vmatprep.subr.bf16.mxu0 %v886_v0  ;;  %866 = vmatprep.subr.bf16.mxu1 %v886_v0  ;;  %v856_v24 = vpack.c.bf16 %v159_v23, %v158_v22  ;;  %v161_v26 = vld [vmem:[%s1659_s1 + $0x78] sm:$0xff]  ;;  %v162_v28 = vld [vmem:[%s1659_s1 + $0x80] sm:$0xff] }
   0xa   :  { %35 = vst.msk [vmem:[#allocation2 + $0x88] sm:$0xff] %vm17_vm0, %v887_v6  ;;  %36 = vst.msk [vmem:[#allocation2 + $0x90] sm:$0xff] %vm17_vm0, %v887_v6  ;;  %v859_v27 = vpack.c.bf16 %v161_v26, %v160_v25  ;;  %v163_v29 = vld [vmem:[%s1659_s1 + $0x88] sm:$0xff]  ;;  %v164_v31 = vld [vmem:[%s1659_s1 + $0x90] sm:$0x7] }
   0xb   :  { %37 = vst.msk [vmem:[#allocation2 + $0x98] sm:$0xff] %vm17_vm0, %v887_v6  ;;  %38 = vst.msk [vmem:[#allocation2 + $0xa0] sm:$0xff] %vm17_vm0, %v887_v6  ;;  %v862_v30 = vpack.c.bf16 %v163_v29, %v162_v28  ;;  %v82_v32 = vld [vmem:[%s1660_s0] sm:$0xff]  ;;  %v85_v34 = vld [vmem:[%s1660_s0 + $0x18] sm:$0xff] }
   0xc   :  { %39 = vst.msk [vmem:[#allocation2 + $0xa8] sm:$0xff] %vm17_vm0, %v887_v6  ;;  %40 = vst.msk [vmem:[#allocation2 + $0xb0] sm:$0xff] %vm17_vm0, %v887_v6  ;;  %845 = vmatpush1.bf16.msra.mxu0 %v844_v11  ;;  %876 = vmatpush1.bf16.msra.mxu1 %v844_v11  ;;  %v114_v33 = vld [vmem:[%s1660_s0 + $0x100] sm:$0xff]  ;;  %v117_v35 = vld [vmem:[%s1660_s0 + $0x118] sm:$0xff] }
   0xd   :  { %41 = vst.msk [vmem:[#allocation2 + $0xb8] sm:$0xff] %vm17_vm0, %v887_v6  ;;  %42 = vst.msk [vmem:[#allocation2 + $0xc0] sm:$0xff] %vm17_vm0, %v887_v6  ;;  %846 = vmatprep.subr.bf16.mxu0 %v886_v0  ;;  %867 = vmatprep.subr.bf16.mxu1 %v886_v0  ;;  %v84_v36 = vld [vmem:[%s1660_s0 + $0x10] sm:$0xff]  ;;  %v87_v38 = vld [vmem:[%s1660_s0 + $0x28] sm:$0xff] }
   0xe   :  { %43 = vst.msk [vmem:[#allocation2 + $0xc8] sm:$0xff] %vm17_vm0, %v887_v6  ;;  %44 = vst.msk [vmem:[#allocation2 + $0xd0] sm:$0xff] %vm17_vm0, %v887_v6  ;;  %v116_v37 = vld [vmem:[%s1660_s0 + $0x110] sm:$0xff]  ;;  %v119_v39 = vld [vmem:[%s1660_s0 + $0x128] sm:$0xff] }
   0xf   :  { %45 = vst.msk [vmem:[#allocation2 + $0xd8] sm:$0xff] %vm17_vm0, %v887_v6  ;;  %46 = vst.msk [vmem:[#allocation2 + $0xe0] sm:$0xff] %vm17_vm0, %v887_v6  ;;  %v86_v40 = vld [vmem:[%s1660_s0 + $0x20] sm:$0xff]  ;;  %v89_v42 = vld [vmem:[%s1660_s0 + $0x38] sm:$0xff] }
  0x10   :  { %47 = vst.msk [vmem:[#allocation2 + $0xe8] sm:$0xff] %vm17_vm0, %v887_v6  ;;  %48 = vst.msk [vmem:[#allocation2 + $0xf0] sm:$0xff] %vm17_vm0, %v887_v6  ;;  %848 = vmatpush1.bf16.msra.mxu0 %v847_v14  ;;  %877 = vmatpush1.bf16.msra.mxu1 %v847_v14  ;;  %v118_v41 = vld [vmem:[%s1660_s0 + $0x120] sm:$0xff]  ;;  %v121_v43 = vld [vmem:[%s1660_s0 + $0x138] sm:$0xff] }
  0x11   :  { %49 = vst.msk [vmem:[#allocation2 + $0xf8] sm:$0xff] %vm17_vm0, %v887_v6  ;;  %849 = vmatprep.subr.bf16.mxu0 %v886_v0  ;;  %868 = vmatprep.subr.bf16.mxu1 %v886_v0  ;;  %v88_v44 = vld [vmem:[%s1660_s0 + $0x30] sm:$0xff]  ;;  %v91_v46 = vld [vmem:[%s1660_s0 + $0x48] sm:$0xff]  ;;  %v90_v48 = vld [vmem:[%s1660_s0 + $0x40] sm:$0xff] }
  0x12   :  { %v120_v45 = vld [vmem:[%s1660_s0 + $0x130] sm:$0xff]  ;;  %v123_v47 = vld [vmem:[%s1660_s0 + $0x148] sm:$0xff]  ;;  %v122_v49 = vld [vmem:[%s1660_s0 + $0x140] sm:$0xff] }
  0x13   :  { %v93_v50 = vld [vmem:[%s1660_s0 + $0x58] sm:$0xff]  ;;  %v92_v52 = vld [vmem:[%s1660_s0 + $0x50] sm:$0xff]  ;;  %v95_v54 = vld [vmem:[%s1660_s0 + $0x68] sm:$0xff] }
  0x14   :  { %851 = vmatpush1.bf16.msra.mxu0 %v850_v18  ;;  %878 = vmatpush1.bf16.msra.mxu1 %v850_v18  ;;  %v125_v51 = vld [vmem:[%s1660_s0 + $0x158] sm:$0xff]  ;;  %v124_v53 = vld [vmem:[%s1660_s0 + $0x150] sm:$0xff]  ;;  %v127_v55 = vld [vmem:[%s1660_s0 + $0x168] sm:$0xff] }
  0x15   :  { %852 = vmatprep.subr.bf16.mxu0 %v886_v0  ;;  %869 = vmatprep.subr.bf16.mxu1 %v886_v0  ;;  %v94_v56 = vld [vmem:[%s1660_s0 + $0x60] sm:$0xff]  ;;  %v97_v58 = vld [vmem:[%s1660_s0 + $0x78] sm:$0xff]  ;;  %v96_v60 = vld [vmem:[%s1660_s0 + $0x70] sm:$0xff] }
  0x16   :  { %v126_v57 = vld [vmem:[%s1660_s0 + $0x160] sm:$0xff]  ;;  %v129_v59 = vld [vmem:[%s1660_s0 + $0x178] sm:$0xff]  ;;  %v128_v61 = vld [vmem:[%s1660_s0 + $0x170] sm:$0xff] }
  0x17   :  { %v99_v62 = vld [vmem:[%s1660_s0 + $0x88] sm:$0xff]  ;;  %v130_v1 = vld [vmem:[%s1660_s0 + $0x180] sm:$0xff]  ;;  %v101_v2 = vld [vmem:[%s1660_s0 + $0x98] sm:$0xff] }
  0x18   :  { %854 = vmatpush1.bf16.msra.mxu0 %v853_v21  ;;  %879 = vmatpush1.bf16.msra.mxu1 %v853_v21  ;;  %v131_v63 = vld [vmem:[%s1660_s0 + $0x188] sm:$0xff]  ;;  %v133_v3 = vld [vmem:[%s1660_s0 + $0x198] sm:$0xff]  ;;  %v100_v4 = vld [vmem:[%s1660_s0 + $0x90] sm:$0xff] }
  0x19   :  { %855 = vmatprep.subr.bf16.mxu0 %v886_v0  ;;  %870 = vmatprep.subr.bf16.mxu1 %v886_v0  ;;  %v132_v5 = vld [vmem:[%s1660_s0 + $0x190] sm:$0xff]  ;;  %v135_v7 = vld [vmem:[%s1660_s0 + $0x1a8] sm:$0xff]  ;;  %v102_v8 = vld [vmem:[%s1660_s0 + $0xa0] sm:$0xff] }
  0x1a   :  { %v134_v9 = vld [vmem:[%s1660_s0 + $0x1a0] sm:$0xff]  ;;  %v105_v10 = vld [vmem:[%s1660_s0 + $0xb8] sm:$0xff]  ;;  %v104_v12 = vld [vmem:[%s1660_s0 + $0xb0] sm:$0xff] }
  0x1b   :  { %v137_v11 = vld [vmem:[%s1660_s0 + $0x1b8] sm:$0xff]  ;;  %v136_v13 = vld [vmem:[%s1660_s0 + $0x1b0] sm:$0xff]  ;;  %v107_v14 = vld [vmem:[%s1660_s0 + $0xc8] sm:$0xff] }
  0x1c   :  { %857 = vmatpush1.bf16.msra.mxu0 %v856_v24  ;;  %880 = vmatpush1.bf16.msra.mxu1 %v856_v24  ;;  %v139_v15 = vld [vmem:[%s1660_s0 + $0x1c8] sm:$0xff]  ;;  %v106_v16 = vld [vmem:[%s1660_s0 + $0xc0] sm:$0xff]  ;;  %v109_v18 = vld [vmem:[%s1660_s0 + $0xd8] sm:$0xff] }
  0x1d   :  { %858 = vmatprep.subr.bf16.mxu0 %v886_v0  ;;  %871 = vmatprep.subr.bf16.mxu1 %v886_v0  ;;  %v138_v17 = vld [vmem:[%s1660_s0 + $0x1c0] sm:$0xff]  ;;  %v141_v19 = vld [vmem:[%s1660_s0 + $0x1d8] sm:$0xff]  ;;  %v108_v20 = vld [vmem:[%s1660_s0 + $0xd0] sm:$0xff] }
  0x1e   :  { %v140_v21 = vld [vmem:[%s1660_s0 + $0x1d0] sm:$0xff]  ;;  %v111_v22 = vld [vmem:[%s1660_s0 + $0xe8] sm:$0xff]  ;;  %v110_v24 = vld [vmem:[%s1660_s0 + $0xe0] sm:$0xff] }
  0x1f   :  { %v143_v23 = vld [vmem:[%s1660_s0 + $0x1e8] sm:$0xff]  ;;  %v142_v25 = vld [vmem:[%s1660_s0 + $0x1e0] sm:$0xff]  ;;  %v113_v26 = vld [vmem:[%s1660_s0 + $0xf8] sm:$0xff] }
  0x20   :  { %860 = vmatpush1.bf16.msra.mxu0 %v859_v27  ;;  %881 = vmatpush1.bf16.msra.mxu1 %v859_v27  ;;  %v145_v27 = vld [vmem:[%s1660_s0 + $0x1f8] sm:$0xff]  ;;  %v112_v28 = vld [vmem:[%s1660_s0 + $0xf0] sm:$0xff] }
  0x21   :  { %861 = vmatprep.subr.bf16.mxu0 %v886_v0  ;;  %872 = vmatprep.subr.bf16.mxu1 %v886_v0  ;;  %v98_v0 = vld [vmem:[%s1660_s0 + $0x80] sm:$0xff]  ;;  %v144_v29 = vld [vmem:[%s1660_s0 + $0x1f0] sm:$0xff] }
  0x24   :  { %863 = vmatpush1.bf16.msra.mxu0 %v862_v30  ;;  %882 = vmatpush1.bf16.msra.mxu1 %v862_v30  ;;  %v50_v30 = vld [vmem:[#allocation2] sm:$0xff] }
  0x25   :  { %302 = vmatprep.subr.mxu0 %v887_v6  ;;  %873 = vmatprep.subr.mxu1 %v887_v6  ;;  %v103_v6 = vld [vmem:[%s1660_s0 + $0xa8] sm:$0xff] }
  0x28   :  { %804 = vmatpush1.msk.msra.mxu0 %vm262_vm2, %v164_v31  ;;  %883 = vmatpush1.msk.msra.mxu1 %vm262_vm2, %v164_v31  ;;  %v66_v31 = vld [vmem:[#allocation2 + $0x80] sm:$0xff] }
  0x29   :  { %331 = vmatmul.mubr.f32.vlgmr.msra.gmra.mrb[0].mxu0 %v82_v32  ;;  %411 = vmatmul.mubr.f32.vlgmr.msra.gmra.mrb[0].mxu1 %v114_v33 }
  0x2a   :  { %806 = vmatprep.mubr.msk.f32.mxu0 %vm165_vm1, %v85_v34  ;;  %822 = vmatprep.mubr.msk.f32.mxu1 %vm165_vm1, %v117_v35 }
  0x2d   :  { %336 = vmatmul.mubr.f32.gmra.mrb[2].mxu0 %v84_v36  ;;  %416 = vmatmul.mubr.f32.gmra.mrb[2].mxu1 %v116_v37 }
  0x2e   :  { %807 = vmatprep.mubr.msk.f32.mxu0 %vm165_vm1, %v87_v38  ;;  %823 = vmatprep.mubr.msk.f32.mxu1 %vm165_vm1, %v119_v39  ;;  %v51_v38 = vld [vmem:[#allocation2 + $0x8] sm:$0xff] }
  0x2f   :  { %v67_v39 = vld [vmem:[#allocation2 + $0x88] sm:$0xff] }
  0x31   :  { %341 = vmatmul.mubr.f32.gmra.mrb[4].mxu0 %v86_v40  ;;  %421 = vmatmul.mubr.f32.gmra.mrb[4].mxu1 %v118_v41 }
  0x32   :  { %808 = vmatprep.mubr.msk.f32.mxu0 %vm165_vm1, %v89_v42  ;;  %824 = vmatprep.mubr.msk.f32.mxu1 %vm165_vm1, %v121_v43 }
  0x35   :  { %346 = vmatmul.mubr.f32.gmra.mrb[6].mxu0 %v88_v44  ;;  %426 = vmatmul.mubr.f32.gmra.mrb[6].mxu1 %v120_v45 }
  0x36   :  { %809 = vmatprep.mubr.msk.f32.mxu0 %vm165_vm1, %v91_v46  ;;  %825 = vmatprep.mubr.msk.f32.mxu1 %vm165_vm1, %v123_v47  ;;  %v52_v46 = vld [vmem:[#allocation2 + $0x10] sm:$0xff] }
  0x37   :  { %v68_v47 = vld [vmem:[#allocation2 + $0x90] sm:$0xff] }
  0x39   :  { %351 = vmatmul.mubr.f32.gmra.mrb[8].mxu0 %v90_v48  ;;  %431 = vmatmul.mubr.f32.gmra.mrb[8].mxu1 %v122_v49 }
  0x3a   :  { %810 = vmatprep.mubr.msk.f32.mxu0 %vm165_vm1, %v93_v50  ;;  %826 = vmatprep.mubr.msk.f32.mxu1 %vm165_vm1, %v125_v51 }
  0x3d   :  { %356 = vmatmul.mubr.f32.gmra.mrb[10].mxu0 %v92_v52  ;;  %436 = vmatmul.mubr.f32.gmra.mrb[10].mxu1 %v124_v53  ;;  %v53_v52 = vld [vmem:[#allocation2 + $0x18] sm:$0xff] }
  0x3e   :  { %811 = vmatprep.mubr.msk.f32.mxu0 %vm165_vm1, %v95_v54  ;;  %827 = vmatprep.mubr.msk.f32.mxu1 %vm165_vm1, %v127_v55 }
  0x41   :  { %361 = vmatmul.mubr.f32.gmra.mrb[12].mxu0 %v94_v56  ;;  %441 = vmatmul.mubr.f32.gmra.mrb[12].mxu1 %v126_v57  ;;  %v69_v57 = vld [vmem:[#allocation2 + $0x98] sm:$0xff] }
  0x42   :  { %812 = vmatprep.mubr.msk.f32.mxu0 %vm165_vm1, %v97_v58  ;;  %828 = vmatprep.mubr.msk.f32.mxu1 %vm165_vm1, %v129_v59 }
  0x45   :  { %366 = vmatmul.mubr.f32.gmra.mrb[14].mxu0 %v96_v60  ;;  %446 = vmatmul.mubr.f32.gmra.mrb[14].mxu1 %v128_v61 }
  0x46   :  { %813 = vmatprep.mubr.msk.f32.mxu0 %vm165_vm1, %v99_v62  ;;  %829 = vmatprep.mubr.msk.f32.mxu1 %vm165_vm1, %v131_v63  ;;  %v54_v62 = vld [vmem:[#allocation2 + $0x20] sm:$0xff] }
  0x49   :  { %371 = vmatmul.mubr.f32.gmra.mrb[16].mxu0 %v98_v0  ;;  %451 = vmatmul.mubr.f32.gmra.mrb[16].mxu1 %v130_v1 }
  0x4a   :  { %814 = vmatprep.mubr.msk.f32.mxu0 %vm165_vm1, %v101_v2  ;;  %830 = vmatprep.mubr.msk.f32.mxu1 %vm165_vm1, %v133_v3  ;;  %v70_v3 = vld [vmem:[#allocation2 + $0xa0] sm:$0xff] }
  0x4d   :  { %376 = vmatmul.mubr.f32.gmra.mrb[18].mxu0 %v100_v4  ;;  %456 = vmatmul.mubr.f32.gmra.mrb[18].mxu1 %v132_v5 }
  0x4e   :  { %815 = vmatprep.mubr.msk.f32.mxu0 %vm165_vm1, %v103_v6  ;;  %831 = vmatprep.mubr.msk.f32.mxu1 %vm165_vm1, %v135_v7 }
  0x51   :  { %381 = vmatmul.mubr.f32.gmra.mrb[20].mxu0 %v102_v8  ;;  %461 = vmatmul.mubr.f32.gmra.mrb[20].mxu1 %v134_v9  ;;  %v55_v8 = vld [vmem:[#allocation2 + $0x28] sm:$0xff] }
  0x52   :  { %816 = vmatprep.mubr.msk.f32.mxu0 %vm165_vm1, %v105_v10  ;;  %832 = vmatprep.mubr.msk.f32.mxu1 %vm165_vm1, %v137_v11 }
  0x55   :  { %386 = vmatmul.mubr.f32.gmra.mrb[22].mxu0 %v104_v12  ;;  %466 = vmatmul.mubr.f32.gmra.mrb[22].mxu1 %v136_v13  ;;  %v71_v13 = vld [vmem:[#allocation2 + $0xa8] sm:$0xff] }
  0x56   :  { %817 = vmatprep.mubr.msk.f32.mxu0 %vm165_vm1, %v107_v14  ;;  %833 = vmatprep.mubr.msk.f32.mxu1 %vm165_vm1, %v139_v15 }
  0x59   :  { %391 = vmatmul.mubr.f32.gmra.mrb[24].mxu0 %v106_v16  ;;  %471 = vmatmul.mubr.f32.gmra.mrb[24].mxu1 %v138_v17 }
  0x5a   :  { %818 = vmatprep.mubr.msk.f32.mxu0 %vm165_vm1, %v109_v18  ;;  %834 = vmatprep.mubr.msk.f32.mxu1 %vm165_vm1, %v141_v19  ;;  %v56_v18 = vld [vmem:[#allocation2 + $0x30] sm:$0xff] }
  0x5d   :  { %396 = vmatmul.mubr.f32.gmra.mrb[26].mxu0 %v108_v20  ;;  %476 = vmatmul.mubr.f32.gmra.mrb[26].mxu1 %v140_v21 }
  0x5e   :  { %819 = vmatprep.mubr.msk.f32.mxu0 %vm165_vm1, %v111_v22  ;;  %835 = vmatprep.mubr.msk.f32.mxu1 %vm165_vm1, %v143_v23  ;;  %v72_v23 = vld [vmem:[#allocation2 + $0xb0] sm:$0xff] }
  0x61   :  { %401 = vmatmul.mubr.f32.gmra.mrb[28].mxu0 %v110_v24  ;;  %481 = vmatmul.mubr.f32.gmra.mrb[28].mxu1 %v142_v25 }
  0x62   :  { %820 = vmatprep.mubr.msk.f32.mxu0 %vm165_vm1, %v113_v26  ;;  %836 = vmatprep.mubr.msk.f32.mxu1 %vm165_vm1, %v145_v27 }
  0x65   :  { %406 = vmatmul.mubr.f32.gmra.mrb[30].mxu0 %v112_v28  ;;  %486 = vmatmul.mubr.f32.gmra.mrb[30].mxu1 %v144_v29  ;;  %v57_v28 = vld [vmem:[#allocation2 + $0x38] sm:$0xff] }
  0xfc   :  { %v332_v32 = vpop.f32.mrb[0].mxu0  ;;  %v412_v33 = vpop.f32.mrb[0].mxu1 }
  0xfd   :  { %v491_v34 = vadd.f32 %v332_v32, %v50_v30  ;;  %v334_v35 = vpop.f32.mrb[1].mxu0  ;;  %v507_v36 = vadd.f32 %v412_v33, %v66_v31  ;;  %v414_v37 = vpop.f32.mrb[1].mxu1  ;;  %v73_v33 = vld [vmem:[#allocation2 + $0xb8] sm:$0xff] }
  0xff   :  { %524 = vst.msk [vmem:[#allocation2] sm:$0xff] %vm17_vm0, %v491_v34  ;;  %540 = vst.msk [vmem:[#allocation2 + $0x80] sm:$0xff] %vm17_vm0, %v507_v36 }
 0x100   :  { %v337_v40 = vpop.f32.mrb[2].mxu0  ;;  %v417_v41 = vpop.f32.mrb[2].mxu1 }
 0x101   :  { %v492_v42 = vadd.f32 %v337_v40, %v51_v38  ;;  %v339_v43 = vpop.f32.mrb[3].mxu0  ;;  %v508_v44 = vadd.f32 %v417_v41, %v67_v39  ;;  %v419_v45 = vpop.f32.mrb[3].mxu1  ;;  %v58_v38 = vld [vmem:[#allocation2 + $0x40] sm:$0xff] }
 0x102   :  { %v74_v43 = vld [vmem:[#allocation2 + $0xc0] sm:$0xff] }
 0x103   :  { %525 = vst.msk [vmem:[#allocation2 + $0x8] sm:$0xff] %vm17_vm0, %v492_v42  ;;  %541 = vst.msk [vmem:[#allocation2 + $0x88] sm:$0xff] %vm17_vm0, %v508_v44 }
 0x104   :  { %v342_v48 = vpop.f32.mrb[4].mxu0  ;;  %v422_v49 = vpop.f32.mrb[4].mxu1 }
 0x105   :  { %v493_v50 = vadd.f32 %v342_v48, %v52_v46  ;;  %v344_v51 = vpop.f32.mrb[5].mxu0  ;;  %v509_v53 = vadd.f32 %v422_v49, %v68_v47  ;;  %v424_v54 = vpop.f32.mrb[5].mxu1  ;;  %v59_v48 = vld [vmem:[#allocation2 + $0x48] sm:$0xff] }
 0x106   :  { %v1277_v55 = vld [vmem:[#allocation2] sm:$0xff] }
 0x107   :  { %v1279_v56 = vld [vmem:[#allocation2 + $0x80] sm:$0xff]  ;;  %591 = vst.msk [vmem:[%s1661_s2] sm:$0xff] %vm17_vm0, %v1277_v55  ;;  %526 = vst.msk [vmem:[#allocation2 + $0x10] sm:$0xff] %vm17_vm0, %v493_v50 }
 0x108   :  { %607 = vst.msk [vmem:[%s1661_s2 + $0x80] sm:$0xff] %vm17_vm0, %v1279_v56  ;;  %542 = vst.msk [vmem:[#allocation2 + $0x90] sm:$0xff] %vm17_vm0, %v509_v53  ;;  %v347_v58 = vpop.f32.mrb[6].mxu0  ;;  %v427_v59 = vpop.f32.mrb[6].mxu1  ;;  %v75_v53 = vld [vmem:[#allocation2 + $0xc8] sm:$0xff] }
 0x109   :  { %v494_v60 = vadd.f32 %v347_v58, %v53_v52  ;;  %v349_v61 = vpop.f32.mrb[7].mxu0  ;;  %v510_v63 = vadd.f32 %v427_v59, %v69_v57  ;;  %v429_v0 = vpop.f32.mrb[7].mxu1 }
 0x10a   :  { %v1293_v1 = vld [vmem:[#allocation2 + $0x8] sm:$0xff] }
 0x10b   :  { %v1295_v2 = vld [vmem:[#allocation2 + $0x88] sm:$0xff]  ;;  %592 = vst.msk [vmem:[%s1661_s2 + $0x8] sm:$0xff] %vm17_vm0, %v1293_v1  ;;  %527 = vst.msk [vmem:[#allocation2 + $0x18] sm:$0xff] %vm17_vm0, %v494_v60  ;;  %v60_v60 = vld [vmem:[#allocation2 + $0x50] sm:$0xff] }
 0x10c   :  { %608 = vst.msk [vmem:[%s1661_s2 + $0x88] sm:$0xff] %vm17_vm0, %v1295_v2  ;;  %543 = vst.msk [vmem:[#allocation2 + $0x98] sm:$0xff] %vm17_vm0, %v510_v63  ;;  %v352_v4 = vpop.f32.mrb[8].mxu0  ;;  %v432_v5 = vpop.f32.mrb[8].mxu1 }
 0x10d   :  { %v495_v6 = vadd.f32 %v352_v4, %v54_v62  ;;  %v354_v7 = vpop.f32.mrb[9].mxu0  ;;  %v511_v9 = vadd.f32 %v432_v5, %v70_v3  ;;  %v434_v10 = vpop.f32.mrb[9].mxu1  ;;  %v76_v3 = vld [vmem:[#allocation2 + $0xd0] sm:$0xff]  ;;  %v695_v4 = vmul.f32 %v1293_v1, %v1293_v1  ;;  %v694_v5 = vmul.f32 %v1277_v55, %v1277_v55 }
 0x10e   :  { %v1309_v11 = vld [vmem:[#allocation2 + $0x10] sm:$0xff] }
 0x10f   :  { %v1311_v12 = vld [vmem:[#allocation2 + $0x90] sm:$0xff]  ;;  %593 = vst.msk [vmem:[%s1661_s2 + $0x10] sm:$0xff] %vm17_vm0, %v1309_v11  ;;  %528 = vst.msk [vmem:[#allocation2 + $0x20] sm:$0xff] %vm17_vm0, %v495_v6  ;;  %v696_v6 = vmul.f32 %v1309_v11, %v1309_v11 }
 0x110   :  { %609 = vst.msk [vmem:[%s1661_s2 + $0x90] sm:$0xff] %vm17_vm0, %v1311_v12  ;;  %544 = vst.msk [vmem:[#allocation2 + $0xa0] sm:$0xff] %vm17_vm0, %v511_v9  ;;  %v357_v14 = vpop.f32.mrb[10].mxu0  ;;  %v437_v15 = vpop.f32.mrb[10].mxu1  ;;  %v624_v9 = vsel %vm17_vm0, %v1293_v1, 0.0 }
 0x111   :  { %v496_v16 = vadd.f32 %v357_v14, %v55_v8  ;;  %v359_v17 = vpop.f32.mrb[11].mxu0  ;;  %v512_v19 = vadd.f32 %v437_v15, %v71_v13  ;;  %v439_v20 = vpop.f32.mrb[11].mxu1  ;;  %v61_v14 = vld [vmem:[#allocation2 + $0x58] sm:$0xff] }
 0x112   :  { %v1325_v21 = vld [vmem:[#allocation2 + $0x18] sm:$0xff]  ;;  %v623_v20 = vsel %vm17_vm0, %v1277_v55, 0.0  ;;  %v726_v55 = vsel %vm17_vm0, %v694_v5, 0.0  ;;  %v79_v5 = vld [vmem:[#allocation2 + $0xe8] sm:$0xff] }
 0x113   :  { %v1327_v22 = vld [vmem:[#allocation2 + $0x98] sm:$0xff]  ;;  %594 = vst.msk [vmem:[%s1661_s2 + $0x18] sm:$0xff] %vm17_vm0, %v1325_v21  ;;  %529 = vst.msk [vmem:[#allocation2 + $0x28] sm:$0xff] %vm17_vm0, %v496_v16  ;;  %v697_v1 = vmul.f32 %v1325_v21, %v1325_v21 }
 0x114   :  { %610 = vst.msk [vmem:[%s1661_s2 + $0x98] sm:$0xff] %vm17_vm0, %v1327_v22  ;;  %545 = vst.msk [vmem:[#allocation2 + $0xa8] sm:$0xff] %vm17_vm0, %v512_v19  ;;  %v362_v24 = vpop.f32.mrb[12].mxu0  ;;  %v442_v25 = vpop.f32.mrb[12].mxu1  ;;  %v77_v19 = vld [vmem:[#allocation2 + $0xd8] sm:$0xff] }
 0x115   :  { %v497_v26 = vadd.f32 %v362_v24, %v56_v18  ;;  %v364_v27 = vpop.f32.mrb[13].mxu0  ;;  %v513_v29 = vadd.f32 %v442_v25, %v72_v23  ;;  %v444_v30 = vpop.f32.mrb[13].mxu1  ;;  %v727_v23 = vsel %vm17_vm0, %v695_v4, 0.0  ;;  %v626_v24 = vsel %vm17_vm0, %v1309_v11, 0.0 }
 0x116   :  { %v1341_v31 = vld [vmem:[#allocation2 + $0x20] sm:$0xff]  ;;  %v625_v11 = vadd.f32 %v624_v9, %v623_v20  ;;  %v729_v25 = vsel %vm17_vm0, %v696_v6, 0.0  ;;  %v64_v20 = vld [vmem:[#allocation2 + $0x70] sm:$0xff] }
 0x117   :  { %v1343_v32 = vld [vmem:[#allocation2 + $0xa0] sm:$0xff]  ;;  %595 = vst.msk [vmem:[%s1661_s2 + $0x20] sm:$0xff] %vm17_vm0, %v1341_v31  ;;  %530 = vst.msk [vmem:[#allocation2 + $0x30] sm:$0xff] %vm17_vm0, %v497_v26 }
 0x118   :  { %611 = vst.msk [vmem:[%s1661_s2 + $0xa0] sm:$0xff] %vm17_vm0, %v1343_v32  ;;  %546 = vst.msk [vmem:[#allocation2 + $0xb0] sm:$0xff] %vm17_vm0, %v513_v29  ;;  %v367_v34 = vpop.f32.mrb[14].mxu0  ;;  %v447_v35 = vpop.f32.mrb[14].mxu1  ;;  %v698_v29 = vmul.f32 %v1341_v31, %v1341_v31 }
 0x119   :  { %v498_v36 = vadd.f32 %v367_v34, %v57_v28  ;;  %v369_v37 = vpop.f32.mrb[15].mxu0  ;;  %v514_v39 = vadd.f32 %v447_v35, %v73_v33  ;;  %v449_v40 = vpop.f32.mrb[15].mxu1  ;;  %v628_v28 = vsel %vm17_vm0, %v1325_v21, 0.0  ;;  %v62_v34 = vld [vmem:[#allocation2 + $0x60] sm:$0xff]  ;;  %v630_v21 = vsel %vm17_vm0, %v1341_v31, 0.0 }
 0x11a   :  { %v1357_v41 = vld [vmem:[#allocation2 + $0x28] sm:$0xff]  ;;  %v728_v37 = vadd.f32 %v727_v23, %v726_v55 }
 0x11b   :  { %v1359_v42 = vld [vmem:[#allocation2 + $0xa8] sm:$0xff]  ;;  %596 = vst.msk [vmem:[%s1661_s2 + $0x28] sm:$0xff] %vm17_vm0, %v1357_v41  ;;  %531 = vst.msk [vmem:[#allocation2 + $0x38] sm:$0xff] %vm17_vm0, %v498_v36 }
 0x11c   :  { %612 = vst.msk [vmem:[%s1661_s2 + $0xa8] sm:$0xff] %vm17_vm0, %v1359_v42  ;;  %547 = vst.msk [vmem:[#allocation2 + $0xb8] sm:$0xff] %vm17_vm0, %v514_v39  ;;  %v372_v44 = vpop.f32.mrb[16].mxu0  ;;  %v452_v45 = vpop.f32.mrb[16].mxu1  ;;  %v730_v31 = vadd.f32 %v729_v25, %v728_v37 }
 0x11d   :  { %v499_v46 = vadd.f32 %v372_v44, %v58_v38  ;;  %v374_v47 = vpop.f32.mrb[17].mxu0  ;;  %v515_v49 = vadd.f32 %v452_v45, %v74_v43  ;;  %v454_v50 = vpop.f32.mrb[17].mxu1  ;;  %v627_v38 = vadd.f32 %v626_v24, %v625_v11  ;;  %v78_v43 = vld [vmem:[#allocation2 + $0xe0] sm:$0xff]  ;;  %v731_v44 = vsel %vm17_vm0, %v697_v1, 0.0 }
 0x11e   :  { %v1373_v51 = vld [vmem:[#allocation2 + $0x30] sm:$0xff]  ;;  %v699_v45 = vmul.f32 %v1357_v41, %v1357_v41  ;;  %v733_v50 = vsel %vm17_vm0, %v698_v29, 0.0 }
 0x11f   :  { %v1375_v52 = vld [vmem:[#allocation2 + $0xb0] sm:$0xff]  ;;  %597 = vst.msk [vmem:[%s1661_s2 + $0x30] sm:$0xff] %vm17_vm0, %v1373_v51  ;;  %532 = vst.msk [vmem:[#allocation2 + $0x40] sm:$0xff] %vm17_vm0, %v499_v46  ;;  %v629_v46 = vadd.f32 %v628_v28, %v627_v38  ;;  %v700_v47 = vmul.f32 %v1373_v51, %v1373_v51 }
 0x120   :  { %613 = vst.msk [vmem:[%s1661_s2 + $0xb0] sm:$0xff] %vm17_vm0, %v1375_v52  ;;  %548 = vst.msk [vmem:[#allocation2 + $0xc0] sm:$0xff] %vm17_vm0, %v515_v49  ;;  %v377_v54 = vpop.f32.mrb[18].mxu0  ;;  %v457_v57 = vpop.f32.mrb[18].mxu1  ;;  %v735_v6 = vsel %vm17_vm0, %v699_v45, 0.0 }
 0x121   :  { %v500_v58 = vadd.f32 %v377_v54, %v59_v48  ;;  %v379_v59 = vpop.f32.mrb[19].mxu0  ;;  %v516_v61 = vadd.f32 %v457_v57, %v75_v53  ;;  %v459_v62 = vpop.f32.mrb[19].mxu1  ;;  %v632_v53 = vsel %vm17_vm0, %v1357_v41, 0.0  ;;  %v737_v9 = vsel %vm17_vm0, %v700_v47, 0.0 }
 0x122   :  { %v1389_v63 = vld [vmem:[#allocation2 + $0x38] sm:$0xff]  ;;  %v631_v62 = vadd.f32 %v630_v21, %v629_v46 }
 0x123   :  { %v1391_v0 = vld [vmem:[#allocation2 + $0xb8] sm:$0xff]  ;;  %598 = vst.msk [vmem:[%s1661_s2 + $0x38] sm:$0xff] %vm17_vm0, %v1389_v63  ;;  %533 = vst.msk [vmem:[#allocation2 + $0x48] sm:$0xff] %vm17_vm0, %v500_v58  ;;  %v63_v58 = vld [vmem:[#allocation2 + $0x68] sm:$0xff] }
 0x124   :  { %614 = vst.msk [vmem:[%s1661_s2 + $0xb8] sm:$0xff] %vm17_vm0, %v1391_v0  ;;  %549 = vst.msk [vmem:[#allocation2 + $0xc8] sm:$0xff] %vm17_vm0, %v516_v61  ;;  %v382_v7 = vpop.f32.mrb[20].mxu0  ;;  %v462_v8 = vpop.f32.mrb[20].mxu1  ;;  %v732_v61 = vadd.f32 %v731_v44, %v730_v31 }
 0x125   :  { %v501_v10 = vadd.f32 %v382_v7, %v60_v60  ;;  %v384_v13 = vpop.f32.mrb[21].mxu0  ;;  %v517_v15 = vadd.f32 %v462_v8, %v76_v3  ;;  %v464_v16 = vpop.f32.mrb[21].mxu1  ;;  %v634_v7 = vsel %vm17_vm0, %v1373_v51, 0.0  ;;  %v701_v8 = vmul.f32 %v1389_v63, %v1389_v63 }
 0x126   :  { %v1413_v17 = vld [vmem:[#allocation2 + $0x40] sm:$0xff]  ;;  %v734_v41 = vadd.f32 %v733_v50, %v732_v61  ;;  %v633_v51 = vadd.f32 %v632_v53, %v631_v62 }
 0x127   :  { %v1415_v18 = vld [vmem:[#allocation2 + $0xc0] sm:$0xff]  ;;  %599 = vst.msk [vmem:[%s1661_s2 + $0x40] sm:$0xff] %vm17_vm0, %v1413_v17  ;;  %534 = vst.msk [vmem:[#allocation2 + $0x50] sm:$0xff] %vm17_vm0, %v501_v10  ;;  %v638_v28 = vsel %vm17_vm0, %v1413_v17, 0.0 }
 0x128   :  { %615 = vst.msk [vmem:[%s1661_s2 + $0xc0] sm:$0xff] %vm17_vm0, %v1415_v18  ;;  %550 = vst.msk [vmem:[#allocation2 + $0xd0] sm:$0xff] %vm17_vm0, %v517_v15  ;;  %v387_v26 = vpop.f32.mrb[22].mxu0  ;;  %v467_v27 = vpop.f32.mrb[22].mxu1  ;;  %v702_v15 = vmul.f32 %v1413_v17, %v1413_v17  ;;  %v736_v1 = vadd.f32 %v735_v6, %v734_v41  ;;  %v635_v55 = vadd.f32 %v634_v7, %v633_v51 }
 0x129   :  { %v502_v30 = vadd.f32 %v387_v26, %v61_v14  ;;  %v389_v33 = vpop.f32.mrb[23].mxu0  ;;  %v518_v35 = vadd.f32 %v467_v27, %v77_v19  ;;  %v469_v36 = vpop.f32.mrb[23].mxu1  ;;  %v636_v14 = vsel %vm17_vm0, %v1389_v63, 0.0  ;;  %v80_v26 = vld [vmem:[#allocation2 + $0xf0] sm:$0xff]  ;;  %v739_v27 = vsel %vm17_vm0, %v701_v8, 0.0 }
 0x12a   :  { %v1442_v39 = vld [vmem:[#allocation2 + $0x48] sm:$0xff]  ;;  %v738_v29 = vadd.f32 %v737_v9, %v736_v1  ;;  %v637_v17 = vadd.f32 %v636_v14, %v635_v55 }
 0x12b   :  { %v1444_v40 = vld [vmem:[#allocation2 + $0xc8] sm:$0xff]  ;;  %600 = vst.msk [vmem:[%s1661_s2 + $0x48] sm:$0xff] %vm17_vm0, %v1442_v39  ;;  %535 = vst.msk [vmem:[#allocation2 + $0x58] sm:$0xff] %vm17_vm0, %v502_v30  ;;  %v703_v63 = vmul.f32 %v1442_v39, %v1442_v39  ;;  %v640_v36 = vsel %vm17_vm0, %v1442_v39, 0.0 }
 0x12c   :  { %616 = vst.msk [vmem:[%s1661_s2 + $0xc8] sm:$0xff] %vm17_vm0, %v1444_v40  ;;  %551 = vst.msk [vmem:[#allocation2 + $0xd8] sm:$0xff] %vm17_vm0, %v518_v35  ;;  %v392_v48 = vpop.f32.mrb[24].mxu0  ;;  %v472_v49 = vpop.f32.mrb[24].mxu1  ;;  %v741_v35 = vsel %vm17_vm0, %v702_v15, 0.0  ;;  %v740_v45 = vadd.f32 %v739_v27, %v738_v29  ;;  %v639_v31 = vadd.f32 %v638_v28, %v637_v17 }
 0x12d   :  { %v503_v54 = vadd.f32 %v392_v48, %v62_v34  ;;  %v394_v57 = vpop.f32.mrb[25].mxu0  ;;  %v519_v59 = vadd.f32 %v472_v49, %v78_v43  ;;  %v474_v60 = vpop.f32.mrb[25].mxu1  ;;  %v65_v43 = vld [vmem:[#allocation2 + $0x78] sm:$0xff]  ;;  %v743_v49 = vsel %vm17_vm0, %v703_v63, 0.0 }
 0x12e   :  { %v569_v3 = vld [vmem:[#allocation2 + $0x50] sm:$0xff]  ;;  %v81_v48 = vld [vmem:[#allocation2 + $0xf8] sm:$0xff]  ;;  %v742_v39 = vadd.f32 %v741_v35, %v740_v45 }
 0x12f   :  { %v1468_v4 = vld [vmem:[#allocation2 + $0xd0] sm:$0xff]  ;;  %601 = vst.msk [vmem:[%s1661_s2 + $0x50] sm:$0xff] %vm17_vm0, %v569_v3  ;;  %536 = vst.msk [vmem:[#allocation2 + $0x60] sm:$0xff] %vm17_vm0, %v503_v54  ;;  %v704_v30 = vmul.f32 %v569_v3, %v569_v3  ;;  %v642_v50 = vsel %vm17_vm0, %v569_v3, 0.0  ;;  %v641_v54 = vadd.f32 %v640_v36, %v639_v31 }
 0x130   :  { %617 = vst.msk [vmem:[%s1661_s2 + $0xd0] sm:$0xff] %vm17_vm0, %v1468_v4  ;;  %552 = vst.msk [vmem:[#allocation2 + $0xe0] sm:$0xff] %vm17_vm0, %v519_v59  ;;  %v397_v10 = vpop.f32.mrb[26].mxu0  ;;  %v477_v13 = vpop.f32.mrb[26].mxu1  ;;  %v744_v7 = vadd.f32 %v743_v49, %v742_v39  ;;  %v712_v49 = vmul.f32 %v1311_v12, %v1311_v12 }
 0x131   :  { %v504_v16 = vadd.f32 %v397_v10, %v63_v58  ;;  %v399_v19 = vpop.f32.mrb[27].mxu0  ;;  %v520_v23 = vadd.f32 %v477_v13, %v79_v5  ;;  %v479_v24 = vpop.f32.mrb[27].mxu1  ;;  %v745_v57 = vsel %vm17_vm0, %v704_v30, 0.0  ;;  %v643_v8 = vadd.f32 %v642_v50, %v641_v54 }
 0x132   :  { %v570_v11 = vld [vmem:[#allocation2 + $0x58] sm:$0xff]  ;;  %v746_v14 = vadd.f32 %v745_v57, %v744_v7  ;;  %v713_v54 = vmul.f32 %v1327_v22, %v1327_v22 }
 0x133   :  { %v1491_v25 = vld [vmem:[#allocation2 + $0xd8] sm:$0xff]  ;;  %602 = vst.msk [vmem:[%s1661_s2 + $0x58] sm:$0xff] %vm17_vm0, %v570_v11  ;;  %537 = vst.msk [vmem:[#allocation2 + $0x68] sm:$0xff] %vm17_vm0, %v504_v16  ;;  %v705_v53 = vmul.f32 %v570_v11, %v570_v11  ;;  %v644_v60 = vsel %vm17_vm0, %v570_v11, 0.0 }
 0x134   :  { %618 = vst.msk [vmem:[%s1661_s2 + $0xd8] sm:$0xff] %vm17_vm0, %v1491_v25  ;;  %553 = vst.msk [vmem:[#allocation2 + $0xe8] sm:$0xff] %vm17_vm0, %v520_v23  ;;  %v402_v33 = vpop.f32.mrb[28].mxu0  ;;  %v482_v34 = vpop.f32.mrb[28].mxu1  ;;  %v645_v15 = vadd.f32 %v644_v60, %v643_v8  ;;  %v714_v60 = vmul.f32 %v1343_v32, %v1343_v32 }
 0x135   :  { %v505_v37 = vadd.f32 %v402_v33, %v64_v20  ;;  %v404_v38 = vpop.f32.mrb[29].mxu0  ;;  %v521_v44 = vadd.f32 %v482_v34, %v80_v26  ;;  %v484_v21 = vpop.f32.mrb[29].mxu1  ;;  %v747_v9 = vsel %vm17_vm0, %v705_v53, 0.0  ;;  %v710_v34 = vmul.f32 %v1279_v56, %v1279_v56 }
 0x136   :  { %v571_v46 = vld [vmem:[#allocation2 + $0x60] sm:$0xff]  ;;  %v748_v20 = vadd.f32 %v747_v9, %v746_v14  ;;  %v765_v8 = vsel %vm17_vm0, %v714_v60, 0.0  ;;  %v717_v14 = vmul.f32 %v1391_v0, %v1391_v0 }
 0x137   :  { %v1512_v47 = vld [vmem:[#allocation2 + $0xe0] sm:$0xff]  ;;  %603 = vst.msk [vmem:[%s1661_s2 + $0x60] sm:$0xff] %vm17_vm0, %v571_v46  ;;  %538 = vst.msk [vmem:[#allocation2 + $0x70] sm:$0xff] %vm17_vm0, %v505_v37  ;;  %v706_v61 = vmul.f32 %v571_v46, %v571_v46  ;;  %v646_v10 = vsel %vm17_vm0, %v571_v46, 0.0  ;;  %v757_v46 = vsel %vm17_vm0, %v710_v34, 0.0  ;;  %v721_v34 = vmul.f32 %v1491_v25, %v1491_v25 }
 0x138   :  { %619 = vst.msk [vmem:[%s1661_s2 + $0xe0] sm:$0xff] %vm17_vm0, %v1512_v47  ;;  %554 = vst.msk [vmem:[#allocation2 + $0xf0] sm:$0xff] %vm17_vm0, %v521_v44  ;;  %v407_v58 = vpop.f32.mrb[30].mxu0  ;;  %v487_v59 = vpop.f32.mrb[30].mxu1  ;;  %v647_v23 = vadd.f32 %v646_v10, %v645_v15  ;;  %v711_v44 = vmul.f32 %v1295_v2, %v1295_v2 }
 0x139   :  { %v506_v62 = vadd.f32 %v407_v58, %v65_v43  ;;  %v409_v3 = vpop.f32.mrb[31].mxu0  ;;  %v522_v5 = vadd.f32 %v487_v59, %v81_v48  ;;  %v489_v6 = vpop.f32.mrb[31].mxu1  ;;  %v749_v16 = vsel %vm17_vm0, %v706_v61, 0.0  ;;  %v654_v43 = vsel %vm17_vm0, %v1279_v56, 0.0 }
 0x13a   :  { %v572_v41 = vld [vmem:[#allocation2 + $0x68] sm:$0xff]  ;;  %v750_v27 = vadd.f32 %v749_v16, %v748_v20  ;;  %v656_v48 = vsel %vm17_vm0, %v1295_v2, 0.0  ;;  %v759_v39 = vsel %vm17_vm0, %v711_v44, 0.0  ;;  %v658_v56 = vsel %vm17_vm0, %v1311_v12, 0.0 }
 0x13b   :  { %v1529_v51 = vld [vmem:[#allocation2 + $0xe8] sm:$0xff]  ;;  %604 = vst.msk [vmem:[%s1661_s2 + $0x68] sm:$0xff] %vm17_vm0, %v572_v41  ;;  %v707_v13 = vmul.f32 %v572_v41, %v572_v41  ;;  %539 = vst.msk [vmem:[#allocation2 + $0x78] sm:$0xff] %vm17_vm0, %v506_v62  ;;  %v648_v19 = vsel %vm17_vm0, %v572_v41, 0.0  ;;  %v761_v59 = vsel %vm17_vm0, %v712_v49, 0.0  ;;  %v660_v2 = vsel %vm17_vm0, %v1327_v22, 0.0 }
 0x13c   :  { %620 = vst.msk [vmem:[%s1661_s2 + $0xe8] sm:$0xff] %vm17_vm0, %v1529_v51  ;;  %555 = vst.msk [vmem:[#allocation2 + $0xf8] sm:$0xff] %vm17_vm0, %v522_v5  ;;  %v649_v28 = vadd.f32 %v648_v19, %v647_v23  ;;  %v763_v3 = vsel %vm17_vm0, %v713_v54, 0.0  ;;  %v662_v12 = vsel %vm17_vm0, %v1343_v32, 0.0  ;;  %v715_v5 = vmul.f32 %v1359_v42, %v1359_v42 }
 0x13d   :  { %v751_v55 = vsel %vm17_vm0, %v707_v13, 0.0  ;;  %v664_v22 = vsel %vm17_vm0, %v1359_v42, 0.0  ;;  %v716_v41 = vmul.f32 %v1375_v52, %v1375_v52  ;;  %v666_v32 = vsel %vm17_vm0, %v1375_v52, 0.0 }
 0x13e   :  { %v573_v24 = vld [vmem:[#allocation2 + $0x70] sm:$0xff]  ;;  %v752_v29 = vadd.f32 %v751_v55, %v750_v27  ;;  %v767_v13 = vsel %vm17_vm0, %v715_v5, 0.0  ;;  %v668_v42 = vsel %vm17_vm0, %v1391_v0, 0.0  ;;  %v718_v20 = vmul.f32 %v1415_v18, %v1415_v18 }
 0x13f   :  { %v1546_v1 = vld [vmem:[#allocation2 + $0xf0] sm:$0xff]  ;;  %605 = vst.msk [vmem:[%s1661_s2 + $0x70] sm:$0xff] %vm17_vm0, %v573_v24  ;;  %v650_v11 = vsel %vm17_vm0, %v573_v24, 0.0  ;;  %v708_v26 = vmul.f32 %v573_v24, %v573_v24  ;;  %v769_v19 = vsel %vm17_vm0, %v716_v41, 0.0  ;;  %v771_v55 = vsel %vm17_vm0, %v717_v14, 0.0 }
 0x140   :  { %621 = vst.msk [vmem:[%s1661_s2 + $0xf0] sm:$0xff] %vm17_vm0, %v1546_v1  ;;  %v651_v17 = vadd.f32 %v650_v11, %v649_v28  ;;  %v670_v52 = vsel %vm17_vm0, %v1415_v18, 0.0  ;;  %v719_v11 = vmul.f32 %v1444_v40, %v1444_v40  ;;  %v773_v28 = vsel %vm17_vm0, %v718_v20, 0.0 }
 0x141   :  { %v753_v63 = vsel %vm17_vm0, %v708_v26, 0.0  ;;  %v672_v0 = vsel %vm17_vm0, %v1444_v40, 0.0  ;;  %v674_v18 = vsel %vm17_vm0, %v1468_v4, 0.0  ;;  %v676_v40 = vsel %vm17_vm0, %v1491_v25, 0.0 }
 0x142   :  { %v574_v30 = vld [vmem:[#allocation2 + $0x78] sm:$0xff]  ;;  %v754_v37 = vadd.f32 %v753_v63, %v752_v29  ;;  %v720_v63 = vmul.f32 %v1468_v4, %v1468_v4  ;;  %v678_v4 = vsel %vm17_vm0, %v1512_v47, 0.0  ;;  %v680_v25 = vsel %vm17_vm0, %v1529_v51, 0.0 }
 0x143   :  { %v1560_v33 = vld [vmem:[#allocation2 + $0xf8] sm:$0xff]  ;;  %606 = vst.msk [vmem:[%s1661_s2 + $0x78] sm:$0xff] %vm17_vm0, %v574_v30  ;;  %v652_v35 = vsel %vm17_vm0, %v574_v30, 0.0  ;;  %v709_v36 = vmul.f32 %v574_v30, %v574_v30  ;;  %v775_v30 = vsel %vm17_vm0, %v719_v11, 0.0  ;;  %v724_v49 = vmul.f32 %v1546_v1, %v1546_v1 }
 0x144   :  { %622 = vst.msk [vmem:[%s1661_s2 + $0xf8] sm:$0xff] %vm17_vm0, %v1560_v33  ;;  %v653_v38 = vadd.f32 %v652_v35, %v651_v17  ;;  %v684_v54 = vsel %vm17_vm0, %v1560_v33, 0.0 }
 0x145   :  { %v755_v21 = vsel %vm17_vm0, %v709_v36, 0.0 }
 0x146   :  { %v655_v45 = vadd.f32 %v654_v43, %v653_v38  ;;  %v756_v31 = vadd.f32 %v755_v21, %v754_v37  ;;  %v777_v37 = vsel %vm17_vm0, %v720_v63, 0.0  ;;  %v722_v38 = vmul.f32 %v1512_v47, %v1512_v47 }
 0x147   :  { %v779_v21 = vsel %vm17_vm0, %v721_v34, 0.0 }
 0x148   :  { %v657_v50 = vadd.f32 %v656_v48, %v655_v45  ;;  %v758_v53 = vadd.f32 %v757_v46, %v756_v31  ;;  %v723_v45 = vmul.f32 %v1529_v51, %v1529_v51  ;;  %v781_v48 = vsel %vm17_vm0, %v722_v38, 0.0 }
 0x149   :  { %v785_v51 = vsel %vm17_vm0, %v724_v49, 0.0 }
 0x14a   :  { %v659_v57 = vadd.f32 %v658_v56, %v657_v50  ;;  %v760_v58 = vadd.f32 %v759_v39, %v758_v53  ;;  %v725_v50 = vmul.f32 %v1560_v33, %v1560_v33  ;;  %v783_v47 = vsel %vm17_vm0, %v723_v45, 0.0 }
 0x14b   :  { %v682_v56 = vsel %vm17_vm0, %v1546_v1, 0.0 }
 0x14c   :  { %v661_v61 = vadd.f32 %v660_v2, %v659_v57  ;;  %v762_v62 = vadd.f32 %v761_v59, %v760_v58  ;;  %v787_v59 = vsel %vm17_vm0, %v725_v50, 0.0 }
 0x14e   :  { %v764_v6 = vadd.f32 %v763_v3, %v762_v62  ;;  %v663_v7 = vadd.f32 %v662_v12, %v661_v61 }
 0x150   :  { %v665_v9 = vadd.f32 %v664_v22, %v663_v7  ;;  %v766_v10 = vadd.f32 %v765_v8, %v764_v6 }
 0x152   :  { %v667_v15 = vadd.f32 %v666_v32, %v665_v9  ;;  %v768_v16 = vadd.f32 %v767_v13, %v766_v10 }
 0x154   :  { %v669_v23 = vadd.f32 %v668_v42, %v667_v15  ;;  %v770_v24 = vadd.f32 %v769_v19, %v768_v16 }
 0x156   :  { %v671_v26 = vadd.f32 %v670_v52, %v669_v23  ;;  %v772_v27 = vadd.f32 %v771_v55, %v770_v24 }
 0x158   :  { %v774_v29 = vadd.f32 %v773_v28, %v772_v27  ;;  %v673_v17 = vadd.f32 %v672_v0, %v671_v26 }
 0x15a   :  { %v776_v35 = vadd.f32 %v775_v30, %v774_v29  ;;  %v675_v36 = vadd.f32 %v674_v18, %v673_v17 }
 0x15c   :  { %v778_v43 = vadd.f32 %v777_v37, %v776_v35  ;;  %v677_v44 = vadd.f32 %v676_v40, %v675_v36 }
 0x15e   :  { %v780_v31 = vadd.f32 %v779_v21, %v778_v43  ;;  %v679_v46 = vadd.f32 %v678_v4, %v677_v44 }
 0x160   :  { %v782_v53 = vadd.f32 %v781_v48, %v780_v31  ;;  %v681_v39 = vadd.f32 %v680_v25, %v679_v46 }
 0x162   :  { %v784_v57 = vadd.f32 %v783_v47, %v782_v53  ;;  %v683_v58 = vadd.f32 %v682_v56, %v681_v39 }
 0x164   :  { %v786_v2 = vadd.f32 %v785_v51, %v784_v57  ;;  %v685_v60 = vadd.f32 %v684_v54, %v683_v58 }
 0x166   :  { %v686_v61 = vrot.slane %v685_v60, 4  ;;  %v788_v62 = vadd.f32 %v787_v59, %v786_v2 }
 0x168   :  { %v687_v3 = vadd.f32 %v686_v61, %v685_v60  ;;  %v789_v12 = vrot.slane %v788_v62, 4 }
 0x16a   :  { %v688_v5 = vrot.slane %v687_v3, 2  ;;  %v790_v6 = vadd.f32 %v789_v12, %v788_v62 }
 0x16c   :  { %v689_v7 = vadd.f32 %v688_v5, %v687_v3  ;;  %v791_v8 = vrot.slane %v790_v6, 2 }
 0x16e   :  { %v690_v1 = vrot.slane %v689_v7, 1  ;;  %v792_v22 = vadd.f32 %v791_v8, %v790_v6 }
 0x170   :  { %v691_v33 = vadd.f32 %v690_v1, %v689_v7  ;;  %v793_v41 = vrot.slane %v792_v22, 1 }
 0x172   :  { %693 = vst.msk [vmem:[%s1662_s3] sm:$0x1] %vm692_vm3, %v691_v33  ;;  %v794_v9 = vadd.f32 %v793_v41, %v792_v22 }
 0x174   :  { %795 = vst.msk [vmem:[%s1662_s3 + $0x1] sm:$0x1] %vm692_vm3, %v794_v9 }

// kernel: tanet_forward.30
= control target key start
LH: loop header
LB: loop body
LE: loop exit
PB: predicated region body
PF: predicated region fallthrough
CT: control target
= control target key end

     0   :  { %s316_s6 = smov 0   ;;  %s379_s0 = inlined_call_operand.vmem [shape: f32[4,4,5,5,64], index: 0, kind: input, shape index: {}]   ;;  %s380_s1 = inlined_call_operand.vmem [shape: f32[4,4,4,64], index: 1, kind: output, shape index: {}]  }
   0x1 LB: > { %s250_s7 = sadd.s32 4294967295, %s304_s6   ;;  %p254_p0 = scmp.ge.s32.totalorder %s304_s6, 1  ;;  %s304_s6 = sphi %s316_s6, %s11_s6  }
   0x2   : > { %p87_p1 = scmp.lt.s32.totalorder %s304_s6, 5 }
   0x4   : > { %p88_p2 = pnand %p254_p0, %p87_p1 }
   0x5   : > { %p107_p3 = scmp.lt.s32.totalorder (!%p88_p2), %s250_s7, 3  ;;  %vm190_vm0 = vcmask (!%p88_p2), 519168  }
   0x6   : > { %91 = sbr.rel (%p88_p2) target bundleno = 41 (0x29), region = 24 }
   0xd   : > { %s382_s7 = smov (!%p107_p3, %s250_s7), 3 }
   0xe   : > { %s289_s8 = smul.u32 160, %s382_s7  ;;  %s288_s12 = sshll.u32 %s382_s7, 4 }
   0xf   : > { %s116_s15 = scalar_lea.vmem %s380_s1, %s288_s12 }
  0x10   : > { %s330_s11 = scalar_lea.vmem %s379_s0, %s289_s8 }
  0x11   : > { %v117_v0 = vld [vmem:[%s330_s11] sm:$0xf]  ;;  %v258_v1 = vld [vmem:[%s330_s11 + $0x28] sm:$0xf]  ;;  %v262_v4 = vld [vmem:[%s330_s11 + $0x50] sm:$0xf] }
  0x12   : > { %v130_v2 = vld [vmem:[%s330_s11 + $0x1] sm:$0xf]  ;;  %v126_v3 = vmax.f32 %v117_v0, %v258_v1  ;;  %v118_v6 = vld [vmem:[%s330_s11 + $0x8] sm:$0xf]  ;;  %v259_v7 = vld [vmem:[%s330_s11 + $0x30] sm:$0xf] }
  0x13   : > { %v131_v8 = vld [vmem:[%s330_s11 + $0x9] sm:$0xf]  ;;  %v266_v9 = vld [vmem:[%s330_s11 + $0x78] sm:$0xf]  ;;  %v127_v10 = vmax.f32 %v118_v6, %v259_v7  ;;  %v270_v12 = vld [vmem:[%s330_s11 + $0x51] sm:$0xf] }
  0x14   : > { %v134_v5 = vmax.f32 %v126_v3, %v130_v2  ;;  %v263_v13 = vld [vmem:[%s330_s11 + $0x58] sm:$0xf]  ;;  %v119_v15 = vld [vmem:[%s330_s11 + $0x10] sm:$0xf]  ;;  %v267_v19 = vld [vmem:[%s330_s11 + $0x80] sm:$0xf] }
  0x15   : > { %v135_v14 = vmax.f32 %v127_v10, %v131_v8  ;;  %v260_v16 = vld [vmem:[%s330_s11 + $0x38] sm:$0xf]  ;;  %v132_v17 = vld [vmem:[%s330_s11 + $0x11] sm:$0xf]  ;;  %v274_v21 = vld [vmem:[%s330_s11 + $0x8] sm:$0xf] }
  0x16   : > { %v143_v11 = vmax.f32 %v134_v5, %v262_v4  ;;  %v128_v20 = vmax.f32 %v119_v15, %v260_v16  ;;  %v271_v23 = vld [vmem:[%s330_s11 + $0x59] sm:$0xf]  ;;  %v264_v24 = vld [vmem:[%s330_s11 + $0x60] sm:$0xf]  ;;  %v278_v30 = vld [vmem:[%s330_s11 + $0x30] sm:$0xf] }
  0x17   : > { %v144_v22 = vmax.f32 %v135_v14, %v263_v13  ;;  %v120_v27 = vld [vmem:[%s330_s11 + $0x18] sm:$0xf]  ;;  %v261_v28 = vld [vmem:[%s330_s11 + $0x40] sm:$0xf]  ;;  %v268_v32 = vld [vmem:[%s330_s11 + $0x88] sm:$0xf] }
  0x18   : > { %v152_v18 = vmax.f32 %v143_v11, %v266_v9  ;;  %v136_v26 = vmax.f32 %v128_v20, %v132_v17  ;;  %v133_v29 = vld [vmem:[%s330_s11 + $0x19] sm:$0xf]  ;;  %v129_v33 = vmax.f32 %v120_v27, %v261_v28  ;;  %v275_v35 = vld [vmem:[%s330_s11 + $0x10] sm:$0xf]  ;;  %v265_v37 = vld [vmem:[%s330_s11 + $0x68] sm:$0xf] }
  0x19   : > { %v153_v31 = vmax.f32 %v144_v22, %v267_v19  ;;  %v282_v38 = vld [vmem:[%s330_s11 + $0x9] sm:$0xf]  ;;  %v272_v40 = vld [vmem:[%s330_s11 + $0x61] sm:$0xf]  ;;  %v279_v43 = vld [vmem:[%s330_s11 + $0x38] sm:$0xf] }
  0x1a   : > { %v160_v25 = vmax.f32 %v152_v18, %v270_v12  ;;  %v145_v36 = vmax.f32 %v136_v26, %v264_v24  ;;  %v137_v41 = vmax.f32 %v129_v33, %v133_v29  ;;  %v269_v45 = vld [vmem:[%s330_s11 + $0x90] sm:$0xf]  ;;  %v276_v47 = vld [vmem:[%s330_s11 + $0x18] sm:$0xf]  ;;  %v273_v52 = vld [vmem:[%s330_s11 + $0x69] sm:$0xf] }
  0x1b   : > { %v161_v39 = vmax.f32 %v153_v31, %v271_v23  ;;  %v283_v50 = vld [vmem:[%s330_s11 + $0x11] sm:$0xf]  ;;  %v280_v54 = vld [vmem:[%s330_s11 + $0x40] sm:$0xf]  ;;  %v284_v59 = vld [vmem:[%s330_s11 + $0x19] sm:$0xf] }
  0x1c   : > { %v169_v34 = vmax.f32 %v160_v25, %v274_v21  ;;  %v154_v44 = vmax.f32 %v145_v36, %v268_v32  ;;  %v146_v48 = vmax.f32 %v137_v41, %v265_v37  ;;  %v277_v57 = vld [vmem:[%s330_s11 + $0x20] sm:$0xf]  ;;  %v281_v62 = vld [vmem:[%s330_s11 + $0x48] sm:$0xf] }
  0x1d   : > { %v170_v46 = vmax.f32 %v161_v39, %v275_v35  ;;  %v285_v1 = vld [vmem:[%s330_s11 + $0x21] sm:$0xf] }
  0x1e   : > { %v178_v42 = vmax.f32 %v169_v34, %v278_v30  ;;  %v162_v51 = vmax.f32 %v154_v44, %v272_v40  ;;  %v155_v55 = vmax.f32 %v146_v48, %v269_v45 }
  0x1f   : > { %v179_v53 = vmax.f32 %v170_v46, %v279_v43 }
  0x20   : > { %v186_v49 = vmax.f32 %v178_v42, %v282_v38  ;;  %v171_v56 = vmax.f32 %v162_v51, %v276_v47  ;;  %v163_v60 = vmax.f32 %v155_v55, %v273_v52 }
  0x21   : > { %v187_v58 = vmax.f32 %v179_v53, %v283_v50 }
  0x22   : > { %191 = vst.msk [vmem:[%s116_s15] sm:$0xf] %vm190_vm0, %v186_v49  ;;  %v180_v61 = vmax.f32 %v171_v56, %v280_v54  ;;  %v172_v63 = vmax.f32 %v163_v60, %v277_v57 }
  0x23   : > { %192 = vst.msk [vmem:[%s116_s15 + $0x4] sm:$0xf] %vm190_vm0, %v187_v58 }
  0x24   : > { %v188_v0 = vmax.f32 %v180_v61, %v284_v59  ;;  %v181_v2 = vmax.f32 %v172_v63, %v281_v62 }
  0x26   : > { %193 = vst.msk [vmem:[%s116_s15 + $0x8] sm:$0xf] %vm190_vm0, %v188_v0  ;;  %v189_v3 = vmax.f32 %v181_v2, %v285_v1 }
  0x28   : > { %194 = vst.msk [vmem:[%s116_s15 + $0xc] sm:$0xf] %vm190_vm0, %v189_v3 }
  0x29 PF: > { %s11_s6 = sadd.s32 1, %s304_s6  }
  0x2a   : > { %p8_p4 = scmp.ge.s32.totalorder %s11_s6, 6  }
  0x2c   :  { %10 = sbr.rel (!%p8_p4) target bundleno = 1 (0x1), region = 59 }

// kernel: tanet_forward.38
= control target key start
LH: loop header
LB: loop body
LE: loop exit
PB: predicated region body
PF: predicated region fallthrough
CT: control target
= control target key end

     0   :  { %v432_v3 = vmov 0.0   ;;  %vm73_vm0 = vcmask 523264   ;;  %s588_s1 = inlined_call_operand.vmem [shape: f32[64,256], index: 1, kind: input, shape index: {}]   ;;  %s589_s0 = inlined_call_operand.vmem [shape: f32[64,64], index: 0, kind: input, shape index: {}]   ;;  %s590_s2 = inlined_call_operand.vmem [shape: f32[64,256], index: 2, kind: output, shape index: {0}]   ;;  %s591_s3 = inlined_call_operand.vmem [shape: f32[1,2,256], index: 3, kind: output, shape index: {1}]  }
   0x1   :  { %v58_v0 = vld [vmem:[%s588_s1 + $0x8] sm:$0xff]  ;;  %v60_v1 = vld [vmem:[%s588_s1 + $0x18] sm:$0xff]  ;;  %v57_v2 = vld [vmem:[%s588_s1] sm:$0xff]  ;;  %162 = vmatprep.mubr.f32.mxu0 %v432_v3  ;;  %186 = vmatprep.mubr.f32.mxu1 %v432_v3 }
   0x2   :  { %v406_v4 = vpack.c.bf16 %v60_v1, %v58_v0  ;;  %v59_v5 = vld [vmem:[%s588_s1 + $0x10] sm:$0xff]  ;;  %v62_v6 = vld [vmem:[%s588_s1 + $0x28] sm:$0xff]  ;;  %v64_v7 = vld [vmem:[%s588_s1 + $0x38] sm:$0xff] }
   0x3   :  { %v408_v8 = vpack.c.bf16 %v59_v5, %v57_v2  ;;  %v410_v9 = vpack.c.bf16 %v64_v7, %v62_v6  ;;  %v61_v10 = vld [vmem:[%s588_s1 + $0x20] sm:$0xff]  ;;  %v63_v11 = vld [vmem:[%s588_s1 + $0x30] sm:$0xff]  ;;  %v66_v12 = vld [vmem:[%s588_s1 + $0x48] sm:$0xff] }
   0x4   :  { %407 = vmatprep.subr.bf16.mxu0 %v406_v4  ;;  %422 = vmatprep.subr.bf16.mxu1 %v406_v4  ;;  %v68_v13 = vld [vmem:[%s588_s1 + $0x58] sm:$0xff]  ;;  %v412_v14 = vpack.c.bf16 %v63_v11, %v61_v10  ;;  %v65_v16 = vld [vmem:[%s588_s1 + $0x40] sm:$0xff]  ;;  %v67_v17 = vld [vmem:[%s588_s1 + $0x50] sm:$0xff] }
   0x5   :  { %409 = vmatpush1.bf16.msra.mxu0 %v408_v8  ;;  %426 = vmatpush1.bf16.msra.mxu1 %v408_v8  ;;  %v414_v15 = vpack.c.bf16 %v68_v13, %v66_v12  ;;  %v70_v18 = vld [vmem:[%s588_s1 + $0x68] sm:$0xff]  ;;  %v72_v19 = vld [vmem:[%s588_s1 + $0x78] sm:$0xff]  ;;  %v416_v20 = vpack.c.bf16 %v67_v17, %v65_v16  ;;  %v69_v22 = vld [vmem:[%s588_s1 + $0x60] sm:$0xff] }
   0x6   :  { %411 = vmatprep.subr.bf16.mxu0 %v410_v9  ;;  %423 = vmatprep.subr.bf16.mxu1 %v410_v9  ;;  %v418_v21 = vpack.c.bf16 %v72_v19, %v70_v18  ;;  %v71_v23 = vld [vmem:[%s588_s1 + $0x70] sm:$0xff]  ;;  %v49_v25 = vld [vmem:[%s589_s0] sm:$0xff]  ;;  %v50_v27 = vld [vmem:[%s589_s0 + $0x8] sm:$0xff] }
   0x7   :  { %v420_v24 = vpack.c.bf16 %v71_v23, %v69_v22  ;;  %v53_v26 = vld [vmem:[%s589_s0 + $0x20] sm:$0xff]  ;;  %v54_v28 = vld [vmem:[%s589_s0 + $0x28] sm:$0xff]  ;;  %v51_v29 = vld [vmem:[%s589_s0 + $0x10] sm:$0xff] }
   0x8   :  { %v55_v30 = vld [vmem:[%s589_s0 + $0x30] sm:$0xff]  ;;  %v52_v31 = vld [vmem:[%s589_s0 + $0x18] sm:$0xff] }
   0x9   :  { %413 = vmatpush1.bf16.msra.mxu0 %v412_v14  ;;  %427 = vmatpush1.bf16.msra.mxu1 %v412_v14  ;;  %v56_v32 = vld [vmem:[%s589_s0 + $0x38] sm:$0xff] }
   0xa   :  { %415 = vmatprep.subr.bf16.mxu0 %v414_v15  ;;  %424 = vmatprep.subr.bf16.mxu1 %v414_v15 }
   0xd   :  { %417 = vmatpush1.bf16.msra.mxu0 %v416_v20  ;;  %428 = vmatpush1.bf16.msra.mxu1 %v416_v20 }
   0xe   :  { %419 = vmatprep.subr.bf16.mxu0 %v418_v21  ;;  %425 = vmatprep.subr.bf16.mxu1 %v418_v21 }
  0x11   :  { %421 = vmatpush1.bf16.msra.mxu0 %v420_v24  ;;  %429 = vmatpush1.bf16.msra.mxu1 %v420_v24 }
  0x14   :  { %397 = vmatmul.mubr.msk.f32.vlgmr.msra.gmra.mrb[0].mxu0 %vm73_vm0, %v49_v25  ;;  %401 = vmatmul.mubr.msk.f32.vlgmr.msra.gmra.mrb[0].mxu1 %vm73_vm0, %v53_v26 }
  0x15   :  { %168 = vmatprep.mubr.f32.mxu0 %v432_v3  ;;  %192 = vmatprep.mubr.f32.mxu1 %v432_v3 }
  0x18   :  { %398 = vmatmul.mubr.msk.f32.gmra.mrb[2].mxu0 %vm73_vm0, %v50_v27  ;;  %402 = vmatmul.mubr.msk.f32.gmra.mrb[2].mxu1 %vm73_vm0, %v54_v28 }
  0x19   :  { %174 = vmatprep.mubr.f32.mxu0 %v432_v3  ;;  %198 = vmatprep.mubr.f32.mxu1 %v432_v3 }
  0x1c   :  { %399 = vmatmul.mubr.msk.f32.gmra.mrb[4].mxu0 %vm73_vm0, %v51_v29  ;;  %403 = vmatmul.mubr.msk.f32.gmra.mrb[4].mxu1 %vm73_vm0, %v55_v30 }
  0x1d   :  { %180 = vmatprep.mubr.f32.mxu0 %v432_v3  ;;  %204 = vmatprep.mubr.f32.mxu1 %v432_v3 }
  0x20   :  { %400 = vmatmul.mubr.msk.f32.gmra.mrb[6].mxu0 %vm73_vm0, %v52_v31  ;;  %404 = vmatmul.mubr.msk.f32.gmra.mrb[6].mxu1 %vm73_vm0, %v56_v32 }
  0xe7   :  { %v164_v33 = vpop.f32.mrb[0].mxu0  ;;  %v188_v34 = vpop.f32.mrb[0].mxu1 }
  0xe8   :  { %262 = vst [vmem:[%s590_s2] sm:$0xff] %v164_v33  ;;  %v166_v35 = vpop.f32.mrb[1].mxu0  ;;  %270 = vst [vmem:[%s590_s2 + $0x40] sm:$0xff] %v188_v34  ;;  %v190_v36 = vpop.f32.mrb[1].mxu1  ;;  %v327_v39 = vmul.f32 %v164_v33, %v164_v33  ;;  %v335_v3 = vmul.f32 %v188_v34, %v188_v34 }
  0xe9   :  { %263 = vst [vmem:[%s590_s2 + $0x8] sm:$0xff] %v166_v35  ;;  %271 = vst [vmem:[%s590_s2 + $0x48] sm:$0xff] %v190_v36  ;;  %v328_v44 = vmul.f32 %v166_v35, %v166_v35  ;;  %v336_v6 = vmul.f32 %v190_v36, %v190_v36 }
  0xeb   :  { %v170_v37 = vpop.f32.mrb[2].mxu0  ;;  %v194_v38 = vpop.f32.mrb[2].mxu1 }
  0xec   :  { %264 = vst [vmem:[%s590_s2 + $0x10] sm:$0xff] %v170_v37  ;;  %v278_v40 = vadd.f32 %v170_v37, %v164_v33  ;;  %v329_v41 = vmul.f32 %v170_v37, %v170_v37  ;;  %v172_v42 = vpop.f32.mrb[3].mxu0  ;;  %272 = vst [vmem:[%s590_s2 + $0x50] sm:$0xff] %v194_v38  ;;  %v196_v43 = vpop.f32.mrb[3].mxu1  ;;  %v337_v9 = vmul.f32 %v194_v38, %v194_v38 }
  0xed   :  { %265 = vst [vmem:[%s590_s2 + $0x18] sm:$0xff] %v172_v42  ;;  %v291_v45 = vadd.f32 %v172_v42, %v166_v35  ;;  %v330_v46 = vmul.f32 %v172_v42, %v172_v42  ;;  %273 = vst [vmem:[%s590_s2 + $0x58] sm:$0xff] %v196_v43  ;;  %v338_v12 = vmul.f32 %v196_v43, %v196_v43 }
  0xee   :  { %v343_v47 = vadd.f32 %v329_v41, %v327_v39 }
  0xef   :  { %v356_v48 = vadd.f32 %v330_v46, %v328_v44  ;;  %v176_v49 = vpop.f32.mrb[4].mxu0  ;;  %v200_v50 = vpop.f32.mrb[4].mxu1 }
  0xf0   :  { %266 = vst [vmem:[%s590_s2 + $0x20] sm:$0xff] %v176_v49  ;;  %v279_v51 = vadd.f32 %v278_v40, %v176_v49  ;;  %v331_v52 = vmul.f32 %v176_v49, %v176_v49  ;;  %v178_v53 = vpop.f32.mrb[5].mxu0  ;;  %274 = vst [vmem:[%s590_s2 + $0x60] sm:$0xff] %v200_v50  ;;  %v202_v54 = vpop.f32.mrb[5].mxu1  ;;  %v339_v16 = vmul.f32 %v200_v50, %v200_v50 }
  0xf1   :  { %267 = vst [vmem:[%s590_s2 + $0x28] sm:$0xff] %v178_v53  ;;  %v292_v55 = vadd.f32 %v291_v45, %v178_v53  ;;  %v332_v56 = vmul.f32 %v178_v53, %v178_v53  ;;  %275 = vst [vmem:[%s590_s2 + $0x68] sm:$0xff] %v202_v54  ;;  %v340_v20 = vmul.f32 %v202_v54, %v202_v54 }
  0xf2   :  { %v344_v57 = vadd.f32 %v343_v47, %v331_v52 }
  0xf3   :  { %v357_v58 = vadd.f32 %v356_v48, %v332_v56  ;;  %v182_v59 = vpop.f32.mrb[6].mxu0  ;;  %v206_v60 = vpop.f32.mrb[6].mxu1 }
  0xf4   :  { %268 = vst [vmem:[%s590_s2 + $0x30] sm:$0xff] %v182_v59  ;;  %v280_v61 = vadd.f32 %v279_v51, %v182_v59  ;;  %v333_v62 = vmul.f32 %v182_v59, %v182_v59  ;;  %v184_v63 = vpop.f32.mrb[7].mxu0  ;;  %276 = vst [vmem:[%s590_s2 + $0x70] sm:$0xff] %v206_v60  ;;  %v208_v0 = vpop.f32.mrb[7].mxu1  ;;  %v341_v18 = vmul.f32 %v206_v60, %v206_v60 }
  0xf5   :  { %269 = vst [vmem:[%s590_s2 + $0x38] sm:$0xff] %v184_v63  ;;  %v293_v1 = vadd.f32 %v292_v55, %v184_v63  ;;  %v334_v2 = vmul.f32 %v184_v63, %v184_v63  ;;  %277 = vst [vmem:[%s590_s2 + $0x78] sm:$0xff] %v208_v0  ;;  %v342_v22 = vmul.f32 %v208_v0, %v208_v0 }
  0xf6   :  { %v281_v4 = vadd.f32 %v280_v61, %v188_v34  ;;  %v345_v5 = vadd.f32 %v344_v57, %v333_v62  ;;  %v433_v34 = vmov 1966171168  }
  0xf7   :  { %v294_v7 = vadd.f32 %v293_v1, %v190_v36  ;;  %v358_v8 = vadd.f32 %v357_v58, %v334_v2  ;;  %v308_v35 = vunpack.c.l.s4 %v433_v34  ;;  %v310_v36 = vlaneseq }
  0xf8   :  { %v346_v10 = vadd.f32 %v345_v5, %v335_v3  ;;  %v282_v11 = vadd.f32 %v281_v4, %v194_v38 }
  0xf9   :  { %v359_v13 = vadd.f32 %v358_v8, %v336_v6  ;;  %v295_v14 = vadd.f32 %v294_v7, %v196_v43  ;;  %v309_v45 = vunpack.c.0.s8 %v308_v35  ;;  %v311_v46 = vshrl.u32 %v310_v36, 7 }
  0xfa   :  { %v283_v15 = vadd.f32 %v282_v11, %v200_v50  ;;  %v347_v17 = vadd.f32 %v346_v10, %v337_v9  ;;  %vm324_vm1 = vcmp.lt.s32.totalorder %v310_v36, 256 }
  0xfb   :  { %v296_v19 = vadd.f32 %v295_v14, %v202_v54  ;;  %v360_v21 = vadd.f32 %v359_v13, %v338_v12  ;;  %v312_v55 = vsub.s32 %v309_v45, %v311_v46 }
  0xfc   :  { %v348_v23 = vadd.f32 %v347_v17, %v339_v16  ;;  %v284_v24 = vadd.f32 %v283_v15, %v206_v60 }
  0xfd   :  { %v361_v25 = vadd.f32 %v360_v21, %v340_v20  ;;  %v297_v26 = vadd.f32 %v296_v19, %v208_v0 }
  0xfe   :  { %v285_v27 = vrot.slane %v284_v24, 4  ;;  %v349_v28 = vadd.f32 %v348_v23, %v341_v18 }
  0xff   :  { %v298_v29 = vrot.slane %v297_v26, 4  ;;  %v362_v30 = vadd.f32 %v361_v25, %v342_v22 }
 0x100   :  { %v286_v31 = vadd.f32 %v285_v27, %v284_v24  ;;  %v350_v32 = vrot.slane %v349_v28, 4 }
 0x101   :  { %v299_v33 = vadd.f32 %v298_v29, %v297_v26  ;;  %v363_v37 = vrot.slane %v362_v30, 4 }
 0x102   :  { %v287_v38 = vrot.slane %v286_v31, 2  ;;  %v351_v39 = vadd.f32 %v350_v32, %v349_v28 }
 0x103   :  { %v300_v40 = vrot.slane %v299_v33, 2  ;;  %v364_v41 = vadd.f32 %v363_v37, %v362_v30 }
 0x104   :  { %v288_v42 = vadd.f32 %v287_v38, %v286_v31  ;;  %v352_v43 = vrot.slane %v351_v39, 2 }
 0x105   :  { %v301_v44 = vadd.f32 %v300_v40, %v299_v33  ;;  %v365_v47 = vrot.slane %v364_v41, 2 }
 0x106   :  { %v289_v48 = vrot.slane %v288_v42, 1  ;;  %v353_v49 = vadd.f32 %v352_v43, %v351_v39 }
 0x107   :  { %v302_v50 = vrot.slane %v301_v44, 1  ;;  %v366_v51 = vadd.f32 %v365_v47, %v364_v41 }
 0x108   :  { %v290_v52 = vadd.f32 %v289_v48, %v288_v42  ;;  %v354_v53 = vrot.slane %v353_v49, 1 }
 0x109   :  { %v303_v54 = vadd.f32 %v302_v50, %v301_v44  ;;  %v367_v56 = vrot.slane %v366_v51, 1 }
 0x10a   :  { %v355_v57 = vadd.f32 %v354_v53, %v353_v49 }
 0x10b   :  { %v306_v58 = vcombine.low %v290_v52, %v303_v54  ;;  %v368_v59 = vadd.f32 %v367_v56, %v366_v51 }
 0x10d   :  { %v313_v60 = vrot.slane %v306_v58, %v312_v55  ;;  %v371_v61 = vcombine.low %v355_v57, %v368_v59 }
 0x10f   :  { %v320_v62 = vrot.slane %v313_v60, %v312_v55  ;;  %v378_v63 = vrot.slane %v371_v61, %v312_v55 }
 0x111   :  { %326 = vst.msk [vmem:[%s591_s3] ss:$2 sm:$0x3] %vm324_vm1, %v320_v62  ;;  %v385_v0 = vrot.slane %v378_v63, %v312_v55 }
 0x113   :  { %405 = vst.msk [vmem:[%s591_s3 + $0x1] ss:$2 sm:$0x3] %vm324_vm1, %v385_v0 }

// kernel: tanet_forward.31
= control target key start
LH: loop header
LB: loop body
LE: loop exit
PB: predicated region body
PF: predicated region fallthrough
CT: control target
= control target key end

     0   :  { %vm17_vm0 = vcmask 523264   ;;  %v353_v3 = vmov 0.0   ;;  %vm236_vm1 = vcmask 516096   ;;  %s500_s1 = inlined_call_operand.vmem [shape: f32[64,64], index: 1, kind: input, shape index: {}]   ;;  %s501_s0 = inlined_call_operand.vmem [shape: f32[64,64], index: 0, kind: input, shape index: {}]   ;;  %s502_s2 = inlined_call_operand.vmem [shape: f32[64,64], index: 2, kind: output, shape index: {0}]   ;;  %s503_s3 = inlined_call_operand.vmem [shape: f32[1,2,64], index: 3, kind: output, shape index: {1}]  }
   0x1   :  { %v42_v0 = vld [vmem:[%s500_s1] sm:$0xff]  ;;  %v43_v1 = vld [vmem:[%s500_s1 + $0x8] sm:$0xff]  ;;  %v44_v2 = vld [vmem:[%s500_s1 + $0x10] sm:$0xff]  ;;  %19 = vst.msk [vmem:[#allocation2 + $0x8] sm:$0xff] %vm17_vm0, %v353_v3 }
   0x2   :  { %18 = vst.msk [vmem:[#allocation2] sm:$0xff] %vm17_vm0, %v353_v3  ;;  %20 = vst.msk [vmem:[#allocation2 + $0x10] sm:$0xff] %vm17_vm0, %v353_v3  ;;  %v328_v4 = vpack.c.bf16 %v43_v1, %v42_v0  ;;  %v45_v5 = vld [vmem:[%s500_s1 + $0x18] sm:$0xff]  ;;  %v46_v7 = vld [vmem:[%s500_s1 + $0x20] sm:$0xff] }
   0x3   :  { %21 = vst.msk [vmem:[#allocation2 + $0x18] sm:$0xff] %vm17_vm0, %v353_v3  ;;  %22 = vst.msk [vmem:[#allocation2 + $0x20] sm:$0xff] %vm17_vm0, %v353_v3  ;;  %v332_v6 = vpack.c.bf16 %v45_v5, %v44_v2  ;;  %v47_v8 = vld [vmem:[%s500_s1 + $0x28] sm:$0xff]  ;;  %v34_v9 = vld [vmem:[%s501_s0] sm:$0xff] }
   0x4   :  { %23 = vst.msk [vmem:[#allocation2 + $0x28] sm:$0xff] %vm17_vm0, %v353_v3  ;;  %24 = vst.msk [vmem:[#allocation2 + $0x30] sm:$0xff] %vm17_vm0, %v353_v3  ;;  %329 = vmatprep.subr.bf16.mxu0 %v328_v4  ;;  %344 = vmatprep.subr.bf16.mxu1 %v328_v4  ;;  %v38_v10 = vld [vmem:[%s501_s0 + $0x20] sm:$0xff]  ;;  %v336_v11 = vpack.c.bf16 %v47_v8, %v46_v7  ;;  %v48_v12 = vld [vmem:[%s500_s1 + $0x30] sm:$0xff] }
   0x5   :  { %25 = vst.msk [vmem:[#allocation2 + $0x38] sm:$0xff] %vm17_vm0, %v353_v3  ;;  %331 = vmatpush3.bf16.msra.mxu0 %v328_v4  ;;  %348 = vmatpush3.bf16.msra.mxu1 %v328_v4  ;;  %v49_v13 = vld [vmem:[%s500_s1 + $0x38] sm:$0xff]  ;;  %v35_v15 = vld [vmem:[%s501_s0 + $0x8] sm:$0xff]  ;;  %v36_v17 = vld [vmem:[%s501_s0 + $0x10] sm:$0xff] }
   0x6   :  { %333 = vmatprep.subr.bf16.mxu0 %v332_v6  ;;  %345 = vmatprep.subr.bf16.mxu1 %v332_v6  ;;  %v340_v14 = vpack.c.bf16 %v49_v13, %v48_v12  ;;  %v39_v16 = vld [vmem:[%s501_s0 + $0x28] sm:$0xff]  ;;  %v40_v18 = vld [vmem:[%s501_s0 + $0x30] sm:$0xff]  ;;  %v37_v19 = vld [vmem:[%s501_s0 + $0x18] sm:$0xff] }
   0x7   :  { %316 = vmatprep.mubr.msk.f32.mxu0 %vm17_vm0, %v34_v9  ;;  %322 = vmatprep.mubr.msk.f32.mxu1 %vm17_vm0, %v38_v10  ;;  %v41_v20 = vld [vmem:[%s501_s0 + $0x38] sm:$0xff] }
   0x8   :  { %v27_v21 = vld [vmem:[#allocation2 + $0x8] sm:$0xff] }
   0x9   :  { %335 = vmatpush3.bf16.msra.mxu0 %v332_v6  ;;  %349 = vmatpush3.bf16.msra.mxu1 %v332_v6  ;;  %v26_v23 = vld [vmem:[#allocation2] sm:$0xff]  ;;  %v28_v35 = vld [vmem:[#allocation2 + $0x10] sm:$0xff] }
   0xa   :  { %337 = vmatprep.subr.bf16.mxu0 %v336_v11  ;;  %346 = vmatprep.subr.bf16.mxu1 %v336_v11  ;;  %v30_v24 = vld [vmem:[#allocation2 + $0x20] sm:$0xff]  ;;  %v29_v32 = vld [vmem:[#allocation2 + $0x18] sm:$0xff] }
   0xb   :  { %v31_v22 = vld [vmem:[#allocation2 + $0x28] sm:$0xff]  ;;  %v32_v36 = vld [vmem:[#allocation2 + $0x30] sm:$0xff] }
   0xc   :  { %v33_v34 = vld [vmem:[#allocation2 + $0x38] sm:$0xff] }
   0xd   :  { %339 = vmatpush3.bf16.msra.mxu0 %v336_v11  ;;  %350 = vmatpush3.bf16.msra.mxu1 %v336_v11 }
   0xe   :  { %341 = vmatprep.subr.bf16.mxu0 %v340_v14  ;;  %347 = vmatprep.subr.bf16.mxu1 %v340_v14 }
  0x11   :  { %343 = vmatpush3.bf16.msra.mxu0 %v340_v14  ;;  %351 = vmatpush3.bf16.msra.mxu1 %v340_v14 }
  0x14   :  { %317 = vmatmul.mubr.msk.f32.vlgmr.msra.gmra.mrb[0].mxu0 %vm17_vm0, %v35_v15  ;;  %323 = vmatmul.mubr.msk.f32.vlgmr.msra.gmra.mrb[0].mxu1 %vm17_vm0, %v39_v16 }
  0x15   :  { %319 = vmatprep.mubr.msk.f32.mxu0 %vm17_vm0, %v36_v17  ;;  %325 = vmatprep.mubr.msk.f32.mxu1 %vm17_vm0, %v40_v18 }
  0x18   :  { %320 = vmatmul.mubr.msk.f32.gmra.mrb[2].mxu0 %vm17_vm0, %v37_v19  ;;  %326 = vmatmul.mubr.msk.f32.gmra.mrb[2].mxu1 %vm17_vm0, %v41_v20 }
  0xe7   :  { %v318_v25 = vpop.f32.mrb[0].mxu0  ;;  %v324_v26 = vpop.f32.mrb[0].mxu1 }
  0xe8   :  { %v181_v27 = vadd.f32 %v318_v25, %v27_v21  ;;  %v141_v28 = vpop.f32.mrb[1].mxu0  ;;  %v185_v29 = vadd.f32 %v324_v26, %v31_v22  ;;  %v161_v30 = vpop.f32.mrb[1].mxu1 }
  0xe9   :  { %v180_v31 = vadd.f32 %v141_v28, %v26_v23  ;;  %v184_v33 = vadd.f32 %v161_v30, %v30_v24 }
  0xea   :  { %189 = vst.msk [vmem:[#allocation2 + $0x8] sm:$0xff] %vm17_vm0, %v181_v27  ;;  %193 = vst.msk [vmem:[#allocation2 + $0x28] sm:$0xff] %vm17_vm0, %v185_v29 }
  0xeb   :  { %188 = vst.msk [vmem:[#allocation2] sm:$0xff] %vm17_vm0, %v180_v31  ;;  %v321_v37 = vpop.f32.mrb[2].mxu0  ;;  %192 = vst.msk [vmem:[#allocation2 + $0x20] sm:$0xff] %vm17_vm0, %v184_v33  ;;  %v327_v38 = vpop.f32.mrb[2].mxu1 }
  0xec   :  { %v183_v39 = vadd.f32 %v321_v37, %v29_v32  ;;  %v151_v40 = vpop.f32.mrb[3].mxu0  ;;  %v187_v41 = vadd.f32 %v327_v38, %v33_v34  ;;  %v171_v42 = vpop.f32.mrb[3].mxu1 }
  0xed   :  { %v182_v43 = vadd.f32 %v151_v40, %v28_v35  ;;  %v186_v44 = vadd.f32 %v171_v42, %v32_v36 }
  0xee   :  { %191 = vst.msk [vmem:[#allocation2 + $0x18] sm:$0xff] %vm17_vm0, %v183_v39  ;;  %195 = vst.msk [vmem:[#allocation2 + $0x38] sm:$0xff] %vm17_vm0, %v187_v41 }
  0xef   :  { %190 = vst.msk [vmem:[#allocation2 + $0x10] sm:$0xff] %vm17_vm0, %v182_v43  ;;  %194 = vst.msk [vmem:[#allocation2 + $0x30] sm:$0xff] %vm17_vm0, %v186_v44 }
  0xf1   :  { %v200_v45 = vld [vmem:[#allocation2 + $0x8] sm:$0xff] }
  0xf2   :  { %v204_v46 = vld [vmem:[#allocation2 + $0x28] sm:$0xff]  ;;  %208 = vst.msk [vmem:[%s502_s2 + $0x8] sm:$0xff] %vm17_vm0, %v200_v45  ;;  %v239_v47 = vmul.f32 %v200_v45, %v200_v45  ;;  %v199_v48 = vld [vmem:[#allocation2] sm:$0xff]  ;;  %v216_v50 = vsel %vm17_vm0, %v200_v45, 0.0 }
  0xf3   :  { %212 = vst.msk [vmem:[%s502_s2 + $0x28] sm:$0xff] %vm17_vm0, %v204_v46  ;;  %v203_v49 = vld [vmem:[#allocation2 + $0x20] sm:$0xff]  ;;  %207 = vst.msk [vmem:[%s502_s2] sm:$0xff] %vm17_vm0, %v199_v48  ;;  %v215_v51 = vsel %vm17_vm0, %v199_v48, 0.0  ;;  %v238_v52 = vmul.f32 %v199_v48, %v199_v48  ;;  %v243_v8 = vmul.f32 %v204_v46, %v204_v46  ;;  %v224_v13 = vsel %vm17_vm0, %v204_v46, 0.0 }
  0xf4   :  { %211 = vst.msk [vmem:[%s502_s2 + $0x20] sm:$0xff] %vm17_vm0, %v203_v49  ;;  %v247_v53 = vsel %vm17_vm0, %v239_v47, 0.0  ;;  %v217_v57 = vadd.f32 %v216_v50, %v215_v51  ;;  %v242_v63 = vmul.f32 %v203_v49, %v203_v49  ;;  %v222_v4 = vsel %vm17_vm0, %v203_v49, 0.0 }
  0xf5   :  { %v246_v54 = vsel %vm17_vm0, %v238_v52, 0.0  ;;  %v202_v55 = vld [vmem:[#allocation2 + $0x18] sm:$0xff]  ;;  %v255_v17 = vsel %vm17_vm0, %v243_v8, 0.0 }
  0xf6   :  { %v206_v56 = vld [vmem:[#allocation2 + $0x38] sm:$0xff]  ;;  %210 = vst.msk [vmem:[%s502_s2 + $0x18] sm:$0xff] %vm17_vm0, %v202_v55  ;;  %v201_v58 = vld [vmem:[#allocation2 + $0x10] sm:$0xff]  ;;  %v241_v60 = vmul.f32 %v202_v55, %v202_v55  ;;  %v248_v0 = vadd.f32 %v247_v53, %v246_v54  ;;  %v220_v2 = vsel %vm17_vm0, %v202_v55, 0.0  ;;  %v253_v9 = vsel %vm17_vm0, %v242_v63, 0.0 }
  0xf7   :  { %214 = vst.msk [vmem:[%s502_s2 + $0x38] sm:$0xff] %vm17_vm0, %v206_v56  ;;  %v205_v59 = vld [vmem:[#allocation2 + $0x30] sm:$0xff]  ;;  %209 = vst.msk [vmem:[%s502_s2 + $0x10] sm:$0xff] %vm17_vm0, %v201_v58  ;;  %v218_v61 = vsel %vm17_vm0, %v201_v58, 0.0  ;;  %v240_v62 = vmul.f32 %v201_v58, %v201_v58  ;;  %v245_v18 = vmul.f32 %v206_v56, %v206_v56  ;;  %v228_v22 = vsel %vm17_vm0, %v206_v56, 0.0 }
  0xf8   :  { %213 = vst.msk [vmem:[%s502_s2 + $0x30] sm:$0xff] %vm17_vm0, %v205_v59  ;;  %v219_v1 = vadd.f32 %v218_v61, %v217_v57  ;;  %v251_v7 = vsel %vm17_vm0, %v241_v60, 0.0  ;;  %v244_v10 = vmul.f32 %v205_v59, %v205_v59  ;;  %v226_v14 = vsel %vm17_vm0, %v205_v59, 0.0 }
  0xf9   :  { %v249_v3 = vsel %vm17_vm0, %v240_v62, 0.0  ;;  %v259_v25 = vsel %vm17_vm0, %v245_v18, 0.0 }
  0xfa   :  { %v250_v5 = vadd.f32 %v249_v3, %v248_v0  ;;  %v221_v6 = vadd.f32 %v220_v2, %v219_v1  ;;  %v257_v19 = vsel %vm17_vm0, %v244_v10, 0.0 }
  0xfc   :  { %v223_v11 = vadd.f32 %v222_v4, %v221_v6  ;;  %v252_v12 = vadd.f32 %v251_v7, %v250_v5 }
  0xfe   :  { %v254_v15 = vadd.f32 %v253_v9, %v252_v12  ;;  %v225_v16 = vadd.f32 %v224_v13, %v223_v11 }
 0x100   :  { %v227_v20 = vadd.f32 %v226_v14, %v225_v16  ;;  %v256_v21 = vadd.f32 %v255_v17, %v254_v15 }
 0x102   :  { %v229_v23 = vadd.f32 %v228_v22, %v227_v20  ;;  %v258_v24 = vadd.f32 %v257_v19, %v256_v21 }
 0x104   :  { %v230_v26 = vrot.slane %v229_v23, 4  ;;  %v260_v27 = vadd.f32 %v259_v25, %v258_v24 }
 0x106   :  { %v231_v28 = vadd.f32 %v230_v26, %v229_v23  ;;  %v261_v29 = vrot.slane %v260_v27, 4 }
 0x108   :  { %v232_v30 = vrot.slane %v231_v28, 2  ;;  %v262_v31 = vadd.f32 %v261_v29, %v260_v27 }
 0x10a   :  { %v233_v32 = vadd.f32 %v232_v30, %v231_v28  ;;  %v263_v33 = vrot.slane %v262_v31, 2 }
 0x10c   :  { %v234_v34 = vrot.slane %v233_v32, 1  ;;  %v264_v35 = vadd.f32 %v263_v33, %v262_v31 }
 0x10e   :  { %v235_v36 = vadd.f32 %v234_v34, %v233_v32  ;;  %v265_v37 = vrot.slane %v264_v35, 1 }
 0x110   :  { %237 = vst.msk [vmem:[%s503_s3] sm:$0x1] %vm236_vm1, %v235_v36  ;;  %v266_v38 = vadd.f32 %v265_v37, %v264_v35 }
 0x112   :  { %267 = vst.msk [vmem:[%s503_s3 + $0x1] sm:$0x1] %vm236_vm1, %v266_v38 }

// kernel: tanet_forward.32
= control target key start
LH: loop header
LB: loop body
LE: loop exit
PB: predicated region body
PF: predicated region fallthrough
CT: control target
= control target key end

     0   :  { %s500_s15 = smov 0   ;;  %s502_s16 = smov 0   ;;  %s542_s0 = inlined_call_operand.vmem [shape: f32[4,16,64], index: 0, kind: input, shape index: {}]   ;;  %s543_s1 = inlined_call_operand.vmem [shape: f32[1,1,64], index: 1, kind: input, shape index: {}]   ;;  %s544_s2 = inlined_call_operand.vmem [shape: f32[1,1,64], index: 2, kind: input, shape index: {}]   ;;  %s545_s3 = inlined_call_operand.vmem [shape: f32[4,16,64], index: 3, kind: output, shape index: {0}]   ;;  %s546_s4 = inlined_call_operand.vmem [shape: f32[4,1,64], index: 4, kind: output, shape index: {1}]  }
   0x1   :  { %s504_s17 = smov 0  }
   0x2 LB: > { %s27_s18 = sadd.s32 1, %s469_s16  ;;  %p416_p0 = scmp.ge.s32.totalorder %s473_s17, 1  ;;  %s473_s17 = sphi %s504_s17, %s15_s17   ;;  %s469_s16 = sphi %s502_s16, %s548_s16   ;;  %s465_s15 = sphi %s500_s15, %s547_s15  }
   0x3   : > { %p29_p1 = scmp.ge.s32.totalorder %s27_s18, 4  ;;  %p188_p2 = scmp.lt.s32.totalorder %s473_s17, 5 }
   0x5   : > { %s550_s18 = smov (%p29_p1, %s27_s18), 0  ;;  %p189_p3 = pnand %p416_p0, %p188_p2 }
   0x6   : > { %p229_p4 = scmp.lt.s32.totalorder (!%p189_p3), %s465_s15, 3  ;;  %v421_v0 = vld [vmem:[%s543_s1] ss:$0 sm:$0xff] (!%p189_p3)  ;;  %vm276_vm0 = vcmask (!%p189_p3), 523264   ;;  %vm288_vm1 = vcmask (!%p189_p3), 516096  }
   0x7   : > { %192 = sbr.rel (%p189_p3) target bundleno = 40 (0x28), region = 32  ;;  %v422_v3 = vld [vmem:[%s544_s2] ss:$0 sm:$0xff] (!%p189_p3) }
   0xe   : > { %s552_s15 = smov (!%p229_p4, %s465_s15), 3 }
   0xf   : > { %s425_s19 = sshll.u32 %s552_s15, 4  ;;  %s253_s6 = scalar_lea.vmem %s546_s4, %s552_s15 }
  0x10   : > { %s236_s24 = scalar_lea.vmem %s542_s0, %s425_s19  ;;  %s246_s29 = scalar_lea.vmem %s545_s3, %s425_s19 }
  0x11   : > { %v254_v1 = vld [vmem:[%s236_s24] sm:$0xff]  ;;  %v255_v2 = vld [vmem:[%s236_s24 + $0x8] sm:$0xff] }
  0x12   : > { %v263_v4 = vmul.f32 %v421_v0, %v254_v1  ;;  %v264_v5 = vmul.f32 %v421_v0, %v255_v2 }
  0x14   : > { %v272_v6 = vadd.f32 %v422_v3, %v263_v4  ;;  %v273_v7 = vadd.f32 %v422_v3, %v264_v5 }
  0x16   : > { %v274_v8 = vmax.f32 %v272_v6, 0.0  ;;  %v275_v9 = vmax.f32 %v273_v7, 0.0 }
  0x18   : > { %277 = vst.msk [vmem:[%s246_s29] sm:$0xff] %vm276_vm0, %v274_v8  ;;  %v279_v10 = vsel %vm276_vm0, %v274_v8, 0.0  ;;  %278 = vst.msk [vmem:[%s246_s29 + $0x8] sm:$0xff] %vm276_vm0, %v275_v9  ;;  %v280_v11 = vsel %vm276_vm0, %v275_v9, 0.0 }
  0x19   : > { %v281_v12 = vadd.f32 %v280_v11, %v279_v10 }
  0x1b   : > { %v282_v13 = vrot.slane %v281_v12, 4 }
  0x1d   : > { %v283_v14 = vadd.f32 %v282_v13, %v281_v12 }
  0x1f   : > { %v284_v15 = vrot.slane %v283_v14, 2 }
  0x21   : > { %v285_v16 = vadd.f32 %v284_v15, %v283_v14 }
  0x23   : > { %v286_v17 = vrot.slane %v285_v16, 1 }
  0x25   : > { %v287_v18 = vadd.f32 %v286_v17, %v285_v16 }
  0x27   : > { %289 = vst.msk [vmem:[%s253_s6] sm:$0x1] %vm288_vm1, %v287_v18 }
  0x28 PF: > { %s15_s17 = sadd.s32 1, %s473_s17   ;;  %s547_s15 = smov %s469_s16 }
  0x29   : > { %p12_p5 = scmp.ge.s32.totalorder %s15_s17, 6   ;;  %s548_s16 = smov %s550_s18 }
  0x2b   :  { %14 = sbr.rel (!%p12_p5) target bundleno = 2 (0x2), region = 74 }

// kernel: tanet_forward.34
= control target key start
LH: loop header
LB: loop body
LE: loop exit
PB: predicated region body
PF: predicated region fallthrough
CT: control target
= control target key end

     0   :  { %vm119_vm0 = vcmask 523264   ;;  %s251_s0 = inlined_call_operand.vmem [shape: f32[1,4,16,64], index: 0, kind: input, shape index: {}]   ;;  %s252_s1 = inlined_call_operand.vmem [shape: f32[1,4,3,64], index: 1, kind: input, shape index: {}]   ;;  %s253_s2 = inlined_call_operand.vmem [shape: f32[1,4,16,64], index: 2, kind: output, shape index: {}]  }
   0x1   :  { %v11_v0 = vld [vmem:[%s251_s0] sm:$0xff]  ;;  %v13_v1 = vld [vmem:[%s251_s0 + $0x10] sm:$0xff]  ;;  %v12_v6 = vld [vmem:[%s251_s0 + $0x8] sm:$0xff] }
   0x2   :  { %v132_v2 = vld [vmem:[%s252_s1] ss:$0 sm:$0xff]  ;;  %v136_v3 = vld [vmem:[%s252_s1 + $0x1] ss:$0 sm:$0xff]  ;;  %v140_v4 = vld [vmem:[%s252_s1 + $0x2] ss:$0 sm:$0xff] }
   0x3   :  { %v47_v5 = vmul.f32 %v132_v2, %v11_v0  ;;  %v71_v7 = vmul.f32 %v136_v3, %v11_v0  ;;  %v103_v8 = vmul.f32 %v140_v4, %v13_v1  ;;  %v14_v9 = vld [vmem:[%s251_s0 + $0x18] sm:$0xff]  ;;  %v48_v10 = vmul.f32 %v132_v2, %v12_v6  ;;  %v15_v12 = vld [vmem:[%s251_s0 + $0x20] sm:$0xff]  ;;  %v16_v23 = vld [vmem:[%s251_s0 + $0x28] sm:$0xff] }
   0x4   :  { %v72_v11 = vmul.f32 %v136_v3, %v12_v6  ;;  %v133_v13 = vld [vmem:[%s252_s1 + $0x4] ss:$0 sm:$0xff]  ;;  %v104_v14 = vmul.f32 %v140_v4, %v14_v9  ;;  %v137_v15 = vld [vmem:[%s252_s1 + $0x5] ss:$0 sm:$0xff]  ;;  %v141_v16 = vld [vmem:[%s252_s1 + $0x6] ss:$0 sm:$0xff] }
   0x5   :  { %v49_v17 = vmul.f32 %v133_v13, %v11_v0  ;;  %v50_v18 = vmul.f32 %v133_v13, %v12_v6  ;;  %v79_v19 = vadd.f32 %v71_v7, %v47_v5  ;;  %v73_v21 = vmul.f32 %v137_v15, %v13_v1  ;;  %v134_v24 = vld [vmem:[%s252_s1 + $0x8] ss:$0 sm:$0xff]  ;;  %v138_v25 = vld [vmem:[%s252_s1 + $0x9] ss:$0 sm:$0xff]  ;;  %v17_v28 = vld [vmem:[%s251_s0 + $0x30] sm:$0xff] }
   0x6   :  { %v80_v20 = vadd.f32 %v72_v11, %v48_v10  ;;  %v105_v22 = vmul.f32 %v141_v16, %v15_v12  ;;  %v74_v26 = vmul.f32 %v137_v15, %v14_v9  ;;  %v106_v27 = vmul.f32 %v141_v16, %v16_v23  ;;  %v142_v29 = vld [vmem:[%s252_s1 + $0xa] ss:$0 sm:$0xff]  ;;  %v135_v32 = vld [vmem:[%s252_s1 + $0xc] ss:$0 sm:$0xff]  ;;  %v139_v37 = vld [vmem:[%s252_s1 + $0xd] ss:$0 sm:$0xff] }
   0x7   :  { %v51_v30 = vmul.f32 %v134_v24, %v13_v1  ;;  %v75_v31 = vmul.f32 %v138_v25, %v15_v12  ;;  %v111_v33 = vadd.f32 %v103_v8, %v79_v19  ;;  %v81_v35 = vadd.f32 %v73_v21, %v49_v17  ;;  %v143_v38 = vld [vmem:[%s252_s1 + $0xe] ss:$0 sm:$0xff]  ;;  %v18_v41 = vld [vmem:[%s251_s0 + $0x38] sm:$0xff] }
   0x8   :  { %v112_v34 = vadd.f32 %v104_v14, %v80_v20  ;;  %v107_v36 = vmul.f32 %v142_v29, %v17_v28  ;;  %v82_v39 = vadd.f32 %v74_v26, %v50_v18  ;;  %v52_v42 = vmul.f32 %v134_v24, %v14_v9 }
   0x9   :  { %v83_v40 = vadd.f32 %v75_v31, %v51_v30  ;;  %v76_v43 = vmul.f32 %v138_v25, %v16_v23  ;;  %120 = vst.msk [vmem:[%s253_s2] sm:$0xff] %vm119_vm0, %v111_v33  ;;  %v113_v44 = vadd.f32 %v105_v22, %v81_v35  ;;  %v108_v45 = vmul.f32 %v142_v29, %v18_v41 }
   0xa   :  { %121 = vst.msk [vmem:[%s253_s2 + $0x8] sm:$0xff] %vm119_vm0, %v112_v34  ;;  %v53_v46 = vmul.f32 %v135_v32, %v15_v12  ;;  %v77_v47 = vmul.f32 %v139_v37, %v17_v28  ;;  %v114_v48 = vadd.f32 %v106_v27, %v82_v39  ;;  %v109_v51 = vmul.f32 %v143_v38, %v17_v28 }
   0xb   :  { %v115_v49 = vadd.f32 %v107_v36, %v83_v40  ;;  %v84_v50 = vadd.f32 %v76_v43, %v52_v42  ;;  %122 = vst.msk [vmem:[%s253_s2 + $0x10] sm:$0xff] %vm119_vm0, %v113_v44  ;;  %v54_v53 = vmul.f32 %v135_v32, %v16_v23  ;;  %v78_v54 = vmul.f32 %v139_v37, %v18_v41 }
   0xc   :  { %v85_v52 = vadd.f32 %v77_v47, %v53_v46  ;;  %v110_v55 = vmul.f32 %v143_v38, %v18_v41  ;;  %123 = vst.msk [vmem:[%s253_s2 + $0x18] sm:$0xff] %vm119_vm0, %v114_v48 }
   0xd   :  { %124 = vst.msk [vmem:[%s253_s2 + $0x20] sm:$0xff] %vm119_vm0, %v115_v49  ;;  %v116_v56 = vadd.f32 %v108_v45, %v84_v50  ;;  %v86_v58 = vadd.f32 %v78_v54, %v54_v53 }
   0xe   :  { %v117_v57 = vadd.f32 %v109_v51, %v85_v52 }
   0xf   :  { %125 = vst.msk [vmem:[%s253_s2 + $0x28] sm:$0xff] %vm119_vm0, %v116_v56  ;;  %v118_v59 = vadd.f32 %v110_v55, %v86_v58 }
  0x10   :  { %126 = vst.msk [vmem:[%s253_s2 + $0x30] sm:$0xff] %vm119_vm0, %v117_v57 }
  0x11   :  { %127 = vst.msk [vmem:[%s253_s2 + $0x38] sm:$0xff] %vm119_vm0, %v118_v59 }

// kernel: tanet_forward.33
= control target key start
LH: loop header
LB: loop body
LE: loop exit
PB: predicated region body
PF: predicated region fallthrough
CT: control target
= control target key end

     0   :  { %vm43_vm0 = vcmask 1043456   ;;  %vm39_vm1 = vcmask 31744   ;;  %v569_v0 = vmov 0.0   ;;  %vm570_vm2 = vmmov 0   ;;  %s768_s0 = inlined_call_operand.vmem [shape: f32[4,64], index: 0, kind: input, shape index: {}]   ;;  %s769_s2 = inlined_call_operand.vmem [shape: f32[8,4], index: 2, kind: input, shape index: {}]   ;;  %s770_s6 = inlined_call_operand.vmem [shape: f32[192,16], index: 6, kind: input, shape index: {}]   ;;  %s771_s1 = inlined_call_operand.vmem [shape: f32[4,192], index: 1, kind: input, shape index: {}]   ;;  %s772_s3 = inlined_call_operand.vmem [shape: f32[8,1], index: 3, kind: input, shape index: {}]   ;;  %s773_s4 = inlined_call_operand.vmem [shape: f32[8,1], index: 4, kind: input, shape index: {}]   ;;  %s774_s7 = inlined_call_operand.vmem [shape: f32[1,16], index: 7, kind: input, shape index: {}]   ;;  %s775_s9 = inlined_call_operand.vmem [shape: f32[16,64], index: 9, kind: input, shape index: {}]   ;;  %s776_s8 = inlined_call_operand.vmem [shape: f32[1,16], index: 8, kind: input, shape index: {}]   ;;  %s777_s5 = inlined_call_operand.vmem [shape: f32[3,8], index: 5, kind: input, shape index: {}]   ;;  %s778_s11 = inlined_call_operand.vmem [shape: f32[4,64], index: 11, kind: output, shape index: {1}]   ;;  %s779_s10 = inlined_call_operand.vmem [shape: f32[3,64], index: 10, kind: output, shape index: {0}]  }
   0x1   :  { %494 = vmatprep.subr.mxu1 %v569_v0  ;;  %v38_v1 = vld [vmem:[%s768_s0] sm:$0xf]  ;;  %496 = vmatprep.mubr.msk.f32.mxu1 %vm570_vm2, %v569_v0  ;;  %v571_v4 = vmov 0.0|0.0   ;;  %v248_v5 = vld [vmem:[%s770_s6 + $0x8] sm:$0xff]  ;;  %v249_v6 = vld [vmem:[%s770_s6 + $0x10] sm:$0xff]  ;;  %vm117_vm3 = vcmask 523264  }
   0x2   :  { %v37_v2 = vld [vmem:[%s769_s2] sm:$0xff]  ;;  %495 = vmatpush3.msk.msra.mxu1 %vm43_vm0, %v38_v1  ;;  %511 = vmatprep.subr.bf16.mxu0 %v571_v4  ;;  %v250_v7 = vld [vmem:[%s770_s6 + $0x18] sm:$0xff]  ;;  %v252_v11 = vld [vmem:[%s770_s6 + $0x28] sm:$0xff]  ;;  %v572_v42 = vmov 0   ;;  %vm345_vm4 = vcmask 125952   ;;  %vm151_vm5 = vcmask 64512  }
   0x3   :  { %v247_v3 = vld [vmem:[%s770_s6] sm:$0xff]  ;;  %497 = vmatmul.mubr.msk.f32.vlgmr.msra.gmra.mrb[0].mxu1 %vm39_vm1, %v37_v2  ;;  %499 = vmatprep.subr.mxu1 %v569_v0  ;;  %v515_v9 = vpack.c.bf16 %v250_v7, %v249_v6  ;;  %v253_v14 = vld [vmem:[%s770_s6 + $0x30] sm:$0xff]  ;;  %v254_v15 = vld [vmem:[%s770_s6 + $0x38] sm:$0xff]  ;;  %vm390_vm6 = vcmask 130048   ;;  %vm225_vm7 = vcmask 518144   ;;  %vm470_vm8 = vcmask 519168  }
   0x4   :  { %v512_v8 = vpack.c.bf16 %v248_v5, %v247_v3  ;;  %501 = vmatprep.mubr.msk.f32.mxu1 %vm570_vm2, %v569_v0  ;;  %v251_v10 = vld [vmem:[%s770_s6 + $0x20] sm:$0xff]  ;;  %v521_v17 = vpack.c.bf16 %v254_v15, %v253_v14  ;;  %v256_v19 = vld [vmem:[%s770_s6 + $0x48] sm:$0xff]  ;;  %v257_v21 = vld [vmem:[%s770_s6 + $0x50] sm:$0xff]  ;;  %554 = vset.pattern.permute.xlu1 %v572_v42 }
   0x5   :  { %v518_v12 = vpack.c.bf16 %v252_v11, %v251_v10  ;;  %v246_v13 = vld [vmem:[%s771_s1] sm:$0xff]  ;;  %v258_v22 = vld [vmem:[%s770_s6 + $0x58] sm:$0xff]  ;;  %v260_v25 = vld [vmem:[%s770_s6 + $0x68] sm:$0xff]  ;;  %555 = vset.pattern.permute.xlu0 %v572_v42 }
   0x6   :  { %513 = vmatpush1.bf16.msra.mxu0 %v512_v8  ;;  %v272_v16 = vcombine.high %v246_v13, %v246_v13  ;;  %v255_v18 = vld [vmem:[%s770_s6 + $0x40] sm:$0xff]  ;;  %v527_v23 = vpack.c.bf16 %v258_v22, %v257_v21  ;;  %v261_v27 = vld [vmem:[%s770_s6 + $0x70] sm:$0xff]  ;;  %v262_v28 = vld [vmem:[%s770_s6 + $0x78] sm:$0xff] }
   0x7   :  { %514 = vmatprep.subr.bf16.mxu0 %v571_v4  ;;  %v524_v20 = vpack.c.bf16 %v256_v19, %v255_v18  ;;  %v259_v24 = vld [vmem:[%s770_s6 + $0x60] sm:$0xff]  ;;  %v533_v29 = vpack.c.bf16 %v262_v28, %v261_v27  ;;  %v264_v31 = vld [vmem:[%s770_s6 + $0x88] sm:$0xff]  ;;  %v265_v33 = vld [vmem:[%s770_s6 + $0x90] sm:$0xff] }
   0x8   :  { %483 = vmatprep.mubr.msk.f32.mxu0 %vm117_vm3, %v272_v16  ;;  %v530_v26 = vpack.c.bf16 %v260_v25, %v259_v24  ;;  %v263_v30 = vld [vmem:[%s770_s6 + $0x80] sm:$0xff]  ;;  %v266_v34 = vld [vmem:[%s770_s6 + $0x98] sm:$0xff]  ;;  %v268_v37 = vld [vmem:[%s770_s6 + $0xa8] sm:$0xff] }
   0x9   :  { %v536_v32 = vpack.c.bf16 %v264_v31, %v263_v30  ;;  %v539_v35 = vpack.c.bf16 %v266_v34, %v265_v33  ;;  %v267_v36 = vld [vmem:[%s770_s6 + $0xa0] sm:$0xff]  ;;  %v269_v39 = vld [vmem:[%s770_s6 + $0xb0] sm:$0xff]  ;;  %v270_v40 = vld [vmem:[%s770_s6 + $0xb8] sm:$0xff] }
   0xa   :  { %516 = vmatpush1.bf16.msra.mxu0 %v515_v9  ;;  %v542_v38 = vpack.c.bf16 %v268_v37, %v267_v36  ;;  %v545_v41 = vpack.c.bf16 %v270_v40, %v269_v39  ;;  %v135_v43 = vld [vmem:[%s772_s3] sm:$0xff]  ;;  %v389_v31 = vld [vmem:[%s775_s9 + $0x8] sm:$0xff] }
   0xb   :  { %517 = vmatprep.subr.bf16.mxu0 %v571_v4  ;;  %138 = vperm.xlu1 %554, %v135_v43   ;;  %v142_v44 = vld [vmem:[%s773_s4] sm:$0xff] }
   0xc   :  { %v484_v25 = vld [vmem:[%s774_s7] ss:$0 sm:$0xff] }
   0xd   :  { %v388_v30 = vld [vmem:[%s775_s9] sm:$0xff] }
   0xe   :  { %519 = vmatpush1.bf16.msra.mxu0 %v518_v12  ;;  %v548_v36 = vpack.c.bf16 %v389_v31, %v388_v30 }
   0xf   :  { %520 = vmatprep.subr.bf16.mxu0 %v571_v4  ;;  %145 = vperm.xlu1 %554, %v142_v44  }
  0x12   :  { %522 = vmatpush1.bf16.msra.mxu0 %v521_v17 }
  0x13   :  { %523 = vmatprep.subr.bf16.mxu0 %v571_v4 }
  0x16   :  { %525 = vmatpush1.bf16.msra.mxu0 %v524_v20 }
  0x17   :  { %526 = vmatprep.subr.bf16.mxu0 %v571_v4 }
  0x1a   :  { %528 = vmatpush1.bf16.msra.mxu0 %v527_v23 }
  0x1b   :  { %529 = vmatprep.subr.bf16.mxu0 %v571_v4 }
  0x1e   :  { %531 = vmatpush1.bf16.msra.mxu0 %v530_v26 }
  0x1f   :  { %532 = vmatprep.subr.bf16.mxu0 %v571_v4 }
  0x22   :  { %534 = vmatpush1.bf16.msra.mxu0 %v533_v29 }
  0x23   :  { %535 = vmatprep.subr.bf16.mxu0 %v571_v4 }
  0x26   :  { %537 = vmatpush1.bf16.msra.mxu0 %v536_v32  ;;  %v485_v32 = vld [vmem:[%s776_s8] ss:$0 sm:$0xff] }
  0x27   :  { %538 = vmatprep.subr.bf16.mxu0 %v571_v4 }
  0x2a   :  { %540 = vmatpush1.bf16.msra.mxu0 %v539_v35  ;;  %v150_v35 = vld [vmem:[%s777_s5] sm:$0x7] }
  0x2b   :  { %541 = vmatprep.subr.bf16.mxu0 %v571_v4 }
  0x2e   :  { %543 = vmatpush1.bf16.msra.mxu0 %v542_v38 }
  0x2f   :  { %544 = vmatprep.subr.bf16.mxu0 %v571_v4 }
  0x32   :  { %546 = vmatpush1.bf16.msra.mxu0 %v545_v41 }
  0x35   :  { %340 = vmatmul.mubr.f32.vlgmr.msra.gmra.mrb[0].mxu0 %v246_v13 }
  0x8a   :  { %v139_v21 = vpop.permute.xlu1 %138 }
  0x8e   :  { %v146_v29 = vpop.permute.xlu1 %145 }
  0xd6   :  { %v113_v45 = vpop.f32.mrb[0].mxu1 }
  0xd7   :  { %v498_v46 = vpop.f32.mrb[1].mxu1  ;;  %v118_v47 = vsel %vm117_vm3, %v113_v45, 0.0  ;;  %v123_v48 = vmul.f32 %v113_v45, %v113_v45 }
  0xd8   :  { %119 = vadd.xlane.f32.xlu0 %v118_v47 }
  0xd9   :  { %v124_v49 = vsel %vm117_vm3, %v123_v48, 0.0 }
  0xdc   :  { %125 = vadd.xlane.f32.xlu0 %v124_v49 }
 0x108   :  { %v341_v50 = vpop.f32.mrb[0].mxu0 }
 0x109   :  { %v343_v51 = vpop.f32.mrb[1].mxu0  ;;  %v346_v52 = vsel %vm345_vm4, %v341_v50, 0.0  ;;  %v355_v53 = vmul.f32 %v341_v50, %v341_v50 }
 0x10a   :  { %v347_v54 = vrot.slane %v346_v52, 4 }
 0x10b   :  { %v356_v55 = vsel %vm345_vm4, %v355_v53, 0.0 }
 0x10c   :  { %v348_v56 = vadd.f32 %v347_v54, %v346_v52  ;;  %v357_v57 = vrot.slane %v356_v55, 4 }
 0x10e   :  { %v349_v58 = vrot.slane %v348_v56, 2  ;;  %v358_v59 = vadd.f32 %v357_v57, %v356_v55 }
 0x110   :  { %v350_v60 = vadd.f32 %v349_v58, %v348_v56  ;;  %v359_v61 = vrot.slane %v358_v59, 2 }
 0x112   :  { %v351_v62 = vrot.slane %v350_v60, 1  ;;  %v360_v63 = vadd.f32 %v359_v61, %v358_v59 }
 0x114   :  { %v352_v1 = vadd.f32 %v351_v62, %v350_v60  ;;  %v361_v2 = vrot.slane %v360_v63, 1 }
 0x116   :  { %v354_v3 = vmul.f32 0.25, %v352_v1  ;;  %v362_v5 = vadd.f32 %v361_v2, %v360_v63 }
 0x118   :  { %v363_v6 = vmul.f32 0.25, %v362_v5  ;;  %v364_v7 = vmul.f32 %v354_v3, %v354_v3  ;;  %v367_v19 = vsub.f32 %v341_v50, %v354_v3 }
 0x11a   :  { %v365_v8 = vsub.f32 %v363_v6, %v364_v7 }
 0x11c   :  { %v366_v11 = vmax.f32 %v365_v8, 0.0 }
 0x11e   :  { %v368_v15 = vadd.f32 1e-05, %v366_v11 }
 0x120   :  { %557 = vrsqrt.f32 %v368_v15 }
 0x12a   :  { %v558_v20 = vpop.eup %557 }
 0x12b   :  { %v370_v24 = vmul.f32 %v558_v20, %v367_v19 }
 0x12d   :  { %v378_v28 = vmul.f32 %v484_v25, %v370_v24 }
 0x12f   :  { %v386_v37 = vadd.f32 %v485_v32, %v378_v28 }
 0x131   :  { %v387_v38 = vmax.f32 %v386_v37, 0.0 }
 0x165   :  { %v120_v9 = vpop.xlane.xlu0 %119 }
 0x166   :  { %v122_v10 = vmul.f32 0.015625, %v120_v9 }
 0x168   :  { %v128_v13 = vmul.f32 %v122_v10, %v122_v10  ;;  %v131_v22 = vsub.f32 %v113_v45, %v122_v10 }
 0x169   :  { %v126_v12 = vpop.xlane.xlu0 %125 }
 0x16a   :  { %v127_v14 = vmul.f32 0.015625, %v126_v12 }
 0x16c   :  { %v129_v16 = vsub.f32 %v127_v14, %v128_v13 }
 0x16e   :  { %v130_v17 = vmax.f32 %v129_v16, 0.0 }
 0x170   :  { %v132_v18 = vadd.f32 1e-05, %v130_v17 }
 0x172   :  { %559 = vrsqrt.f32 %v132_v18 }
 0x17c   :  { %v560_v23 = vpop.eup %559 }
 0x17d   :  { %v134_v26 = vmul.f32 %v560_v23, %v131_v22 }
 0x17f   :  { %v141_v27 = vmul.f32 %v139_v21, %v134_v26 }
 0x181   :  { %v148_v33 = vadd.f32 %v146_v29, %v141_v27 }
 0x183   :  { %v149_v34 = vmax.f32 %v148_v33, 0.0 }
 0x185   :  { %500 = vmatpush3.msra.mxu1 %v149_v34 }
 0x186   :  { %502 = vmatmul.mubr.msk.f32.vlgmr.msra.gmra.mrb[2].mxu1 %vm151_vm5, %v150_v35  ;;  %547 = vmatprep.subr.bf16.mxu1 %v571_v4 }
 0x187   :  { %549 = vmatpush3.bf16.msra.mxu1 %v548_v36  ;;  %508 = vmatprep.mubr.msk.f32.mxu1 %vm570_vm2, %v569_v0 }
 0x18a   :  { %509 = vmatmul.mubr.msk.f32.vlgmr.msra.gmra.mrb[4].mxu1 %vm390_vm6, %v387_v38 }
 0x259   :  { %v221_v39 = vpop.f32.mrb[2].mxu1 }
 0x25a   :  { %v226_v40 = vsel %vm225_vm7, %v221_v39, -inf  ;;  %v503_v41 = vpop.f32.mrb[3].mxu1 }
 0x25b   :  { %v227_v42 = vrot.slane %v226_v40, 4 }
 0x25d   :  { %v228_v43 = vmax.f32 %v226_v40, %v227_v42  ;;  %v460_v44 = vpop.f32.mrb[4].mxu1 }
 0x25e   :  { %v464_v45 = vsub.f32 0.0, %v460_v44  ;;  %v510_v46 = vpop.f32.mrb[5].mxu1 }
 0x25f   :  { %v229_v47 = vrot.slane %v228_v43, 2 }
 0x260   :  { %v465_v48 = vmul.f32 1.442695, %v464_v45 }
 0x261   :  { %v230_v4 = vmax.f32 %v228_v43, %v229_v47 }
 0x262   :  { %561 = vpow2.f32 %v465_v48 }
 0x263   :  { %v231_v49 = vrot.slane %v230_v4, 1 }
 0x265   :  { %v232_v50 = vmax.f32 %v230_v4, %v231_v49 }
 0x267   :  { %v233_v0 = vsub.f32 %v221_v39, %v232_v50 }
 0x269   :  { %v234_v51 = vmul.f32 1.442695, %v233_v0 }
 0x26b   :  { %563 = vpow2.f32 %v234_v51 }
 0x26c   :  { %v562_v52 = vpop.eup %561 }
 0x26d   :  { %v467_v53 = vadd.f32 1.0, %v562_v52 }
 0x26f   :  { %565 = vrcp.f32 %v467_v53 }
 0x275   :  { %v564_v54 = vpop.eup %563 }
 0x276   :  { %v236_v55 = vsel %vm225_vm7, %v564_v54, 0.0 }
 0x277   :  { %v237_v56 = vrot.slane %v236_v55, 4 }
 0x279   :  { %v566_v57 = vpop.eup %565  ;;  %v238_v58 = vadd.f32 %v237_v56, %v236_v55 }
 0x27a   :  { %471 = vst.msk [vmem:[%s778_s11] sm:$0xf] %vm470_vm8, %v566_v57 }
 0x27b   :  { %v239_v59 = vrot.slane %v238_v58, 2 }
 0x27d   :  { %v240_v60 = vadd.f32 %v239_v59, %v238_v58 }
 0x27f   :  { %v241_v61 = vrot.slane %v240_v60, 1 }
 0x281   :  { %v242_v62 = vadd.f32 %v241_v61, %v240_v60 }
 0x283   :  { %567 = vrcp.f32 %v242_v62 }
 0x28d   :  { %v568_v63 = vpop.eup %567 }
 0x28e   :  { %v244_v1 = vmul.f32 %v568_v63, %v564_v54 }
 0x290   :  { %245 = vst.msk [vmem:[%s779_s10] sm:$0x7] %vm225_vm7, %v244_v1 }

// kernel: tanet_forward.36
= control target key start
LH: loop header
LB: loop body
LE: loop exit
PB: predicated region body
PF: predicated region fallthrough
CT: control target
= control target key end

     0   :  { %s312_s12 = smov 0   ;;  %s335_s0 = inlined_call_operand.vmem [shape: f32[4,4,6,64], index: 0, kind: input, shape index: {}]   ;;  %s336_s1 = inlined_call_operand.vmem [shape: f32[1,64], index: 1, kind: input, shape index: {}]   ;;  %s337_s2 = inlined_call_operand.vmem [shape: f32[1,64], index: 2, kind: input, shape index: {}]   ;;  %s338_s3 = inlined_call_operand.vmem [shape: f32[4,4,4,64], index: 3, kind: output, shape index: {}]  }
   0x1 LB: > { %s261_s13 = sadd.s32 4294967295, %s290_s12   ;;  %p265_p0 = scmp.ge.s32.totalorder %s290_s12, 1  ;;  %s290_s12 = sphi %s312_s12, %s13_s12  }
   0x2   : > { %p137_p1 = scmp.lt.s32.totalorder %s290_s12, 5 }
   0x4   : > { %p138_p2 = pnand %p265_p0, %p137_p1 }
   0x5   : > { %p161_p3 = scmp.lt.s32.totalorder (!%p138_p2), %s261_s13, 3  ;;  %v270_v0 = vld [vmem:[%s336_s1] ss:$0 sm:$0xff] (!%p138_p2)  ;;  %vm201_vm0 = vcmask (!%p138_p2), 519168  }
   0x6   : > { %141 = sbr.rel (%p138_p2) target bundleno = 25 (0x19), region = 32  ;;  %v271_v1 = vld [vmem:[%s337_s2] ss:$0 sm:$0xff] (!%p138_p2) }
   0xd   : > { %s340_s13 = smov (!%p161_p3, %s261_s13), 3 }
   0xe   : > { %s274_s14 = sshll.u32 %s340_s13, 5  ;;  %s275_s22 = sshll.u32 %s340_s13, 4 }
   0xf   : > { %s165_s19 = scalar_lea.vmem %s335_s0, %s274_s14  ;;  %s170_s25 = scalar_lea.vmem %s338_s3, %s275_s22 }
  0x10   : > { %v171_v2 = vld [vmem:[%s165_s19] sm:$0xf]  ;;  %v172_v3 = vld [vmem:[%s165_s19 + $0x8] sm:$0xf]  ;;  %v173_v4 = vld [vmem:[%s165_s19 + $0x10] sm:$0xf] }
  0x11   : > { %v182_v5 = vmul.f32 %v270_v0, %v171_v2  ;;  %v183_v6 = vmul.f32 %v270_v0, %v172_v3  ;;  %v184_v7 = vmul.f32 %v270_v0, %v173_v4  ;;  %v174_v8 = vld [vmem:[%s165_s19 + $0x18] sm:$0xf] }
  0x12   : > { %v185_v9 = vmul.f32 %v270_v0, %v174_v8 }
  0x13   : > { %v193_v10 = vadd.f32 %v271_v1, %v182_v5  ;;  %v194_v11 = vadd.f32 %v271_v1, %v183_v6  ;;  %v195_v12 = vadd.f32 %v271_v1, %v184_v7 }
  0x14   : > { %v196_v13 = vadd.f32 %v271_v1, %v185_v9 }
  0x15   : > { %v197_v14 = vmax.f32 %v193_v10, 0.0  ;;  %v198_v15 = vmax.f32 %v194_v11, 0.0  ;;  %v199_v16 = vmax.f32 %v195_v12, 0.0 }
  0x16   : > { %v200_v17 = vmax.f32 %v196_v13, 0.0 }
  0x17   : > { %202 = vst.msk [vmem:[%s170_s25] sm:$0xf] %vm201_vm0, %v197_v14  ;;  %203 = vst.msk [vmem:[%s170_s25 + $0x4] sm:$0xf] %vm201_vm0, %v198_v15 }
  0x18   : > { %204 = vst.msk [vmem:[%s170_s25 + $0x8] sm:$0xf] %vm201_vm0, %v199_v16  ;;  %205 = vst.msk [vmem:[%s170_s25 + $0xc] sm:$0xf] %vm201_vm0, %v200_v17 }
  0x19 PF: > { %s13_s12 = sadd.s32 1, %s290_s12  }
  0x1a   : > { %p10_p4 = scmp.ge.s32.totalorder %s13_s12, 6  }
  0x1c   :  { %12 = sbr.rel (!%p10_p4) target bundleno = 1 (0x1), region = 62 }

// kernel: tanet_forward.39
= control target key start
LH: loop header
LB: loop body
LE: loop exit
PB: predicated region body
PF: predicated region fallthrough
CT: control target
= control target key end

     0   :  { %v41_v0 = vlaneseq  ;;  %s490_s1 = inlined_call_operand.vmem [shape: f32[1,256], index: 1, kind: input, shape index: {}]   ;;  %s491_s2 = inlined_call_operand.vmem [shape: f32[1,256], index: 2, kind: input, shape index: {}]   ;;  %s492_s4 = inlined_call_operand.vmem [shape: f32[1,256], index: 4, kind: input, shape index: {}]   ;;  %s493_s5 = inlined_call_operand.vmem [shape: f32[1,256], index: 5, kind: input, shape index: {}]   ;;  %s494_s0 = inlined_call_operand.vmem [shape: f32[64,256], index: 0, kind: input, shape index: {}]   ;;  %s495_s3 = inlined_call_operand.vmem [shape: f32[64,256], index: 3, kind: input, shape index: {}]   ;;  %s496_s6 = inlined_call_operand.vmem [shape: f32[64,256], index: 6, kind: output, shape index: {}]  }
   0x1   :  { %v39_v1 = vld [vmem:[%s490_s1] sm:$0x3]  ;;  %v24_v10 = vld [vmem:[%s494_s0 + $0x8] sm:$0xff]  ;;  %v25_v11 = vld [vmem:[%s494_s0 + $0x10] sm:$0xff] }
   0x2   :  { %v42_v2 = vshrl.u32 %v41_v0, 7  ;;  %v67_v3 = vld [vmem:[%s491_s2] sm:$0x3]  ;;  %v97_v12 = vld [vmem:[%s495_s3 + $0x10] sm:$0xff]  ;;  %v96_v17 = vld [vmem:[%s495_s3 + $0x8] sm:$0xff] }
   0x3   :  { %v111_v4 = vld [vmem:[%s492_s4] sm:$0x3]  ;;  %v26_v18 = vld [vmem:[%s494_s0 + $0x18] sm:$0xff]  ;;  %v28_v30 = vld [vmem:[%s494_s0 + $0x28] sm:$0xff] }
   0x4   :  { %v155_v5 = vld [vmem:[%s493_s5] sm:$0x3]  ;;  %v43_v7 = vsub.s32 0, %v42_v2  ;;  %v47_v9 = vsub.s32 1, %v42_v2  ;;  %v98_v19 = vld [vmem:[%s495_s3 + $0x18] sm:$0xff]  ;;  %v100_v31 = vld [vmem:[%s495_s3 + $0x28] sm:$0xff] }
   0x5   :  { %v23_v6 = vld [vmem:[%s494_s0] sm:$0xff]  ;;  %v29_v36 = vld [vmem:[%s494_s0 + $0x30] sm:$0xff]  ;;  %v30_v50 = vld [vmem:[%s494_s0 + $0x38] sm:$0xff] }
   0x6   :  { %v95_v8 = vld [vmem:[%s495_s3] sm:$0xff]  ;;  %v281_v13 = vrot.slane %v39_v1, %v43_v7  ;;  %v283_v14 = vrot.slane %v67_v3, %v43_v7  ;;  %v285_v15 = vrot.slane %v111_v4, %v43_v7  ;;  %v287_v16 = vrot.slane %v155_v5, %v43_v7  ;;  %v101_v41 = vld [vmem:[%s495_s3 + $0x30] sm:$0xff]  ;;  %v102_v63 = vld [vmem:[%s495_s3 + $0x38] sm:$0xff] }
   0x7   :  { %v298_v20 = vrot.slane %v39_v1, %v47_v9  ;;  %v300_v21 = vrot.slane %v67_v3, %v47_v9  ;;  %v302_v22 = vrot.slane %v111_v4, %v47_v9  ;;  %v304_v23 = vrot.slane %v155_v5, %v47_v9  ;;  %v27_v24 = vld [vmem:[%s494_s0 + $0x20] sm:$0xff]  ;;  %v104_v7 = vld [vmem:[%s495_s3 + $0x48] sm:$0xff] }
   0x8   :  { %v99_v25 = vld [vmem:[%s495_s3 + $0x20] sm:$0xff]  ;;  %v51_v26 = vmul.f32 %v281_v13, %v23_v6  ;;  %v123_v27 = vmul.f32 %v285_v15, %v95_v8  ;;  %v53_v28 = vmul.f32 %v281_v13, %v25_v11  ;;  %v125_v29 = vmul.f32 %v285_v15, %v97_v12  ;;  %v32_v6 = vld [vmem:[%s494_s0 + $0x48] sm:$0xff]  ;;  %v33_v12 = vld [vmem:[%s494_s0 + $0x50] sm:$0xff] }
   0x9   :  { %v52_v32 = vmul.f32 %v298_v20, %v24_v10  ;;  %v124_v33 = vmul.f32 %v302_v22, %v96_v17  ;;  %v54_v34 = vmul.f32 %v298_v20, %v26_v18  ;;  %v126_v35 = vmul.f32 %v302_v22, %v98_v19  ;;  %v31_v0 = vld [vmem:[%s494_s0 + $0x40] sm:$0xff] }
   0xa   :  { %v79_v37 = vadd.f32 %v283_v14, %v51_v26  ;;  %v81_v38 = vadd.f32 %v283_v14, %v53_v28  ;;  %v55_v39 = vmul.f32 %v281_v13, %v27_v24  ;;  %v127_v40 = vmul.f32 %v285_v15, %v99_v25  ;;  %v103_v5 = vld [vmem:[%s495_s3 + $0x40] sm:$0xff]  ;;  %v105_v25 = vld [vmem:[%s495_s3 + $0x50] sm:$0xff]  ;;  %v34_v26 = vld [vmem:[%s494_s0 + $0x58] sm:$0xff] }
   0xb   :  { %v80_v42 = vadd.f32 %v300_v21, %v52_v32  ;;  %v82_v43 = vadd.f32 %v300_v21, %v54_v34  ;;  %v56_v44 = vmul.f32 %v298_v20, %v28_v30  ;;  %v128_v45 = vmul.f32 %v302_v22, %v100_v31  ;;  %v35_v32 = vld [vmem:[%s494_s0 + $0x60] sm:$0xff] }
   0xc   :  { %v139_v46 = vadd.f32 %v123_v27, %v79_v37  ;;  %v141_v47 = vadd.f32 %v125_v29, %v81_v38  ;;  %v83_v48 = vadd.f32 %v283_v14, %v55_v39  ;;  %v57_v49 = vmul.f32 %v281_v13, %v29_v36  ;;  %v106_v27 = vld [vmem:[%s495_s3 + $0x58] sm:$0xff]  ;;  %v107_v37 = vld [vmem:[%s495_s3 + $0x60] sm:$0xff]  ;;  %v36_v38 = vld [vmem:[%s494_s0 + $0x68] sm:$0xff] }
   0xd   :  { %v140_v51 = vadd.f32 %v124_v33, %v80_v42  ;;  %v142_v52 = vadd.f32 %v126_v35, %v82_v43  ;;  %v84_v53 = vadd.f32 %v300_v21, %v56_v44  ;;  %v129_v54 = vmul.f32 %v285_v15, %v101_v41 }
   0xe   :  { %v167_v55 = vadd.f32 %v287_v16, %v139_v46  ;;  %v169_v56 = vadd.f32 %v287_v16, %v141_v47  ;;  %v143_v57 = vadd.f32 %v127_v40, %v83_v48  ;;  %v85_v58 = vadd.f32 %v283_v14, %v57_v49  ;;  %v108_v47 = vld [vmem:[%s495_s3 + $0x68] sm:$0xff] }
   0xf   :  { %v168_v59 = vadd.f32 %v304_v23, %v140_v51  ;;  %v170_v60 = vadd.f32 %v304_v23, %v142_v52  ;;  %v144_v61 = vadd.f32 %v128_v45, %v84_v53  ;;  %v58_v62 = vmul.f32 %v298_v20, %v30_v50  ;;  %v37_v52 = vld [vmem:[%s494_s0 + $0x70] sm:$0xff] }
  0x10   :  { %v183_v1 = vmax.f32 %v167_v55, 0.0  ;;  %v185_v2 = vmax.f32 %v169_v56, 0.0  ;;  %v171_v3 = vadd.f32 %v287_v16, %v143_v57  ;;  %v145_v4 = vadd.f32 %v129_v54, %v85_v58  ;;  %v109_v57 = vld [vmem:[%s495_s3 + $0x70] sm:$0xff] }
  0x11   :  { %v184_v8 = vmax.f32 %v168_v59, 0.0  ;;  %v186_v9 = vmax.f32 %v170_v60, 0.0  ;;  %v172_v10 = vadd.f32 %v304_v23, %v144_v61  ;;  %v86_v11 = vadd.f32 %v300_v21, %v58_v62  ;;  %v38_v62 = vld [vmem:[%s494_s0 + $0x78] sm:$0xff] }
  0x12   :  { %199 = vst [vmem:[%s496_s6] sm:$0xff] %v183_v1  ;;  %201 = vst [vmem:[%s496_s6 + $0x10] sm:$0xff] %v185_v2  ;;  %v187_v17 = vmax.f32 %v171_v3, 0.0  ;;  %v173_v18 = vadd.f32 %v287_v16, %v145_v4  ;;  %v130_v19 = vmul.f32 %v302_v22, %v102_v63  ;;  %v59_v24 = vmul.f32 %v281_v13, %v31_v0  ;;  %v110_v3 = vld [vmem:[%s495_s3 + $0x78] sm:$0xff] }
  0x13   :  { %200 = vst [vmem:[%s496_s6 + $0x8] sm:$0xff] %v184_v8  ;;  %202 = vst [vmem:[%s496_s6 + $0x18] sm:$0xff] %v186_v9  ;;  %v188_v28 = vmax.f32 %v172_v10, 0.0  ;;  %v131_v29 = vmul.f32 %v285_v15, %v103_v5  ;;  %v60_v30 = vmul.f32 %v298_v20, %v32_v6  ;;  %v132_v31 = vmul.f32 %v302_v22, %v104_v7 }
  0x14   :  { %203 = vst [vmem:[%s496_s6 + $0x20] sm:$0xff] %v187_v17  ;;  %v189_v33 = vmax.f32 %v173_v18, 0.0  ;;  %v146_v34 = vadd.f32 %v130_v19, %v86_v11  ;;  %v87_v35 = vadd.f32 %v283_v14, %v59_v24  ;;  %v61_v36 = vmul.f32 %v281_v13, %v33_v12 }
  0x15   :  { %204 = vst [vmem:[%s496_s6 + $0x28] sm:$0xff] %v188_v28  ;;  %v88_v39 = vadd.f32 %v300_v21, %v60_v30  ;;  %v133_v40 = vmul.f32 %v285_v15, %v105_v25  ;;  %v62_v41 = vmul.f32 %v298_v20, %v34_v26  ;;  %v134_v42 = vmul.f32 %v302_v22, %v106_v27 }
  0x16   :  { %205 = vst [vmem:[%s496_s6 + $0x30] sm:$0xff] %v189_v33  ;;  %v174_v43 = vadd.f32 %v304_v23, %v146_v34  ;;  %v147_v44 = vadd.f32 %v131_v29, %v87_v35  ;;  %v89_v45 = vadd.f32 %v283_v14, %v61_v36  ;;  %v63_v46 = vmul.f32 %v281_v13, %v35_v32 }
  0x17   :  { %v148_v48 = vadd.f32 %v132_v31, %v88_v39  ;;  %v90_v49 = vadd.f32 %v300_v21, %v62_v41  ;;  %v135_v50 = vmul.f32 %v285_v15, %v107_v37  ;;  %v64_v51 = vmul.f32 %v298_v20, %v36_v38 }
  0x18   :  { %v190_v53 = vmax.f32 %v174_v43, 0.0  ;;  %v175_v54 = vadd.f32 %v287_v16, %v147_v44  ;;  %v149_v55 = vadd.f32 %v133_v40, %v89_v45  ;;  %v91_v56 = vadd.f32 %v283_v14, %v63_v46 }
  0x19   :  { %v176_v58 = vadd.f32 %v304_v23, %v148_v48  ;;  %v150_v59 = vadd.f32 %v134_v42, %v90_v49  ;;  %v92_v60 = vadd.f32 %v300_v21, %v64_v51  ;;  %v136_v61 = vmul.f32 %v302_v22, %v108_v47 }
  0x1a   :  { %206 = vst [vmem:[%s496_s6 + $0x38] sm:$0xff] %v190_v53  ;;  %v191_v63 = vmax.f32 %v175_v54, 0.0  ;;  %v177_v0 = vadd.f32 %v287_v16, %v149_v55  ;;  %v151_v1 = vadd.f32 %v135_v50, %v91_v56  ;;  %v65_v2 = vmul.f32 %v281_v13, %v37_v52 }
  0x1b   :  { %v192_v4 = vmax.f32 %v176_v58, 0.0  ;;  %v178_v5 = vadd.f32 %v304_v23, %v150_v59  ;;  %v152_v6 = vadd.f32 %v136_v61, %v92_v60  ;;  %v137_v7 = vmul.f32 %v285_v15, %v109_v57 }
  0x1c   :  { %207 = vst [vmem:[%s496_s6 + $0x40] sm:$0xff] %v191_v63  ;;  %v193_v8 = vmax.f32 %v177_v0, 0.0  ;;  %v179_v9 = vadd.f32 %v287_v16, %v151_v1  ;;  %v93_v10 = vadd.f32 %v283_v14, %v65_v2  ;;  %v66_v13 = vmul.f32 %v298_v20, %v38_v62 }
  0x1d   :  { %208 = vst [vmem:[%s496_s6 + $0x48] sm:$0xff] %v192_v4  ;;  %v194_v11 = vmax.f32 %v178_v5, 0.0  ;;  %v180_v12 = vadd.f32 %v304_v23, %v152_v6  ;;  %v138_v15 = vmul.f32 %v302_v22, %v110_v3 }
  0x1e   :  { %209 = vst [vmem:[%s496_s6 + $0x50] sm:$0xff] %v193_v8  ;;  %v195_v17 = vmax.f32 %v179_v9, 0.0  ;;  %v153_v18 = vadd.f32 %v137_v7, %v93_v10  ;;  %v94_v19 = vadd.f32 %v300_v21, %v66_v13 }
  0x1f   :  { %210 = vst [vmem:[%s496_s6 + $0x58] sm:$0xff] %v194_v11  ;;  %v196_v14 = vmax.f32 %v180_v12, 0.0 }
  0x20   :  { %211 = vst [vmem:[%s496_s6 + $0x60] sm:$0xff] %v195_v17  ;;  %v181_v20 = vadd.f32 %v287_v16, %v153_v18  ;;  %v154_v22 = vadd.f32 %v138_v15, %v94_v19 }
  0x21   :  { %212 = vst [vmem:[%s496_s6 + $0x68] sm:$0xff] %v196_v14 }
  0x22   :  { %v197_v24 = vmax.f32 %v181_v20, 0.0  ;;  %v182_v25 = vadd.f32 %v304_v23, %v154_v22 }
  0x24   :  { %213 = vst [vmem:[%s496_s6 + $0x70] sm:$0xff] %v197_v24  ;;  %v198_v21 = vmax.f32 %v182_v25, 0.0 }
  0x26   :  { %214 = vst [vmem:[%s496_s6 + $0x78] sm:$0xff] %v198_v21 }

// kernel: tanet_forward.35
= control target key start
LH: loop header
LB: loop body
LE: loop exit
PB: predicated region body
PF: predicated region fallthrough
CT: control target
= control target key end

     0   :  { %s2067_s12 = smov 0   ;;  %s2069_s13 = smov 0   ;;  %s2540_s0 = inlined_call_operand.vmem [shape: f32[4,1,38,64], index: 0, kind: input, shape index: {}]   ;;  %s2541_s1 = inlined_call_operand.vmem [shape: f32[3,3,64,64], index: 1, kind: input, shape index: {}]   ;;  %s2542_s2 = inlined_call_operand.vmem [shape: f32[4,24,64], index: 2, kind: output, shape index: {0}]   ;;  %s2543_s3 = inlined_call_operand.vmem [shape: f32[4,2,64], index: 3, kind: output, shape index: {1}]  }
   0x1   :  { %s2071_s14 = smov 0  }
   0x2 LB: > { %s23_s15 = sadd.s32 1, %s2038_s13  ;;  %p1448_p0 = scmp.ge.s32.totalorder %s2042_s14, 1  ;;  %s2042_s14 = sphi %s2071_s14, %s14_s14   ;;  %s2038_s13 = sphi %s2069_s13, %s2545_s13   ;;  %s2034_s12 = sphi %s2067_s12, %s2544_s12  }
   0x3   : > { %p24_p1 = scmp.ge.s32.totalorder %s23_s15, 4  ;;  %p165_p2 = scmp.lt.s32.totalorder %s2042_s14, 5 }
   0x5   : > { %s2547_s15 = smov (%p24_p1, %s23_s15), 0  ;;  %p166_p3 = pnand %p1448_p0, %p165_p2 }
   0x6   : > { %v230_v0 = vld [vmem:[%s2541_s1] sm:$0xff] (!%p166_p3)  ;;  %v231_v1 = vld [vmem:[%s2541_s1 + $0x8] sm:$0xff] (!%p166_p3)  ;;  %v232_v2 = vld [vmem:[%s2541_s1 + $0x10] sm:$0xff] (!%p166_p3)  ;;  %v2044_v3 = vmov (!%p166_p3), 0.0|0.0   ;;  %p203_p4 = scmp.lt.s32.totalorder (!%p166_p3), %s2034_s12, 3  ;;  %vm2045_vm0 = vmmov (!%p166_p3), 0  }
   0x7   : > { %169 = sbr.rel (%p166_p3) target bundleno = 351 (0x15f), region = 28  ;;  %1869 = vmatprep.subr.bf16.mxu0 (!%p166_p3), %v2044_v3  ;;  %v1870_v4 = vpack.c.bf16 (!%p166_p3), %v231_v1, %v230_v0  ;;  %v233_v5 = vld [vmem:[%s2541_s1 + $0x18] sm:$0xff] (!%p166_p3)  ;;  %1881 = vmatprep.subr.bf16.mxu1 (!%p166_p3), %v2044_v3  ;;  %v1455_v6 = vld [vmem:[%s2541_s1 + $0x40] sm:$0xff] (!%p166_p3)  ;;  %v1456_v7 = vld [vmem:[%s2541_s1 + $0x48] sm:$0xff] (!%p166_p3)  ;;  %v2046_v10 = vmov (!%p166_p3), 0.0   ;;  %vm238_vm1 = vcmask (!%p166_p3), 523264  }
   0x8   : > { %v1882_v8 = vpack.c.bf16 (!%p166_p3), %v1456_v7, %v1455_v6  ;;  %v1457_v9 = vld [vmem:[%s2541_s1 + $0x50] sm:$0xff] (!%p166_p3)  ;;  %1660 = vmatprep.mubr.msk.f32.mxu0 (!%p166_p3), %vm2045_vm0, %v2046_v10  ;;  %1685 = vmatprep.mubr.msk.f32.mxu1 (!%p166_p3), %vm2045_vm0, %v2046_v10  ;;  %v1873_v11 = vpack.c.bf16 (!%p166_p3), %v233_v5, %v232_v2  ;;  %v1458_v12 = vld [vmem:[%s2541_s1 + $0x58] sm:$0xff] (!%p166_p3)  ;;  %v234_v13 = vld [vmem:[%s2541_s1 + $0x20] sm:$0xff] (!%p166_p3)  ;;  %vm1292_vm14 = vcmask (!%p166_p3), 516096  }
   0x9   : > { %1871 = vmatpush3.bf16.msra.mxu0 (!%p166_p3), %v1870_v4  ;;  %v235_v14 = vld [vmem:[%s2541_s1 + $0x28] sm:$0xff] (!%p166_p3)  ;;  %v1885_v15 = vpack.c.bf16 (!%p166_p3), %v1458_v12, %v1457_v9  ;;  %v1459_v16 = vld [vmem:[%s2541_s1 + $0x60] sm:$0xff] (!%p166_p3)  ;;  %v236_v19 = vld [vmem:[%s2541_s1 + $0x30] sm:$0xff] (!%p166_p3) }
   0xa   : > { %1872 = vmatprep.subr.bf16.mxu0 (!%p166_p3), %v2044_v3  ;;  %1883 = vmatpush3.bf16.msra.mxu1 (!%p166_p3), %v1882_v8  ;;  %v1460_v17 = vld [vmem:[%s2541_s1 + $0x68] sm:$0xff] (!%p166_p3)  ;;  %v1876_v18 = vpack.c.bf16 (!%p166_p3), %v235_v14, %v234_v13  ;;  %v237_v20 = vld [vmem:[%s2541_s1 + $0x38] sm:$0xff] (!%p166_p3)  ;;  %v1461_v22 = vld [vmem:[%s2541_s1 + $0x70] sm:$0xff] (!%p166_p3) }
   0xb   : > { %1884 = vmatprep.subr.bf16.mxu1 (!%p166_p3), %v2044_v3  ;;  %v1888_v21 = vpack.c.bf16 (!%p166_p3), %v1460_v17, %v1459_v16  ;;  %v1462_v23 = vld [vmem:[%s2541_s1 + $0x78] sm:$0xff] (!%p166_p3)  ;;  %v1879_v24 = vpack.c.bf16 (!%p166_p3), %v237_v20, %v236_v19  ;;  %v1466_v25 = vld [vmem:[%s2541_s1 + $0x80] sm:$0xff] (!%p166_p3)  ;;  %v1467_v26 = vld [vmem:[%s2541_s1 + $0x88] sm:$0xff] (!%p166_p3) }
   0xc   : > { %v1891_v27 = vpack.c.bf16 (!%p166_p3), %v1462_v23, %v1461_v22  ;;  %v1477_v28 = vld [vmem:[%s2541_s1 + $0xc0] sm:$0xff] (!%p166_p3)  ;;  %v1478_v29 = vld [vmem:[%s2541_s1 + $0xc8] sm:$0xff] (!%p166_p3)  ;;  %v1894_v31 = vpack.c.bf16 (!%p166_p3), %v1467_v26, %v1466_v25  ;;  %v1468_v32 = vld [vmem:[%s2541_s1 + $0x90] sm:$0xff] (!%p166_p3) }
   0xd   : > { %1874 = vmatpush3.bf16.msra.mxu0 (!%p166_p3), %v1873_v11  ;;  %v1469_v33 = vld [vmem:[%s2541_s1 + $0x98] sm:$0xff] (!%p166_p3)  ;;  %v1906_v35 = vpack.c.bf16 (!%p166_p3), %v1478_v29, %v1477_v28  ;;  %v1479_v36 = vld [vmem:[%s2541_s1 + $0xd0] sm:$0xff] (!%p166_p3)  ;;  %v1470_v40 = vld [vmem:[%s2541_s1 + $0xa0] sm:$0xff] (!%p166_p3) }
   0xe   : > { %s2549_s12 = smov (!%p203_p4, %s2034_s12), 3  ;;  %1875 = vmatprep.subr.bf16.mxu0 %v2044_v3  ;;  %1886 = vmatpush3.bf16.msra.mxu1 %v1885_v15  ;;  %v1480_v37 = vld [vmem:[%s2541_s1 + $0xd8] sm:$0xff]  ;;  %v1897_v39 = vpack.c.bf16 %v1469_v33, %v1468_v32  ;;  %v1471_v41 = vld [vmem:[%s2541_s1 + $0xa8] sm:$0xff]  ;;  %v1481_v44 = vld [vmem:[%s2541_s1 + $0xe0] sm:$0xff] }
   0xf   : > { %s1985_s21 = smul.u32 40, %s2549_s12  ;;  %1887 = vmatprep.subr.bf16.mxu1 %v2044_v3  ;;  %v1909_v43 = vpack.c.bf16 %v1480_v37, %v1479_v36  ;;  %v1482_v45 = vld [vmem:[%s2541_s1 + $0xe8] sm:$0xff]  ;;  %v1900_v47 = vpack.c.bf16 %v1471_v41, %v1470_v40  ;;  %v1472_v48 = vld [vmem:[%s2541_s1 + $0xb0] sm:$0xff]  ;;  %v1473_v49 = vld [vmem:[%s2541_s1 + $0xb8] sm:$0xff]  ;;  %s1451_s7 = sshll.u32 %s2549_s12, 1 }
  0x10   : > { %v1912_v51 = vpack.c.bf16 %v1482_v45, %v1481_v44  ;;  %v1483_v52 = vld [vmem:[%s2541_s1 + $0xf0] sm:$0xff]  ;;  %v1484_v53 = vld [vmem:[%s2541_s1 + $0xf8] sm:$0xff]  ;;  %v1903_v54 = vpack.c.bf16 %v1473_v49, %v1472_v48  ;;  %v1488_v55 = vld [vmem:[%s2541_s1 + $0x100] sm:$0xff]  ;;  %s226_s10 = scalar_lea.vmem %s2543_s3, %s1451_s7 }
  0x11   : > { %1877 = vmatpush3.bf16.msra.mxu0 %v1876_v18  ;;  %s2156_s28 = scalar_lea.vmem %s2540_s0, %s1985_s21  ;;  %v1489_v56 = vld [vmem:[%s2541_s1 + $0x108] sm:$0xff]  ;;  %v1915_v57 = vpack.c.bf16 %v1484_v53, %v1483_v52  ;;  %v1499_v58 = vld [vmem:[%s2541_s1 + $0x140] sm:$0xff]  ;;  %v1490_v62 = vld [vmem:[%s2541_s1 + $0x110] sm:$0xff] }
  0x12   : > { %1878 = vmatprep.subr.bf16.mxu0 %v2044_v3  ;;  %1889 = vmatpush3.bf16.msra.mxu1 %v1888_v21  ;;  %v227_v30 = vld [vmem:[%s2156_s28] sm:$0xff]  ;;  %v2191_v38 = vld [vmem:[%s2156_s28 + $0x8] sm:$0xff]  ;;  %v2216_v46 = vld [vmem:[%s2156_s28 + $0x10] sm:$0xff]  ;;  %v1918_v61 = vpack.c.bf16 %v1489_v56, %v1488_v55 }
  0x13   : > { %1890 = vmatprep.subr.bf16.mxu1 %v2044_v3  ;;  %v331_v34 = vld [vmem:[%s2156_s28 + $0x1] sm:$0xff]  ;;  %v332_v42 = vld [vmem:[%s2156_s28 + $0x9] sm:$0xff]  ;;  %v333_v50 = vld [vmem:[%s2156_s28 + $0x11] sm:$0xff] }
  0x14   : > { %v1500_v59 = vld [vmem:[%s2541_s1 + $0x148] sm:$0xff]  ;;  %v1491_v63 = vld [vmem:[%s2541_s1 + $0x118] sm:$0xff]  ;;  %v1501_v2 = vld [vmem:[%s2541_s1 + $0x150] sm:$0xff] }
  0x15   : > { %1880 = vmatpush3.bf16.msra.mxu0 %v1879_v24  ;;  %v441_v60 = vld [vmem:[%s2156_s28 + $0x2] sm:$0xff]  ;;  %v1930_v1 = vpack.c.bf16 %v1500_v59, %v1499_v58  ;;  %v1502_v4 = vld [vmem:[%s2541_s1 + $0x158] sm:$0xff]  ;;  %v442_v5 = vld [vmem:[%s2156_s28 + $0xa] sm:$0xff]  ;;  %v1921_v6 = vpack.c.bf16 %v1491_v63, %v1490_v62 }
  0x16   : > { %1893 = vmatprep.subr.bf16.mxu0 %v2044_v3  ;;  %1892 = vmatpush3.bf16.msra.mxu1 %v1891_v27  ;;  %v551_v0 = vld [vmem:[%s2156_s28 + $0x6] sm:$0xff]  ;;  %v2288_v9 = vld [vmem:[%s2156_s28 + $0xe] sm:$0xff]  ;;  %v1933_v11 = vpack.c.bf16 %v1502_v4, %v1501_v2  ;;  %v1495_v17 = vld [vmem:[%s2541_s1 + $0x138] sm:$0xff] }
  0x17   : > { %1905 = vmatprep.subr.bf16.mxu1 %v2044_v3  ;;  %v1492_v7 = vld [vmem:[%s2541_s1 + $0x120] sm:$0xff]  ;;  %v1493_v8 = vld [vmem:[%s2541_s1 + $0x128] sm:$0xff]  ;;  %v443_v14 = vld [vmem:[%s2156_s28 + $0x12] sm:$0xff] }
  0x18   : > { %1661 = vmatmul.mubr.msk.f32.vlgmr.msra.gmra.mrb[0].mxu0 %vm238_vm1, %v227_v30  ;;  %v1503_v12 = vld [vmem:[%s2541_s1 + $0x160] sm:$0xff]  ;;  %v1504_v13 = vld [vmem:[%s2541_s1 + $0x168] sm:$0xff]  ;;  %v1924_v15 = vpack.c.bf16 %v1493_v8, %v1492_v7  ;;  %v1494_v16 = vld [vmem:[%s2541_s1 + $0x130] sm:$0xff] }
  0x19   : > { %1895 = vmatpush3.bf16.msra.mxu0 %v1894_v31  ;;  %1663 = vmatprep.mubr.msk.f32.mxu0 %vm2045_vm0, %v2046_v10  ;;  %v2313_v18 = vld [vmem:[%s2156_s28 + $0x16] sm:$0xff]  ;;  %v1936_v19 = vpack.c.bf16 %v1504_v13, %v1503_v12  ;;  %v1927_v22 = vpack.c.bf16 %v1495_v17, %v1494_v16  ;;  %v1510_v23 = vld [vmem:[%s2541_s1 + $0x180] sm:$0xff]  ;;  %v1511_v24 = vld [vmem:[%s2541_s1 + $0x188] sm:$0xff] }
  0x1a   : > { %1896 = vmatprep.subr.bf16.mxu0 %v2044_v3  ;;  %1686 = vmatmul.mubr.msk.f32.vlgmr.msra.gmra.mrb[0].mxu1 %vm238_vm1, %v331_v34  ;;  %v1505_v20 = vld [vmem:[%s2541_s1 + $0x170] sm:$0xff]  ;;  %v1506_v21 = vld [vmem:[%s2541_s1 + $0x178] sm:$0xff]  ;;  %v1521_v26 = vld [vmem:[%s2541_s1 + $0x1c0] sm:$0xff]  ;;  %v1942_v29 = vpack.c.bf16 %v1511_v24, %v1510_v23 }
  0x1b   : > { %1688 = vmatprep.mubr.msk.f32.mxu1 %vm2045_vm0, %v2046_v10  ;;  %1907 = vmatpush3.bf16.msra.mxu1 %v1906_v35  ;;  %v1939_v25 = vpack.c.bf16 %v1506_v21, %v1505_v20  ;;  %v1522_v27 = vld [vmem:[%s2541_s1 + $0x1c8] sm:$0xff]  ;;  %v1512_v30 = vld [vmem:[%s2541_s1 + $0x190] sm:$0xff]  ;;  %v1513_v31 = vld [vmem:[%s2541_s1 + $0x198] sm:$0xff] }
  0x1c   : > { %1664 = vmatmul.mubr.msk.f32.gmra.mrb[2].mxu0 %vm238_vm1, %v2191_v38  ;;  %1908 = vmatprep.subr.bf16.mxu1 %v2044_v3  ;;  %v661_v28 = vld [vmem:[%s2156_s28 + $0x7] sm:$0xff]  ;;  %v1954_v32 = vpack.c.bf16 %v1522_v27, %v1521_v26  ;;  %v1523_v33 = vld [vmem:[%s2541_s1 + $0x1d0] sm:$0xff]  ;;  %v1524_v34 = vld [vmem:[%s2541_s1 + $0x1d8] sm:$0xff]  ;;  %v1945_v36 = vpack.c.bf16 %v1513_v31, %v1512_v30 }
  0x1d   : > { %1898 = vmatpush3.bf16.msra.mxu0 %v1897_v39  ;;  %1666 = vmatprep.mubr.msk.f32.mxu0 %vm2045_vm0, %v2046_v10  ;;  %v662_v35 = vld [vmem:[%s2156_s28 + $0xf] sm:$0xff]  ;;  %v1514_v37 = vld [vmem:[%s2541_s1 + $0x1a0] sm:$0xff]  ;;  %v1957_v40 = vpack.c.bf16 %v1524_v34, %v1523_v33  ;;  %v1517_v45 = vld [vmem:[%s2541_s1 + $0x1b8] sm:$0xff] }
  0x1e   : > { %1899 = vmatprep.subr.bf16.mxu0 %v2044_v3  ;;  %1689 = vmatmul.mubr.msk.f32.gmra.mrb[2].mxu1 %vm238_vm1, %v332_v42  ;;  %v1515_v39 = vld [vmem:[%s2541_s1 + $0x1a8] sm:$0xff]  ;;  %v663_v42 = vld [vmem:[%s2156_s28 + $0x17] sm:$0xff] }
  0x1f   : > { %1691 = vmatprep.mubr.msk.f32.mxu1 %vm2045_vm0, %v2046_v10  ;;  %1910 = vmatpush3.bf16.msra.mxu1 %v1909_v43  ;;  %v1526_v41 = vld [vmem:[%s2541_s1 + $0x1e8] sm:$0xff]  ;;  %v1948_v43 = vpack.c.bf16 %v1515_v39, %v1514_v37  ;;  %v1516_v44 = vld [vmem:[%s2541_s1 + $0x1b0] sm:$0xff]  ;;  %v1528_v49 = vld [vmem:[%s2541_s1 + $0x1f8] sm:$0xff] }
  0x20   : > { %1667 = vmatmul.mubr.msk.f32.gmra.mrb[4].mxu0 %vm238_vm1, %v2216_v46  ;;  %1911 = vmatprep.subr.bf16.mxu1 %v2044_v3  ;;  %v1533_v52 = vld [vmem:[%s2541_s1 + $0x208] sm:$0xff]  ;;  %v1534_v56 = vld [vmem:[%s2541_s1 + $0x210] sm:$0xff]  ;;  %v1539_v4 = vld [vmem:[%s2541_s1 + $0x238] sm:$0xff] }
  0x21   : > { %1901 = vmatpush3.bf16.msra.mxu0 %v1900_v47  ;;  %1710 = vmatprep.mubr.msk.f32.mxu0 %vm2045_vm0, %v2046_v10  ;;  %v773_v47 = vld [vmem:[%s2156_s28 + $0x18] sm:$0xff]  ;;  %v991_v58 = vld [vmem:[%s2156_s28 + $0xd] sm:$0xff] }
  0x22   : > { %1902 = vmatprep.subr.bf16.mxu0 %v2044_v3  ;;  %1692 = vmatmul.mubr.msk.f32.gmra.mrb[4].mxu1 %vm238_vm1, %v333_v50  ;;  %v1951_v50 = vpack.c.bf16 %v1517_v45, %v1516_v44  ;;  %v882_v59 = vld [vmem:[%s2156_s28 + $0x14] sm:$0xff]  ;;  %v1537_v62 = vld [vmem:[%s2541_s1 + $0x228] sm:$0xff]  ;;  %v1103_v7 = vld [vmem:[%s2156_s28 + $0x1e] sm:$0xff] }
  0x23   : > { %1913 = vmatpush3.bf16.msra.mxu1 %v1912_v51  ;;  %1735 = vmatprep.mubr.msk.f32.mxu1 %vm2045_vm0, %v2046_v10  ;;  %v1532_v51 = vld [vmem:[%s2541_s1 + $0x200] sm:$0xff]  ;;  %v992_v63 = vld [vmem:[%s2156_s28 + $0x15] sm:$0xff] }
  0x24   : > { %1914 = vmatprep.subr.bf16.mxu1 %v2044_v3  ;;  %v1966_v55 = vpack.c.bf16 %v1533_v52, %v1532_v51  ;;  %v1538_v2 = vld [vmem:[%s2541_s1 + $0x230] sm:$0xff] }
  0x25   : > { %1904 = vmatpush3.bf16.msra.mxu0 %v1903_v54  ;;  %v881_v54 = vld [vmem:[%s2156_s28 + $0xc] sm:$0xff] }
  0x26   : > { %1917 = vmatprep.subr.bf16.mxu0 %v2044_v3 }
  0x27   : > { %1916 = vmatpush3.bf16.msra.mxu1 %v1915_v57  ;;  %v1535_v57 = vld [vmem:[%s2541_s1 + $0x218] sm:$0xff] }
  0x28   : > { %1711 = vmatmul.mubr.msk.f32.vlgmr.msra.gmra.mrb[6].mxu0 %vm238_vm1, %v441_v60  ;;  %1929 = vmatprep.subr.bf16.mxu1 %v2044_v3  ;;  %v1969_v60 = vpack.c.bf16 %v1535_v57, %v1534_v56 }
  0x29   : > { %1713 = vmatprep.mubr.msk.f32.mxu0 %vm2045_vm0, %v2046_v10  ;;  %1919 = vmatpush3.bf16.msra.mxu0 %v1918_v61  ;;  %v1536_v61 = vld [vmem:[%s2541_s1 + $0x220] sm:$0xff] }
  0x2a   : > { %1920 = vmatprep.subr.bf16.mxu0 %v2044_v3  ;;  %1736 = vmatmul.mubr.msk.f32.vlgmr.msra.gmra.mrb[6].mxu1 %vm238_vm1, %v551_v0  ;;  %v883_v0 = vld [vmem:[%s2156_s28 + $0x1c] sm:$0xff] }
  0x2b   : > { %1738 = vmatprep.mubr.msk.f32.mxu1 %vm2045_vm0, %v2046_v10  ;;  %1931 = vmatpush3.bf16.msra.mxu1 %v1930_v1  ;;  %v1972_v1 = vpack.c.bf16 %v1537_v62, %v1536_v61 }
  0x2c   : > { %1714 = vmatmul.mubr.msk.f32.gmra.mrb[8].mxu0 %vm238_vm1, %v442_v5  ;;  %1932 = vmatprep.subr.bf16.mxu1 %v2044_v3  ;;  %v993_v5 = vld [vmem:[%s2156_s28 + $0x1d] sm:$0xff]  ;;  %s1986_s28 = smul.u32 24, %s2549_s12 }
  0x2d   : > { %1716 = vmatprep.mubr.msk.f32.mxu0 %vm2045_vm0, %v2046_v10  ;;  %1922 = vmatpush3.bf16.msra.mxu0 %v1921_v6  ;;  %v1975_v6 = vpack.c.bf16 %v1539_v4, %v1538_v2 }
  0x2e   : > { %1923 = vmatprep.subr.bf16.mxu0 %v2044_v3  ;;  %1739 = vmatmul.mubr.msk.f32.gmra.mrb[8].mxu1 %vm238_vm1, %v2288_v9  ;;  %s219_s6 = scalar_lea.vmem %s2542_s2, %s1986_s28 }
  0x2f   : > { %1741 = vmatprep.mubr.msk.f32.mxu1 %vm2045_vm0, %v2046_v10  ;;  %1934 = vmatpush3.bf16.msra.mxu1 %v1933_v11 }
  0x30   : > { %1717 = vmatmul.mubr.msk.f32.gmra.mrb[10].mxu0 %vm238_vm1, %v443_v14  ;;  %1935 = vmatprep.subr.bf16.mxu1 %v2044_v3 }
  0x31   : > { %1925 = vmatpush3.bf16.msra.mxu0 %v1924_v15  ;;  %1760 = vmatprep.mubr.msk.f32.mxu0 %vm2045_vm0, %v2046_v10 }
  0x32   : > { %1926 = vmatprep.subr.bf16.mxu0 %v2044_v3  ;;  %1742 = vmatmul.mubr.msk.f32.gmra.mrb[10].mxu1 %vm238_vm1, %v2313_v18 }
  0x33   : > { %1937 = vmatpush3.bf16.msra.mxu1 %v1936_v19  ;;  %1785 = vmatprep.mubr.msk.f32.mxu1 %vm2045_vm0, %v2046_v10 }
  0x34   : > { %1938 = vmatprep.subr.bf16.mxu1 %v2044_v3 }
  0x35   : > { %1928 = vmatpush3.bf16.msra.mxu0 %v1927_v22 }
  0x36   : > { %1941 = vmatprep.subr.bf16.mxu0 %v2044_v3 }
  0x37   : > { %1940 = vmatpush3.bf16.msra.mxu1 %v1939_v25 }
  0x38   : > { %1761 = vmatmul.mubr.msk.f32.vlgmr.msra.gmra.mrb[12].mxu0 %vm238_vm1, %v661_v28  ;;  %1953 = vmatprep.subr.bf16.mxu1 %v2044_v3 }
  0x39   : > { %1763 = vmatprep.mubr.msk.f32.mxu0 %vm2045_vm0, %v2046_v10  ;;  %1943 = vmatpush3.bf16.msra.mxu0 %v1942_v29 }
  0x3a   : > { %1944 = vmatprep.subr.bf16.mxu0 %v2044_v3  ;;  %1786 = vmatmul.mubr.msk.f32.vlgmr.msra.gmra.mrb[12].mxu1 %vm238_vm1, %v2191_v38  ;;  %v1525_v38 = vld [vmem:[%s2541_s1 + $0x1e0] sm:$0xff] }
  0x3b   : > { %1788 = vmatprep.mubr.msk.f32.mxu1 %vm2045_vm0, %v2046_v10  ;;  %1955 = vmatpush3.bf16.msra.mxu1 %v1954_v32  ;;  %v1960_v48 = vpack.c.bf16 %v1526_v41, %v1525_v38 }
  0x3c   : > { %1764 = vmatmul.mubr.msk.f32.gmra.mrb[14].mxu0 %vm238_vm1, %v662_v35  ;;  %1956 = vmatprep.subr.bf16.mxu1 %v2044_v3 }
  0x3d   : > { %1766 = vmatprep.mubr.msk.f32.mxu0 %vm2045_vm0, %v2046_v10  ;;  %1946 = vmatpush3.bf16.msra.mxu0 %v1945_v36 }
  0x3e   : > { %1947 = vmatprep.subr.bf16.mxu0 %v2044_v3  ;;  %1789 = vmatmul.mubr.msk.f32.gmra.mrb[14].mxu1 %vm238_vm1, %v2216_v46  ;;  %v1527_v46 = vld [vmem:[%s2541_s1 + $0x1f0] sm:$0xff] }
  0x3f   : > { %1791 = vmatprep.mubr.msk.f32.mxu1 %vm2045_vm0, %v2046_v10  ;;  %1958 = vmatpush3.bf16.msra.mxu1 %v1957_v40  ;;  %v1963_v53 = vpack.c.bf16 %v1528_v49, %v1527_v46 }
  0x40   : > { %1767 = vmatmul.mubr.msk.f32.gmra.mrb[16].mxu0 %vm238_vm1, %v663_v42  ;;  %1959 = vmatprep.subr.bf16.mxu1 %v2044_v3 }
  0x41   : > { %1949 = vmatpush3.bf16.msra.mxu0 %v1948_v43  ;;  %1810 = vmatprep.mubr.msk.f32.mxu0 %vm2045_vm0, %v2046_v10 }
  0x42   : > { %1950 = vmatprep.subr.bf16.mxu0 %v2044_v3  ;;  %1792 = vmatmul.mubr.msk.f32.gmra.mrb[16].mxu1 %vm238_vm1, %v773_v47 }
  0x43   : > { %1961 = vmatpush3.bf16.msra.mxu1 %v1960_v48  ;;  %1835 = vmatprep.mubr.msk.f32.mxu1 %vm2045_vm0, %v2046_v10 }
  0x44   : > { %1962 = vmatprep.subr.bf16.mxu1 %v2044_v3 }
  0x45   : > { %1952 = vmatpush3.bf16.msra.mxu0 %v1951_v50 }
  0x46   : > { %1965 = vmatprep.subr.bf16.mxu0 %v2044_v3 }
  0x47   : > { %1964 = vmatpush3.bf16.msra.mxu1 %v1963_v53 }
  0x48   : > { %1811 = vmatmul.mubr.msk.f32.vlgmr.msra.gmra.mrb[18].mxu0 %vm238_vm1, %v881_v54  ;;  %1977 = vmatprep.subr.bf16.mxu1 %v2044_v3 }
  0x49   : > { %1813 = vmatprep.mubr.msk.f32.mxu0 %vm2045_vm0, %v2046_v10  ;;  %1967 = vmatpush3.bf16.msra.mxu0 %v1966_v55 }
  0x4a   : > { %1836 = vmatmul.mubr.msk.f32.vlgmr.msra.gmra.mrb[18].mxu1 %vm238_vm1, %v991_v58  ;;  %1968 = vmatprep.subr.bf16.mxu0 %v2044_v3 }
  0x4b   : > { %1981 = vmatpush3.bf16.msra.mxu1 %v1966_v55  ;;  %1838 = vmatprep.mubr.msk.f32.mxu1 %vm2045_vm0, %v2046_v10 }
  0x4c   : > { %1814 = vmatmul.mubr.msk.f32.gmra.mrb[20].mxu0 %vm238_vm1, %v882_v59  ;;  %1978 = vmatprep.subr.bf16.mxu1 %v2044_v3 }
  0x4d   : > { %1816 = vmatprep.mubr.msk.f32.mxu0 %vm2045_vm0, %v2046_v10  ;;  %1970 = vmatpush3.bf16.msra.mxu0 %v1969_v60 }
  0x4e   : > { %1971 = vmatprep.subr.bf16.mxu0 %v2044_v3  ;;  %1839 = vmatmul.mubr.msk.f32.gmra.mrb[20].mxu1 %vm238_vm1, %v992_v63 }
  0x4f   : > { %1982 = vmatpush3.bf16.msra.mxu1 %v1969_v60  ;;  %1841 = vmatprep.mubr.msk.f32.mxu1 %vm2045_vm0, %v2046_v10 }
  0x50   : > { %1817 = vmatmul.mubr.msk.f32.gmra.mrb[22].mxu0 %vm238_vm1, %v883_v0  ;;  %1979 = vmatprep.subr.bf16.mxu1 %v2044_v3 }
  0x51   : > { %1973 = vmatpush3.bf16.msra.mxu0 %v1972_v1  ;;  %1860 = vmatprep.mubr.msk.f32.mxu0 %vm2045_vm0, %v2046_v10 }
  0x52   : > { %1974 = vmatprep.subr.bf16.mxu0 %v2044_v3  ;;  %1842 = vmatmul.mubr.msk.f32.gmra.mrb[22].mxu1 %vm238_vm1, %v993_v5 }
  0x53   : > { %1983 = vmatpush3.bf16.msra.mxu1 %v1972_v1  ;;  %1863 = vmatprep.mubr.msk.f32.mxu1 %vm2045_vm0, %v2046_v10 }
  0x54   : > { %1980 = vmatprep.subr.bf16.mxu1 %v2044_v3 }
  0x55   : > { %1976 = vmatpush3.bf16.msra.mxu0 %v1975_v6 }
  0x57   : > { %1984 = vmatpush3.bf16.msra.mxu1 %v1975_v6 }
  0x58   : > { %1861 = vmatmul.mubr.msk.f32.vlgmr.msra.gmra.mrb[24].mxu0 %vm238_vm1, %v2288_v9 }
  0x5a   : > { %1864 = vmatmul.mubr.msk.f32.vlgmr.msra.gmra.mrb[24].mxu1 %vm238_vm1, %v2313_v18 }
  0x5b   : > { %1866 = vmatprep.mubr.msk.f32.mxu1 %vm2045_vm0, %v2046_v10 }
  0x5e   : > { %1867 = vmatmul.mubr.msk.f32.gmra.mrb[26].mxu1 %vm238_vm1, %v1103_v7 }
  0xeb   : > { %v314_v8 = vpop.f32.mrb[0].mxu0 }
  0xec   : > { %328 = vst.msk [vmem:[#allocation2] sm:$0xff] %vm238_vm1, %v314_v8  ;;  %v1662_v11 = vpop.f32.mrb[1].mxu0 }
  0xed   : > { %v418_v12 = vpop.f32.mrb[0].mxu1 }
  0xee   : > { %v1687_v3 = vpop.f32.mrb[1].mxu1 }
  0xef   : > { %v319_v13 = vpop.f32.mrb[2].mxu0 }
  0xf0   : > { %329 = vst.msk [vmem:[#allocation2 + $0x8] sm:$0xff] %vm238_vm1, %v319_v13  ;;  %v1665_v14 = vpop.f32.mrb[3].mxu0 }
  0xf1   : > { %v423_v9 = vpop.f32.mrb[2].mxu1 }
  0xf2   : > { %v1690_v15 = vpop.f32.mrb[3].mxu1 }
  0xf3   : > { %v432_v16 = vld [vmem:[#allocation2] sm:$0xff]  ;;  %v324_v17 = vpop.f32.mrb[4].mxu0 }
  0xf4   : > { %v435_v18 = vadd.f32 %v432_v16, %v418_v12  ;;  %330 = vst.msk [vmem:[#allocation2 + $0x10] sm:$0xff] %vm238_vm1, %v324_v17  ;;  %v1668_v10 = vpop.f32.mrb[5].mxu0  ;;  %v1217_v12 = vlaneseq }
  0xf5   : > { %v428_v19 = vpop.f32.mrb[4].mxu1 }
  0xf6   : > { %438 = vst.msk [vmem:[#allocation2] sm:$0xff] %vm238_vm1, %v435_v18  ;;  %v1693_v20 = vpop.f32.mrb[5].mxu1  ;;  %v1218_v17 = vshrl.u32 %v1217_v12, 7 }
  0xf7   : > { %v433_v21 = vld [vmem:[#allocation2 + $0x8] sm:$0xff] }
  0xf8   : > { %v436_v22 = vadd.f32 %v433_v21, %v423_v9  ;;  %v1219_v21 = vadd.s32 8, %v1218_v17 }
  0xfa   : > { %439 = vst.msk [vmem:[#allocation2 + $0x8] sm:$0xff] %vm238_vm1, %v436_v22 }
  0xfb   : > { %v434_v23 = vld [vmem:[#allocation2 + $0x10] sm:$0xff]  ;;  %v528_v24 = vpop.f32.mrb[6].mxu0 }
  0xfc   : > { %v437_v25 = vadd.f32 %v434_v23, %v428_v19  ;;  %v1712_v26 = vpop.f32.mrb[7].mxu0 }
  0xfd   : > { %v542_v27 = vld [vmem:[#allocation2] sm:$0xff]  ;;  %v638_v28 = vpop.f32.mrb[6].mxu1 }
  0xfe   : > { %440 = vst.msk [vmem:[#allocation2 + $0x10] sm:$0xff] %vm238_vm1, %v437_v25  ;;  %v545_v29 = vadd.f32 %v542_v27, %v528_v24  ;;  %v1737_v30 = vpop.f32.mrb[7].mxu1  ;;  %v2493_v26 = vmul.u32.u64.low 2863311531, %v1218_v17  ;;  %v2494_v27 = vmul.u32.u64.high 2863311531, %v1218_v17, %v2493_v26 }
  0xff   : > { %v533_v31 = vpop.f32.mrb[8].mxu0  ;;  %v1220_v30 = vadd.s32 16, %v1218_v17 }
 0x100   : > { %548 = vst.msk [vmem:[#allocation2] sm:$0xff] %vm238_vm1, %v545_v29  ;;  %v1715_v32 = vpop.f32.mrb[9].mxu0 }
 0x101   : > { %v543_v33 = vld [vmem:[#allocation2 + $0x8] sm:$0xff]  ;;  %v643_v34 = vpop.f32.mrb[8].mxu1 }
 0x102   : > { %v546_v35 = vadd.f32 %v543_v33, %v533_v31  ;;  %v1740_v36 = vpop.f32.mrb[9].mxu1 }
 0x103   : > { %v538_v37 = vpop.f32.mrb[10].mxu0 }
 0x104   : > { %549 = vst.msk [vmem:[#allocation2 + $0x8] sm:$0xff] %vm238_vm1, %v546_v35  ;;  %v1718_v39 = vpop.f32.mrb[11].mxu0  ;;  %v2501_v35 = vmul.u32.u64.low 2863311531, %v1220_v30  ;;  %v2502_v36 = vmul.u32.u64.high 2863311531, %v1220_v30, %v2501_v35 }
 0x105   : > { %v544_v40 = vld [vmem:[#allocation2 + $0x10] sm:$0xff]  ;;  %v648_v38 = vpop.f32.mrb[10].mxu1 }
 0x106   : > { %v547_v41 = vadd.f32 %v544_v40, %v538_v37  ;;  %v1743_v42 = vpop.f32.mrb[11].mxu1 }
 0x107   : > { %v652_v43 = vld [vmem:[#allocation2] sm:$0xff] }
 0x108   : > { %550 = vst.msk [vmem:[#allocation2 + $0x10] sm:$0xff] %vm238_vm1, %v547_v41  ;;  %v655_v44 = vadd.f32 %v652_v43, %v638_v28  ;;  %v2497_v28 = vmul.u32.u64.low 2863311531, %v1219_v21  ;;  %v2498_v29 = vmul.u32.u64.high 2863311531, %v1219_v21, %v2497_v28 }
 0x10a   : > { %658 = vst.msk [vmem:[#allocation2] sm:$0xff] %vm238_vm1, %v655_v44  ;;  %v1238_v44 = vshrl.u32 %v2498_v29, 2 }
 0x10b   : > { %v653_v45 = vld [vmem:[#allocation2 + $0x8] sm:$0xff]  ;;  %v748_v47 = vpop.f32.mrb[12].mxu0 }
 0x10c   : > { %v656_v48 = vadd.f32 %v653_v45, %v643_v34  ;;  %v1762_v46 = vpop.f32.mrb[13].mxu0 }
 0x10d   : > { %v858_v49 = vpop.f32.mrb[12].mxu1 }
 0x10e   : > { %659 = vst.msk [vmem:[#allocation2 + $0x8] sm:$0xff] %vm238_vm1, %v656_v48  ;;  %v1787_v50 = vpop.f32.mrb[13].mxu1 }
 0x10f   : > { %v654_v51 = vld [vmem:[#allocation2 + $0x10] sm:$0xff]  ;;  %v753_v52 = vpop.f32.mrb[14].mxu0  ;;  %v1239_v50 = vmul.u32 6, %v1238_v44 }
 0x110   : > { %v657_v53 = vadd.f32 %v654_v51, %v648_v38  ;;  %v1765_v54 = vpop.f32.mrb[15].mxu0  ;;  %v1227_v38 = vshrl.u32 %v2494_v27, 2  ;;  %v1249_v51 = vshrl.u32 %v2502_v36, 2 }
 0x111   : > { %v762_v55 = vld [vmem:[#allocation2] sm:$0xff]  ;;  %v863_v56 = vpop.f32.mrb[14].mxu1 }
 0x112   : > { %660 = vst.msk [vmem:[#allocation2 + $0x10] sm:$0xff] %vm238_vm1, %v657_v53  ;;  %v765_v57 = vadd.f32 %v762_v55, %v748_v47  ;;  %v1790_v58 = vpop.f32.mrb[15].mxu1  ;;  %v1228_v47 = vmul.u32 6, %v1227_v38  ;;  %v1240_v55 = vsub.s32 %v1219_v21, %v1239_v50 }
 0x113   : > { %v758_v59 = vpop.f32.mrb[16].mxu0 }
 0x114   : > { %768 = vst.msk [vmem:[#allocation2] sm:$0xff] %vm238_vm1, %v765_v57  ;;  %v1768_v60 = vpop.f32.mrb[17].mxu0  ;;  %vm1255_vm4 = vcmp.ne.s32.totalorder %v1240_v55, 0  ;;  %vm1258_vm5 = vcmp.lt.s32.totalorder %v1240_v55, 0 }
 0x115   : > { %v763_v61 = vld [vmem:[#allocation2 + $0x8] sm:$0xff]  ;;  %v868_v62 = vpop.f32.mrb[16].mxu1  ;;  %vm1261_vm7 = vmand %vm1258_vm5, %vm1255_vm4 }
 0x116   : > { %v766_v63 = vadd.f32 %v763_v61, %v753_v52  ;;  %v1793_v0 = vpop.f32.mrb[17].mxu1  ;;  %v1229_v52 = vsub.s32 %v1218_v17, %v1228_v47 }
 0x118   : > { %769 = vst.msk [vmem:[#allocation2 + $0x8] sm:$0xff] %vm238_vm1, %v766_v63  ;;  %vm1254_vm2 = vcmp.ne.s32.totalorder %v1229_v52, 0  ;;  %vm1257_vm3 = vcmp.lt.s32.totalorder %v1229_v52, 0  ;;  %v1264_v63 = vadd.s32 6, %v1240_v55 }
 0x119   : > { %v764_v1 = vld [vmem:[#allocation2 + $0x10] sm:$0xff]  ;;  %vm1260_vm6 = vmand %vm1257_vm3, %vm1254_vm2 }
 0x11a   : > { %v767_v2 = vadd.f32 %v764_v1, %v758_v59  ;;  %v1263_v59 = vadd.s32 6, %v1229_v52 }
 0x11b   : > { %v872_v4 = vld [vmem:[#allocation2] sm:$0xff]  ;;  %v968_v5 = vpop.f32.mrb[18].mxu0 }
 0x11c   : > { %770 = vst.msk [vmem:[#allocation2 + $0x10] sm:$0xff] %vm238_vm1, %v767_v2  ;;  %v875_v6 = vadd.f32 %v872_v4, %v858_v49  ;;  %v1812_v7 = vpop.f32.mrb[19].mxu0  ;;  %v1266_v0 = vsel %vm1260_vm6, %v1263_v59, %v1229_v52  ;;  %v1267_v2 = vsel %vm1261_vm7, %v1264_v63, %v1240_v55 }
 0x11d   : > { %v1078_v8 = vpop.f32.mrb[18].mxu1  ;;  %vm1269_vm10 = vcmp.lt.s32.totalorder %v1266_v0, 4  ;;  %vm1270_vm12 = vcmp.lt.s32.totalorder %v1267_v2, 4 }
 0x11e   : > { %878 = vst.msk [vmem:[#allocation2] sm:$0xff] %vm238_vm1, %v875_v6  ;;  %v1837_v11 = vpop.f32.mrb[19].mxu1 }
 0x11f   : > { %v873_v3 = vld [vmem:[#allocation2 + $0x8] sm:$0xff]  ;;  %v973_v13 = vpop.f32.mrb[20].mxu0 }
 0x120   : > { %v876_v14 = vadd.f32 %v873_v3, %v863_v56  ;;  %v1815_v9 = vpop.f32.mrb[21].mxu0  ;;  %v1250_v56 = vmul.u32 6, %v1249_v51 }
 0x121   : > { %v1083_v15 = vpop.f32.mrb[20].mxu1 }
 0x122   : > { %879 = vst.msk [vmem:[#allocation2 + $0x8] sm:$0xff] %vm238_vm1, %v876_v14  ;;  %v1840_v16 = vpop.f32.mrb[21].mxu1  ;;  %v1251_v60 = vsub.s32 %v1220_v30, %v1250_v56 }
 0x123   : > { %v874_v18 = vld [vmem:[#allocation2 + $0x10] sm:$0xff]  ;;  %v978_v10 = vpop.f32.mrb[22].mxu0 }
 0x124   : > { %v877_v19 = vadd.f32 %v874_v18, %v868_v62  ;;  %v1818_v20 = vpop.f32.mrb[23].mxu0  ;;  %vm1256_vm8 = vcmp.ne.s32.totalorder %v1251_v60, 0  ;;  %vm1259_vm9 = vcmp.lt.s32.totalorder %v1251_v60, 0 }
 0x125   : > { %v982_v22 = vld [vmem:[#allocation2] sm:$0xff]  ;;  %v1088_v23 = vpop.f32.mrb[22].mxu1  ;;  %vm1262_vm11 = vmand %vm1259_vm9, %vm1256_vm8 }
 0x126   : > { %880 = vst.msk [vmem:[#allocation2 + $0x10] sm:$0xff] %vm238_vm1, %v877_v19  ;;  %v985_v24 = vadd.f32 %v982_v22, %v968_v5  ;;  %v1843_v25 = vpop.f32.mrb[23].mxu1  ;;  %v1265_v5 = vadd.s32 6, %v1251_v60 }
 0x128   : > { %988 = vst.msk [vmem:[#allocation2] sm:$0xff] %vm238_vm1, %v985_v24 }
 0x129   : > { %v983_v31 = vld [vmem:[#allocation2 + $0x8] sm:$0xff] }
 0x12a   : > { %v986_v32 = vadd.f32 %v983_v31, %v973_v13 }
 0x12b   : > { %v1188_v33 = vpop.f32.mrb[24].mxu0 }
 0x12c   : > { %989 = vst.msk [vmem:[#allocation2 + $0x8] sm:$0xff] %vm238_vm1, %v986_v32  ;;  %v1862_v34 = vpop.f32.mrb[25].mxu0 }
 0x12d   : > { %v984_v37 = vld [vmem:[#allocation2 + $0x10] sm:$0xff]  ;;  %v1193_v39 = vpop.f32.mrb[24].mxu1 }
 0x12e   : > { %v987_v40 = vadd.f32 %v984_v37, %v978_v10  ;;  %v1865_v41 = vpop.f32.mrb[25].mxu1 }
 0x12f   : > { %v1092_v42 = vld [vmem:[#allocation2] sm:$0xff] }
 0x130   : > { %990 = vst.msk [vmem:[#allocation2 + $0x10] sm:$0xff] %vm238_vm1, %v987_v40  ;;  %v1095_v43 = vadd.f32 %v1092_v42, %v1078_v8  ;;  %v1268_v8 = vsel %vm1262_vm11, %v1265_v5, %v1251_v60 }
 0x131   : > { %v1198_v45 = vpop.f32.mrb[26].mxu1  ;;  %vm1271_vm13 = vcmp.lt.s32.totalorder %v1268_v8, 4 }
 0x132   : > { %1098 = vst.msk [vmem:[#allocation2] sm:$0xff] %vm238_vm1, %v1095_v43  ;;  %v1868_v48 = vpop.f32.mrb[27].mxu1 }
 0x133   : > { %v1093_v46 = vld [vmem:[#allocation2 + $0x8] sm:$0xff] }
 0x134   : > { %v1096_v49 = vadd.f32 %v1093_v46, %v1083_v15 }
 0x136   : > { %1099 = vst.msk [vmem:[#allocation2 + $0x8] sm:$0xff] %vm238_vm1, %v1096_v49 }
 0x137   : > { %v1094_v53 = vld [vmem:[#allocation2 + $0x10] sm:$0xff] }
 0x138   : > { %v1097_v54 = vadd.f32 %v1094_v53, %v1088_v23 }
 0x139   : > { %v1202_v57 = vld [vmem:[#allocation2] sm:$0xff] }
 0x13a   : > { %1100 = vst.msk [vmem:[#allocation2 + $0x10] sm:$0xff] %vm238_vm1, %v1097_v54  ;;  %v1205_v58 = vadd.f32 %v1202_v57, %v1188_v33 }
 0x13c   : > { %1208 = vst.msk [vmem:[#allocation2] sm:$0xff] %vm238_vm1, %v1205_v58 }
 0x13d   : > { %v1203_v61 = vld [vmem:[#allocation2 + $0x8] sm:$0xff] }
 0x13e   : > { %v1206_v62 = vadd.f32 %v1203_v61, %v1193_v39 }
 0x140   : > { %1209 = vst.msk [vmem:[#allocation2 + $0x8] sm:$0xff] %vm238_vm1, %v1206_v62 }
 0x141   : > { %v1204_v1 = vld [vmem:[#allocation2 + $0x10] sm:$0xff] }
 0x142   : > { %v1207_v4 = vadd.f32 %v1204_v1, %v1198_v45 }
 0x143   : > { %v1211_v6 = vld [vmem:[#allocation2] sm:$0xff] }
 0x144   : > { %1214 = vst.msk [vmem:[%s219_s6] sm:$0xff] %vm238_vm1, %v1211_v6  ;;  %1210 = vst.msk [vmem:[#allocation2 + $0x10] sm:$0xff] %vm238_vm1, %v1207_v4  ;;  %v1278_v7 = vsel %vm1269_vm10, %v1211_v6, 0.0 }
 0x145   : > { %v1294_v3 = vmul.f32 %v1278_v7, %v1278_v7  ;;  %v1281_v9 = vsel %vm238_vm1, %v1278_v7, 0.0 }
 0x147   : > { %v1212_v11 = vld [vmem:[#allocation2 + $0x8] sm:$0xff]  ;;  %v1297_v10 = vsel %vm238_vm1, %v1294_v3, 0.0 }
 0x148   : > { %1215 = vst.msk [vmem:[%s219_s6 + $0x8] sm:$0xff] %vm238_vm1, %v1212_v11  ;;  %v1279_v12 = vsel %vm1270_vm12, %v1212_v11, 0.0 }
 0x149   : > { %v1282_v13 = vsel %vm238_vm1, %v1279_v12, 0.0  ;;  %v1295_v14 = vmul.f32 %v1279_v12, %v1279_v12 }
 0x14a   : > { %v1283_v17 = vadd.f32 %v1282_v13, %v1281_v9 }
 0x14b   : > { %v1298_v15 = vsel %vm238_vm1, %v1295_v14, 0.0  ;;  %v1213_v16 = vld [vmem:[#allocation2 + $0x10] sm:$0xff] }
 0x14c   : > { %1216 = vst.msk [vmem:[%s219_s6 + $0x10] sm:$0xff] %vm238_vm1, %v1213_v16  ;;  %v1280_v18 = vsel %vm1271_vm13, %v1213_v16, 0.0  ;;  %v1299_v21 = vadd.f32 %v1298_v15, %v1297_v10 }
 0x14d   : > { %v1284_v19 = vsel %vm238_vm1, %v1280_v18, 0.0  ;;  %v1296_v20 = vmul.f32 %v1280_v18, %v1280_v18 }
 0x14e   : > { %v1285_v22 = vadd.f32 %v1284_v19, %v1283_v17 }
 0x14f   : > { %v1300_v23 = vsel %vm238_vm1, %v1296_v20, 0.0 }
 0x150   : > { %v1286_v24 = vrot.slane %v1285_v22, 4  ;;  %v1301_v25 = vadd.f32 %v1300_v23, %v1299_v21 }
 0x152   : > { %v1287_v26 = vadd.f32 %v1286_v24, %v1285_v22  ;;  %v1302_v27 = vrot.slane %v1301_v25, 4 }
 0x154   : > { %v1288_v28 = vrot.slane %v1287_v26, 2  ;;  %v1303_v29 = vadd.f32 %v1302_v27, %v1301_v25 }
 0x156   : > { %v1289_v30 = vadd.f32 %v1288_v28, %v1287_v26  ;;  %v1304_v31 = vrot.slane %v1303_v29, 2 }
 0x158   : > { %v1290_v32 = vrot.slane %v1289_v30, 1  ;;  %v1305_v33 = vadd.f32 %v1304_v31, %v1303_v29 }
 0x15a   : > { %v1291_v34 = vadd.f32 %v1290_v32, %v1289_v30  ;;  %v1306_v35 = vrot.slane %v1305_v33, 1 }
 0x15c   : > { %1293 = vst.msk [vmem:[%s226_s10] sm:$0x1] %vm1292_vm14, %v1291_v34  ;;  %v1307_v36 = vadd.f32 %v1306_v35, %v1305_v33 }
 0x15e   : > { %1308 = vst.msk [vmem:[%s226_s10 + $0x1] sm:$0x1] %vm1292_vm14, %v1307_v36 }
 0x15f PF: > { %s14_s14 = sadd.s32 1, %s2042_s14   ;;  %s2544_s12 = smov %s2038_s13 }
 0x160   : > { %p11_p5 = scmp.ge.s32.totalorder %s14_s14, 6   ;;  %s2545_s13 = smov %s2547_s15 }
 0x162   :  { %13 = sbr.rel (!%p11_p5) target bundleno = 2 (0x2), region = 81 }

// kernel: tanet_forward.47
= control target key start
LH: loop header
LB: loop body
LE: loop exit
PB: predicated region body
PF: predicated region fallthrough
CT: control target
= control target key end

     0   :  { %v35_v0 = vlaneseq  ;;  %s372_s1 = inlined_call_operand.vmem [shape: f32[1,256], index: 1, kind: input, shape index: {}]   ;;  %s373_s2 = inlined_call_operand.vmem [shape: f32[1,256], index: 2, kind: input, shape index: {}]   ;;  %s374_s0 = inlined_call_operand.vmem [shape: f32[64,256], index: 0, kind: input, shape index: {}]   ;;  %s375_s3 = inlined_call_operand.vmem [shape: f32[64,256], index: 3, kind: input, shape index: {}]   ;;  %s376_s4 = inlined_call_operand.vmem [shape: f32[64,256], index: 4, kind: output, shape index: {}]  }
   0x1   :  { %v33_v2 = vld [vmem:[%s372_s1] sm:$0x3]  ;;  %v18_v6 = vld [vmem:[%s374_s0 + $0x8] sm:$0xff]  ;;  %v19_v8 = vld [vmem:[%s374_s0 + $0x10] sm:$0xff] }
   0x2   :  { %v36_v1 = vshrl.u32 %v35_v0, 7  ;;  %v61_v3 = vld [vmem:[%s373_s2] sm:$0x3]  ;;  %v20_v9 = vld [vmem:[%s374_s0 + $0x18] sm:$0xff]  ;;  %v22_v15 = vld [vmem:[%s374_s0 + $0x28] sm:$0xff] }
   0x3   :  { %v17_v4 = vld [vmem:[%s374_s0] sm:$0xff]  ;;  %v23_v16 = vld [vmem:[%s374_s0 + $0x30] sm:$0xff]  ;;  %v24_v17 = vld [vmem:[%s374_s0 + $0x38] sm:$0xff] }
   0x4   :  { %v37_v5 = vsub.s32 0, %v36_v1  ;;  %v41_v7 = vsub.s32 1, %v36_v1  ;;  %v21_v10 = vld [vmem:[%s374_s0 + $0x20] sm:$0xff]  ;;  %v90_v21 = vld [vmem:[%s375_s3 + $0x8] sm:$0xff]  ;;  %v91_v24 = vld [vmem:[%s375_s3 + $0x10] sm:$0xff] }
   0x5   :  { %v89_v19 = vld [vmem:[%s375_s3] sm:$0xff]  ;;  %v92_v25 = vld [vmem:[%s375_s3 + $0x18] sm:$0xff]  ;;  %v94_v35 = vld [vmem:[%s375_s3 + $0x28] sm:$0xff] }
   0x6   :  { %v203_v11 = vrot.slane %v33_v2, %v37_v5  ;;  %v205_v12 = vrot.slane %v61_v3, %v37_v5  ;;  %v207_v13 = vrot.slane %v33_v2, %v41_v7  ;;  %v209_v14 = vrot.slane %v61_v3, %v41_v7  ;;  %v93_v27 = vld [vmem:[%s375_s3 + $0x20] sm:$0xff]  ;;  %v95_v36 = vld [vmem:[%s375_s3 + $0x30] sm:$0xff]  ;;  %v96_v37 = vld [vmem:[%s375_s3 + $0x38] sm:$0xff] }
   0x7   :  { %v25_v46 = vld [vmem:[%s374_s0 + $0x40] sm:$0xff]  ;;  %v26_v47 = vld [vmem:[%s374_s0 + $0x48] sm:$0xff]  ;;  %v27_v48 = vld [vmem:[%s374_s0 + $0x50] sm:$0xff] }
   0x8   :  { %v45_v18 = vmul.f32 %v203_v11, %v17_v4  ;;  %v46_v20 = vmul.f32 %v207_v13, %v18_v6  ;;  %v47_v22 = vmul.f32 %v203_v11, %v19_v8  ;;  %v48_v23 = vmul.f32 %v207_v13, %v20_v9  ;;  %v28_v53 = vld [vmem:[%s374_s0 + $0x58] sm:$0xff]  ;;  %v29_v54 = vld [vmem:[%s374_s0 + $0x60] sm:$0xff]  ;;  %v30_v55 = vld [vmem:[%s374_s0 + $0x68] sm:$0xff] }
   0x9   :  { %v49_v26 = vmul.f32 %v203_v11, %v21_v10  ;;  %v50_v28 = vmul.f32 %v207_v13, %v22_v15  ;;  %v51_v29 = vmul.f32 %v203_v11, %v23_v16  ;;  %v52_v30 = vmul.f32 %v207_v13, %v24_v17  ;;  %v31_v60 = vld [vmem:[%s374_s0 + $0x70] sm:$0xff]  ;;  %v32_v61 = vld [vmem:[%s374_s0 + $0x78] sm:$0xff]  ;;  %v97_v3 = vld [vmem:[%s375_s3 + $0x40] sm:$0xff] }
   0xa   :  { %v73_v31 = vadd.f32 %v205_v12, %v45_v18  ;;  %v74_v32 = vadd.f32 %v209_v14, %v46_v20  ;;  %v75_v33 = vadd.f32 %v205_v12, %v47_v22  ;;  %v76_v34 = vadd.f32 %v209_v14, %v48_v23  ;;  %v98_v5 = vld [vmem:[%s375_s3 + $0x48] sm:$0xff]  ;;  %v99_v8 = vld [vmem:[%s375_s3 + $0x50] sm:$0xff]  ;;  %v100_v9 = vld [vmem:[%s375_s3 + $0x58] sm:$0xff] }
   0xb   :  { %v77_v38 = vadd.f32 %v205_v12, %v49_v26  ;;  %v78_v39 = vadd.f32 %v209_v14, %v50_v28  ;;  %v79_v40 = vadd.f32 %v205_v12, %v51_v29  ;;  %v80_v41 = vadd.f32 %v209_v14, %v52_v30  ;;  %v101_v15 = vld [vmem:[%s375_s3 + $0x60] sm:$0xff]  ;;  %v102_v23 = vld [vmem:[%s375_s3 + $0x68] sm:$0xff] }
   0xc   :  { %v105_v42 = vadd.f32 %v89_v19, %v73_v31  ;;  %v106_v43 = vadd.f32 %v90_v21, %v74_v32  ;;  %v107_v44 = vadd.f32 %v91_v24, %v75_v33  ;;  %v108_v45 = vadd.f32 %v92_v25, %v76_v34  ;;  %v103_v24 = vld [vmem:[%s375_s3 + $0x70] sm:$0xff] }
   0xd   :  { %v109_v49 = vadd.f32 %v93_v27, %v77_v38  ;;  %v110_v50 = vadd.f32 %v94_v35, %v78_v39  ;;  %v111_v51 = vadd.f32 %v95_v36, %v79_v40  ;;  %v112_v52 = vadd.f32 %v96_v37, %v80_v41 }
   0xe   :  { %v121_v56 = vmax.f32 %v105_v42, 0.0  ;;  %v122_v57 = vmax.f32 %v106_v43, 0.0  ;;  %v123_v58 = vmax.f32 %v107_v44, 0.0  ;;  %v124_v59 = vmax.f32 %v108_v45, 0.0 }
   0xf   :  { %v125_v62 = vmax.f32 %v109_v49, 0.0  ;;  %v126_v63 = vmax.f32 %v110_v50, 0.0  ;;  %v127_v0 = vmax.f32 %v111_v51, 0.0  ;;  %v128_v1 = vmax.f32 %v112_v52, 0.0 }
  0x10   :  { %137 = vst [vmem:[%s376_s4] sm:$0xff] %v121_v56  ;;  %138 = vst [vmem:[%s376_s4 + $0x8] sm:$0xff] %v122_v57  ;;  %v53_v2 = vmul.f32 %v203_v11, %v25_v46  ;;  %v54_v4 = vmul.f32 %v207_v13, %v26_v47  ;;  %v55_v6 = vmul.f32 %v203_v11, %v27_v48 }
  0x11   :  { %139 = vst [vmem:[%s376_s4 + $0x10] sm:$0xff] %v123_v58  ;;  %140 = vst [vmem:[%s376_s4 + $0x18] sm:$0xff] %v124_v59  ;;  %v56_v7 = vmul.f32 %v207_v13, %v28_v53  ;;  %v57_v10 = vmul.f32 %v203_v11, %v29_v54  ;;  %v58_v16 = vmul.f32 %v207_v13, %v30_v55 }
  0x12   :  { %141 = vst [vmem:[%s376_s4 + $0x20] sm:$0xff] %v125_v62  ;;  %142 = vst [vmem:[%s376_s4 + $0x28] sm:$0xff] %v126_v63  ;;  %v59_v17 = vmul.f32 %v203_v11, %v31_v60  ;;  %v60_v18 = vmul.f32 %v207_v13, %v32_v61  ;;  %v81_v19 = vadd.f32 %v205_v12, %v53_v2  ;;  %v104_v11 = vld [vmem:[%s375_s3 + $0x78] sm:$0xff] }
  0x13   :  { %143 = vst [vmem:[%s376_s4 + $0x30] sm:$0xff] %v127_v0  ;;  %144 = vst [vmem:[%s376_s4 + $0x38] sm:$0xff] %v128_v1  ;;  %v82_v20 = vadd.f32 %v209_v14, %v54_v4  ;;  %v83_v21 = vadd.f32 %v205_v12, %v55_v6  ;;  %v84_v22 = vadd.f32 %v209_v14, %v56_v7 }
  0x14   :  { %v85_v13 = vadd.f32 %v205_v12, %v57_v10  ;;  %v86_v25 = vadd.f32 %v209_v14, %v58_v16  ;;  %v87_v26 = vadd.f32 %v205_v12, %v59_v17  ;;  %v88_v27 = vadd.f32 %v209_v14, %v60_v18 }
  0x15   :  { %v113_v28 = vadd.f32 %v97_v3, %v81_v19  ;;  %v114_v29 = vadd.f32 %v98_v5, %v82_v20  ;;  %v115_v30 = vadd.f32 %v99_v8, %v83_v21  ;;  %v116_v31 = vadd.f32 %v100_v9, %v84_v22 }
  0x16   :  { %v117_v32 = vadd.f32 %v101_v15, %v85_v13  ;;  %v118_v33 = vadd.f32 %v102_v23, %v86_v25  ;;  %v119_v34 = vadd.f32 %v103_v24, %v87_v26  ;;  %v120_v35 = vadd.f32 %v104_v11, %v88_v27 }
  0x17   :  { %v129_v36 = vmax.f32 %v113_v28, 0.0  ;;  %v130_v37 = vmax.f32 %v114_v29, 0.0  ;;  %v131_v38 = vmax.f32 %v115_v30, 0.0  ;;  %v132_v39 = vmax.f32 %v116_v31, 0.0 }
  0x18   :  { %v133_v40 = vmax.f32 %v117_v32, 0.0  ;;  %v134_v41 = vmax.f32 %v118_v33, 0.0  ;;  %v135_v42 = vmax.f32 %v119_v34, 0.0  ;;  %v136_v43 = vmax.f32 %v120_v35, 0.0 }
  0x19   :  { %145 = vst [vmem:[%s376_s4 + $0x40] sm:$0xff] %v129_v36  ;;  %146 = vst [vmem:[%s376_s4 + $0x48] sm:$0xff] %v130_v37 }
  0x1a   :  { %147 = vst [vmem:[%s376_s4 + $0x50] sm:$0xff] %v131_v38  ;;  %148 = vst [vmem:[%s376_s4 + $0x58] sm:$0xff] %v132_v39 }
  0x1b   :  { %149 = vst [vmem:[%s376_s4 + $0x60] sm:$0xff] %v133_v40  ;;  %150 = vst [vmem:[%s376_s4 + $0x68] sm:$0xff] %v134_v41 }
  0x1c   :  { %151 = vst [vmem:[%s376_s4 + $0x70] sm:$0xff] %v135_v42  ;;  %152 = vst [vmem:[%s376_s4 + $0x78] sm:$0xff] %v136_v43 }

// kernel: tanet_forward.40
= control target key start
LH: loop header
LB: loop body
LE: loop exit
PB: predicated region body
PF: predicated region fallthrough
CT: control target
= control target key end

     0   :  { %vm17_vm0 = vcmask 523264   ;;  %vm244_vm1 = vcmask 516096   ;;  %s624_s1 = inlined_call_operand.vmem [shape: f32[256,64], index: 1, kind: input, shape index: {}]   ;;  %s625_s0 = inlined_call_operand.vmem [shape: f32[64,256], index: 0, kind: input, shape index: {}]   ;;  %s626_s2 = inlined_call_operand.vmem [shape: f32[64,64], index: 2, kind: output, shape index: {0}]   ;;  %s627_s3 = inlined_call_operand.vmem [shape: f32[1,2,64], index: 3, kind: output, shape index: {1}]  }
   0x1   :  { %v66_v0 = vld [vmem:[%s624_s1 + $0x80] sm:$0xff]  ;;  %v67_v1 = vld [vmem:[%s624_s1 + $0x88] sm:$0xff]  ;;  %v68_v5 = vld [vmem:[%s624_s1 + $0x90] sm:$0xff] }
   0x2   :  { %v50_v2 = vld [vmem:[%s624_s1] sm:$0xff]  ;;  %v340_v3 = vpack.c.bf16 %v67_v1, %v66_v0  ;;  %v51_v4 = vld [vmem:[%s624_s1 + $0x8] sm:$0xff]  ;;  %v69_v6 = vld [vmem:[%s624_s1 + $0x98] sm:$0xff]  ;;  %v389_v0 = vmov 0.0  }
   0x3   :  { %v342_v7 = vpack.c.bf16 %v51_v4, %v50_v2  ;;  %v344_v8 = vpack.c.bf16 %v69_v6, %v68_v5  ;;  %v52_v9 = vld [vmem:[%s624_s1 + $0x10] sm:$0xff]  ;;  %v53_v10 = vld [vmem:[%s624_s1 + $0x18] sm:$0xff]  ;;  %v70_v11 = vld [vmem:[%s624_s1 + $0xa0] sm:$0xff]  ;;  %18 = vst.msk [vmem:[#allocation2] sm:$0xff] %vm17_vm0, %v389_v0 }
   0x4   :  { %341 = vmatprep.subr.bf16.mxu0 %v340_v3  ;;  %372 = vmatprep.subr.bf16.mxu1 %v340_v3  ;;  %v71_v12 = vld [vmem:[%s624_s1 + $0xa8] sm:$0xff]  ;;  %v346_v13 = vpack.c.bf16 %v53_v10, %v52_v9  ;;  %v54_v15 = vld [vmem:[%s624_s1 + $0x20] sm:$0xff]  ;;  %v72_v17 = vld [vmem:[%s624_s1 + $0xb0] sm:$0xff]  ;;  %19 = vst.msk [vmem:[#allocation2 + $0x8] sm:$0xff] %vm17_vm0, %v389_v0 }
   0x5   :  { %343 = vmatpush3.bf16.msra.mxu0 %v342_v7  ;;  %380 = vmatpush3.bf16.msra.mxu1 %v342_v7  ;;  %v348_v14 = vpack.c.bf16 %v71_v12, %v70_v11  ;;  %v55_v16 = vld [vmem:[%s624_s1 + $0x28] sm:$0xff]  ;;  %v73_v18 = vld [vmem:[%s624_s1 + $0xb8] sm:$0xff]  ;;  %v56_v21 = vld [vmem:[%s624_s1 + $0x30] sm:$0xff]  ;;  %20 = vst.msk [vmem:[#allocation2 + $0x10] sm:$0xff] %vm17_vm0, %v389_v0 }
   0x6   :  { %345 = vmatprep.subr.bf16.mxu0 %v344_v8  ;;  %373 = vmatprep.subr.bf16.mxu1 %v344_v8  ;;  %v350_v19 = vpack.c.bf16 %v55_v16, %v54_v15  ;;  %v352_v20 = vpack.c.bf16 %v73_v18, %v72_v17  ;;  %v57_v22 = vld [vmem:[%s624_s1 + $0x38] sm:$0xff]  ;;  %v74_v23 = vld [vmem:[%s624_s1 + $0xc0] sm:$0xff]  ;;  %v75_v24 = vld [vmem:[%s624_s1 + $0xc8] sm:$0xff]  ;;  %21 = vst.msk [vmem:[#allocation2 + $0x18] sm:$0xff] %vm17_vm0, %v389_v0 }
   0x7   :  { %v35_v25 = vld [vmem:[%s625_s0 + $0x8] sm:$0xff]  ;;  %v354_v26 = vpack.c.bf16 %v57_v22, %v56_v21  ;;  %v356_v28 = vpack.c.bf16 %v75_v24, %v74_v23  ;;  %v58_v29 = vld [vmem:[%s624_s1 + $0x40] sm:$0xff]  ;;  %v76_v31 = vld [vmem:[%s624_s1 + $0xd0] sm:$0xff]  ;;  %22 = vst.msk [vmem:[#allocation2 + $0x20] sm:$0xff] %vm17_vm0, %v389_v0 }
   0x8   :  { %146 = vmatprep.mubr.f32.mxu0 %v35_v25  ;;  %v43_v27 = vld [vmem:[%s625_s0 + $0x48] sm:$0xff]  ;;  %v77_v32 = vld [vmem:[%s624_s1 + $0xd8] sm:$0xff]  ;;  %v60_v35 = vld [vmem:[%s624_s1 + $0x50] sm:$0xff]  ;;  %23 = vst.msk [vmem:[#allocation2 + $0x28] sm:$0xff] %vm17_vm0, %v389_v0 }
   0x9   :  { %347 = vmatpush3.bf16.msra.mxu0 %v346_v13  ;;  %381 = vmatpush3.bf16.msra.mxu1 %v346_v13  ;;  %v59_v30 = vld [vmem:[%s624_s1 + $0x48] sm:$0xff]  ;;  %v360_v34 = vpack.c.bf16 %v77_v32, %v76_v31  ;;  %v61_v36 = vld [vmem:[%s624_s1 + $0x58] sm:$0xff]  ;;  %v78_v37 = vld [vmem:[%s624_s1 + $0xe0] sm:$0xff]  ;;  %24 = vst.msk [vmem:[#allocation2 + $0x30] sm:$0xff] %vm17_vm0, %v389_v0 }
   0xa   :  { %349 = vmatprep.subr.bf16.mxu0 %v348_v14  ;;  %374 = vmatprep.subr.bf16.mxu1 %v348_v14  ;;  %v358_v33 = vpack.c.bf16 %v59_v30, %v58_v29  ;;  %v79_v38 = vld [vmem:[%s624_s1 + $0xe8] sm:$0xff]  ;;  %v362_v39 = vpack.c.bf16 %v61_v36, %v60_v35  ;;  %v62_v41 = vld [vmem:[%s624_s1 + $0x60] sm:$0xff]  ;;  %v80_v43 = vld [vmem:[%s624_s1 + $0xf0] sm:$0xff]  ;;  %25 = vst.msk [vmem:[#allocation2 + $0x38] sm:$0xff] %vm17_vm0, %v389_v0 }
   0xb   :  { %166 = vmatprep.mubr.f32.mxu1 %v43_v27  ;;  %v364_v40 = vpack.c.bf16 %v79_v38, %v78_v37  ;;  %v63_v42 = vld [vmem:[%s624_s1 + $0x68] sm:$0xff]  ;;  %v81_v44 = vld [vmem:[%s624_s1 + $0xf8] sm:$0xff]  ;;  %v64_v47 = vld [vmem:[%s624_s1 + $0x70] sm:$0xff] }
   0xc   :  { %v366_v45 = vpack.c.bf16 %v63_v42, %v62_v41  ;;  %v368_v46 = vpack.c.bf16 %v81_v44, %v80_v43  ;;  %v65_v48 = vld [vmem:[%s624_s1 + $0x78] sm:$0xff]  ;;  %v34_v50 = vld [vmem:[%s625_s0] sm:$0xff]  ;;  %v36_v54 = vld [vmem:[%s625_s0 + $0x10] sm:$0xff] }
   0xd   :  { %351 = vmatpush3.bf16.msra.mxu0 %v350_v19  ;;  %382 = vmatpush3.bf16.msra.mxu1 %v350_v19  ;;  %v370_v49 = vpack.c.bf16 %v65_v48, %v64_v47  ;;  %v42_v51 = vld [vmem:[%s625_s0 + $0x40] sm:$0xff]  ;;  %v37_v52 = vld [vmem:[%s625_s0 + $0x18] sm:$0xff]  ;;  %v44_v55 = vld [vmem:[%s625_s0 + $0x50] sm:$0xff] }
   0xe   :  { %353 = vmatprep.subr.bf16.mxu0 %v352_v20  ;;  %375 = vmatprep.subr.bf16.mxu1 %v352_v20  ;;  %v45_v53 = vld [vmem:[%s625_s0 + $0x58] sm:$0xff]  ;;  %v39_v56 = vld [vmem:[%s625_s0 + $0x28] sm:$0xff]  ;;  %v38_v58 = vld [vmem:[%s625_s0 + $0x20] sm:$0xff] }
   0xf   :  { %v47_v57 = vld [vmem:[%s625_s0 + $0x68] sm:$0xff]  ;;  %v46_v59 = vld [vmem:[%s625_s0 + $0x60] sm:$0xff]  ;;  %v41_v60 = vld [vmem:[%s625_s0 + $0x38] sm:$0xff] }
  0x10   :  { %v49_v61 = vld [vmem:[%s625_s0 + $0x78] sm:$0xff]  ;;  %v40_v62 = vld [vmem:[%s625_s0 + $0x30] sm:$0xff]  ;;  %v26_v3 = vld [vmem:[#allocation2] sm:$0xff] }
  0x11   :  { %355 = vmatpush3.bf16.msra.mxu0 %v354_v26  ;;  %383 = vmatpush3.bf16.msra.mxu1 %v354_v26  ;;  %v48_v63 = vld [vmem:[%s625_s0 + $0x70] sm:$0xff]  ;;  %v30_v5 = vld [vmem:[#allocation2 + $0x20] sm:$0xff]  ;;  %v27_v13 = vld [vmem:[#allocation2 + $0x8] sm:$0xff] }
  0x12   :  { %357 = vmatprep.subr.bf16.mxu0 %v356_v28  ;;  %376 = vmatprep.subr.bf16.mxu1 %v356_v28  ;;  %v31_v15 = vld [vmem:[#allocation2 + $0x28] sm:$0xff]  ;;  %v28_v23 = vld [vmem:[#allocation2 + $0x10] sm:$0xff]  ;;  %v29_v37 = vld [vmem:[#allocation2 + $0x18] sm:$0xff] }
  0x13   :  { %v32_v25 = vld [vmem:[#allocation2 + $0x30] sm:$0xff]  ;;  %v33_v38 = vld [vmem:[#allocation2 + $0x38] sm:$0xff] }
  0x15   :  { %359 = vmatpush3.bf16.msra.mxu0 %v358_v33  ;;  %384 = vmatpush3.bf16.msra.mxu1 %v358_v33 }
  0x16   :  { %361 = vmatprep.subr.bf16.mxu0 %v360_v34  ;;  %377 = vmatprep.subr.bf16.mxu1 %v360_v34 }
  0x19   :  { %363 = vmatpush3.bf16.msra.mxu0 %v362_v39  ;;  %385 = vmatpush3.bf16.msra.mxu1 %v362_v39 }
  0x1a   :  { %365 = vmatprep.subr.bf16.mxu0 %v364_v40  ;;  %378 = vmatprep.subr.bf16.mxu1 %v364_v40 }
  0x1d   :  { %367 = vmatpush3.bf16.msra.mxu0 %v366_v45  ;;  %386 = vmatpush3.bf16.msra.mxu1 %v366_v45 }
  0x1e   :  { %369 = vmatprep.subr.bf16.mxu0 %v368_v46  ;;  %379 = vmatprep.subr.bf16.mxu1 %v368_v46 }
  0x21   :  { %371 = vmatpush3.bf16.msra.mxu0 %v370_v49  ;;  %387 = vmatpush3.bf16.msra.mxu1 %v370_v49 }
  0x24   :  { %147 = vmatmul.mubr.f32.vlgmr.msra.gmra.mrb[0].mxu0 %v34_v50  ;;  %167 = vmatmul.mubr.f32.vlgmr.msra.gmra.mrb[0].mxu1 %v42_v51 }
  0x25   :  { %151 = vmatprep.mubr.f32.mxu0 %v37_v52  ;;  %171 = vmatprep.mubr.f32.mxu1 %v45_v53 }
  0x28   :  { %152 = vmatmul.mubr.f32.gmra.mrb[2].mxu0 %v36_v54  ;;  %172 = vmatmul.mubr.f32.gmra.mrb[2].mxu1 %v44_v55 }
  0x29   :  { %156 = vmatprep.mubr.f32.mxu0 %v39_v56  ;;  %176 = vmatprep.mubr.f32.mxu1 %v47_v57 }
  0x2c   :  { %157 = vmatmul.mubr.f32.gmra.mrb[4].mxu0 %v38_v58  ;;  %177 = vmatmul.mubr.f32.gmra.mrb[4].mxu1 %v46_v59 }
  0x2d   :  { %161 = vmatprep.mubr.f32.mxu0 %v41_v60  ;;  %181 = vmatprep.mubr.f32.mxu1 %v49_v61 }
  0x30   :  { %162 = vmatmul.mubr.f32.gmra.mrb[6].mxu0 %v40_v62  ;;  %182 = vmatmul.mubr.f32.gmra.mrb[6].mxu1 %v48_v63 }
  0xf7   :  { %v316_v1 = vpop.f32.mrb[0].mxu0  ;;  %v328_v2 = vpop.f32.mrb[0].mxu1 }
  0xf8   :  { %v317_v4 = vpop.f32.mrb[1].mxu0  ;;  %v329_v6 = vpop.f32.mrb[1].mxu1 }
  0xf9   :  { %v318_v7 = vadd.f32 %v317_v4, %v316_v1  ;;  %v330_v8 = vadd.f32 %v329_v6, %v328_v2 }
  0xfb   :  { %v187_v9 = vadd.f32 %v318_v7, %v26_v3  ;;  %v319_v10 = vpop.f32.mrb[2].mxu0  ;;  %v191_v11 = vadd.f32 %v330_v8, %v30_v5  ;;  %v331_v12 = vpop.f32.mrb[2].mxu1 }
  0xfc   :  { %v320_v14 = vpop.f32.mrb[3].mxu0  ;;  %v332_v16 = vpop.f32.mrb[3].mxu1 }
  0xfd   :  { %196 = vst.msk [vmem:[#allocation2] sm:$0xff] %vm17_vm0, %v187_v9  ;;  %v321_v17 = vadd.f32 %v320_v14, %v319_v10  ;;  %200 = vst.msk [vmem:[#allocation2 + $0x20] sm:$0xff] %vm17_vm0, %v191_v11  ;;  %v333_v18 = vadd.f32 %v332_v16, %v331_v12 }
  0xff   :  { %v188_v19 = vadd.f32 %v321_v17, %v27_v13  ;;  %v322_v20 = vpop.f32.mrb[4].mxu0  ;;  %v192_v21 = vadd.f32 %v333_v18, %v31_v15  ;;  %v334_v22 = vpop.f32.mrb[4].mxu1 }
 0x100   :  { %v323_v24 = vpop.f32.mrb[5].mxu0  ;;  %v335_v26 = vpop.f32.mrb[5].mxu1 }
 0x101   :  { %197 = vst.msk [vmem:[#allocation2 + $0x8] sm:$0xff] %vm17_vm0, %v188_v19  ;;  %v324_v27 = vadd.f32 %v323_v24, %v322_v20  ;;  %201 = vst.msk [vmem:[#allocation2 + $0x28] sm:$0xff] %vm17_vm0, %v192_v21  ;;  %v336_v28 = vadd.f32 %v335_v26, %v334_v22 }
 0x103   :  { %v189_v29 = vadd.f32 %v324_v27, %v28_v23  ;;  %v325_v30 = vpop.f32.mrb[6].mxu0  ;;  %v193_v31 = vadd.f32 %v336_v28, %v32_v25  ;;  %v337_v32 = vpop.f32.mrb[6].mxu1 }
 0x104   :  { %v207_v33 = vld [vmem:[#allocation2] sm:$0xff]  ;;  %v326_v35 = vpop.f32.mrb[7].mxu0  ;;  %v338_v36 = vpop.f32.mrb[7].mxu1 }
 0x105   :  { %v211_v34 = vld [vmem:[#allocation2 + $0x20] sm:$0xff]  ;;  %215 = vst.msk [vmem:[%s626_s2] sm:$0xff] %vm17_vm0, %v207_v33  ;;  %198 = vst.msk [vmem:[#allocation2 + $0x10] sm:$0xff] %vm17_vm0, %v189_v29  ;;  %v327_v39 = vadd.f32 %v326_v35, %v325_v30  ;;  %v339_v40 = vadd.f32 %v338_v36, %v337_v32  ;;  %v246_v46 = vmul.f32 %v207_v33, %v207_v33  ;;  %v223_v51 = vsel %vm17_vm0, %v207_v33, 0.0 }
 0x106   :  { %219 = vst.msk [vmem:[%s626_s2 + $0x20] sm:$0xff] %vm17_vm0, %v211_v34  ;;  %202 = vst.msk [vmem:[#allocation2 + $0x30] sm:$0xff] %vm17_vm0, %v193_v31  ;;  %v250_v61 = vmul.f32 %v211_v34, %v211_v34  ;;  %v230_v2 = vsel %vm17_vm0, %v211_v34, 0.0 }
 0x107   :  { %v190_v43 = vadd.f32 %v327_v39, %v29_v37  ;;  %v194_v44 = vadd.f32 %v339_v40, %v33_v38  ;;  %v254_v55 = vsel %vm17_vm0, %v246_v46, 0.0 }
 0x108   :  { %v208_v41 = vld [vmem:[#allocation2 + $0x8] sm:$0xff]  ;;  %v261_v7 = vsel %vm17_vm0, %v250_v61, 0.0 }
 0x109   :  { %v212_v42 = vld [vmem:[#allocation2 + $0x28] sm:$0xff]  ;;  %216 = vst.msk [vmem:[%s626_s2 + $0x8] sm:$0xff] %vm17_vm0, %v208_v41  ;;  %v247_v45 = vmul.f32 %v208_v41, %v208_v41  ;;  %199 = vst.msk [vmem:[#allocation2 + $0x18] sm:$0xff] %vm17_vm0, %v190_v43  ;;  %v224_v47 = vsel %vm17_vm0, %v208_v41, 0.0 }
 0x10a   :  { %220 = vst.msk [vmem:[%s626_s2 + $0x28] sm:$0xff] %vm17_vm0, %v212_v42  ;;  %203 = vst.msk [vmem:[#allocation2 + $0x38] sm:$0xff] %vm17_vm0, %v194_v44  ;;  %v225_v54 = vadd.f32 %v224_v47, %v223_v51  ;;  %v251_v3 = vmul.f32 %v212_v42, %v212_v42  ;;  %v232_v8 = vsel %vm17_vm0, %v212_v42, 0.0 }
 0x10b   :  { %v255_v52 = vsel %vm17_vm0, %v247_v45, 0.0 }
 0x10c   :  { %v209_v48 = vld [vmem:[#allocation2 + $0x10] sm:$0xff]  ;;  %v256_v57 = vadd.f32 %v255_v52, %v254_v55  ;;  %v263_v13 = vsel %vm17_vm0, %v251_v3, 0.0 }
 0x10d   :  { %v213_v49 = vld [vmem:[#allocation2 + $0x30] sm:$0xff]  ;;  %217 = vst.msk [vmem:[%s626_s2 + $0x10] sm:$0xff] %vm17_vm0, %v209_v48  ;;  %v248_v50 = vmul.f32 %v209_v48, %v209_v48  ;;  %v226_v53 = vsel %vm17_vm0, %v209_v48, 0.0 }
 0x10e   :  { %221 = vst.msk [vmem:[%s626_s2 + $0x30] sm:$0xff] %vm17_vm0, %v213_v49  ;;  %v227_v58 = vadd.f32 %v226_v53, %v225_v54  ;;  %v252_v9 = vmul.f32 %v213_v49, %v213_v49  ;;  %v234_v14 = vsel %vm17_vm0, %v213_v49, 0.0 }
 0x10f   :  { %v257_v56 = vsel %vm17_vm0, %v248_v50, 0.0 }
 0x110   :  { %v210_v59 = vld [vmem:[#allocation2 + $0x18] sm:$0xff]  ;;  %v258_v0 = vadd.f32 %v257_v56, %v256_v57  ;;  %v265_v18 = vsel %vm17_vm0, %v252_v9, 0.0 }
 0x111   :  { %v214_v60 = vld [vmem:[#allocation2 + $0x38] sm:$0xff]  ;;  %218 = vst.msk [vmem:[%s626_s2 + $0x18] sm:$0xff] %vm17_vm0, %v210_v59  ;;  %v228_v62 = vsel %vm17_vm0, %v210_v59, 0.0  ;;  %v249_v63 = vmul.f32 %v210_v59, %v210_v59 }
 0x112   :  { %222 = vst.msk [vmem:[%s626_s2 + $0x38] sm:$0xff] %vm17_vm0, %v214_v60  ;;  %v229_v1 = vadd.f32 %v228_v62, %v227_v58  ;;  %v253_v10 = vmul.f32 %v214_v60, %v214_v60  ;;  %v236_v15 = vsel %vm17_vm0, %v214_v60, 0.0 }
 0x113   :  { %v259_v4 = vsel %vm17_vm0, %v249_v63, 0.0 }
 0x114   :  { %v231_v5 = vadd.f32 %v230_v2, %v229_v1  ;;  %v260_v6 = vadd.f32 %v259_v4, %v258_v0  ;;  %v267_v19 = vsel %vm17_vm0, %v253_v10, 0.0 }
 0x116   :  { %v262_v11 = vadd.f32 %v261_v7, %v260_v6  ;;  %v233_v12 = vadd.f32 %v232_v8, %v231_v5 }
 0x118   :  { %v235_v16 = vadd.f32 %v234_v14, %v233_v12  ;;  %v264_v17 = vadd.f32 %v263_v13, %v262_v11 }
 0x11a   :  { %v266_v20 = vadd.f32 %v265_v18, %v264_v17  ;;  %v237_v21 = vadd.f32 %v236_v15, %v235_v16 }
 0x11c   :  { %v238_v22 = vrot.slane %v237_v21, 4  ;;  %v268_v23 = vadd.f32 %v267_v19, %v266_v20 }
 0x11e   :  { %v239_v24 = vadd.f32 %v238_v22, %v237_v21  ;;  %v269_v25 = vrot.slane %v268_v23, 4 }
 0x120   :  { %v240_v26 = vrot.slane %v239_v24, 2  ;;  %v270_v27 = vadd.f32 %v269_v25, %v268_v23 }
 0x122   :  { %v241_v28 = vadd.f32 %v240_v26, %v239_v24  ;;  %v271_v29 = vrot.slane %v270_v27, 2 }
 0x124   :  { %v242_v30 = vrot.slane %v241_v28, 1  ;;  %v272_v31 = vadd.f32 %v271_v29, %v270_v27 }
 0x126   :  { %v243_v32 = vadd.f32 %v242_v30, %v241_v28  ;;  %v273_v33 = vrot.slane %v272_v31, 1 }
 0x128   :  { %245 = vst.msk [vmem:[%s627_s3] sm:$0x1] %vm244_vm1, %v243_v32  ;;  %v274_v34 = vadd.f32 %v273_v33, %v272_v31 }
 0x12a   :  { %275 = vst.msk [vmem:[%s627_s3 + $0x1] sm:$0x1] %vm244_vm1, %v274_v34 }

</bundles_post_ra>
